<compile_context>
chip_gen: v7x
topology: tpu7x:2x2x1
jax: 0.10.0
libtpu: 0.0.40
codegen_flags: <defaults>
</compile_context>

<pallas_src>
import numpy as np
import jax
import jax.numpy as jnp
from jax import lax
from jax.experimental import pallas as pl
from jax.experimental.pallas import tpu as pltpu

# ----------------------- network geometry (fixed by the torch module) -----------------------
H0 = W0 = 28            # input spatial size (the 16*5*5 flatten requires 28x28 inputs)
C1, K1 = 6, 5           # conv1: 1 -> 6, 5x5
H1 = H0 - K1 + 1        # 24
P1 = H1 // 2            # 12   (after pool1)
C2, K2 = 16, 3          # conv2: 6 -> 16, 3x3
H2 = P1 - K2 + 1        # 10
P2 = H2 // 2            # 5    (after pool2)
NFEAT = C2 * P2 * P2    # 400
LANES = 128

# ----------------------- kernel tiling -----------------------
B_TILE = 16                          # images per grid step (8-32 per perf review)
ROWS_IN = B_TILE * H0                # 448 input rows per step; row = b*28 + h
R_Y1 = ROWS_IN - (K1 - 1)            # 444 conv1 rows  (valid content at h <= 23)
R_P1 = R_Y1 - 1                      # 443 pool1 rows  (valid at rows b*28 + 2*hp)
R_Y2 = R_P1 - 2 * (K2 - 1)           # 439 conv2 rows  (valid at rows b*28 + 2*ho)
R_P2 = R_Y2 - 2                      # 437 pool2 rows  (valid at rows b*28 + 4*hp2)


# ------------------------------------ the fused kernel ------------------------------------

def _lenet_kernel(x_ref, c1m_ref, c1b_ref, c2m_ref, c2b_ref, sel_ref,
                  f1m_ref, f1b_ref, f2m_ref, f2b_ref, f3m_ref, f3b_ref,
                  out_ref, m1_ref, p1_ref, mw_ref):
    """Full forward pass for B_TILE images, entirely in VMEM.

    The row coordinate of every intermediate is the flattened (image, height) index
    b*28 + h.  Width and channels live on lanes, with the width parity split across the
    two 128-lane halves so each 2x2 max-pool is a max of two aligned lane halves plus a
    max of two row-shifted windows read from a VMEM scratch.  Rows whose height falls
    outside the valid range hold garbage; they are never selected downstream.
    """
    f32 = jnp.float32

    # conv1 + bias + ReLU: one banded matmul per kernel row (kj and the width folded
    # into the packed weight's lanes), summed over row-shifted windows of the raw image
    # block -- the im2col lives only in the weight packing, never in HBM.
    y1 = jnp.dot(x_ref[pl.ds(0, R_Y1), :], c1m_ref[0], preferred_element_type=f32)
    for ki in range(1, K1):
        y1 = y1 + jnp.dot(x_ref[pl.ds(ki, R_Y1), :], c1m_ref[ki],
                          preferred_element_type=f32)
    y1 = jnp.maximum(y1 + c1b_ref[...], 0.0)                           # (R_Y1, 256)

    # 2x2 max-pool #1: width parity = lane halves, height parity = adjacent rows.
    m1_ref[...] = jnp.maximum(y1[:, :LANES], y1[:, LANES:])
    p1_ref[...] = jnp.maximum(m1_ref[pl.ds(0, R_P1), :],
                              m1_ref[pl.ds(1, R_P1), :])               # (R_P1, 128)

    # conv2 + bias + ReLU: same banded trick; (kj, in-channel) folded into the weight's
    # rows, output width parity split across the two lane halves.  3 matmuls, not 9.
    y2 = jnp.dot(p1_ref[pl.ds(0, R_Y2), :], c2m_ref[0], preferred_element_type=f32)
    for ki in range(1, K2):
        y2 = y2 + jnp.dot(p1_ref[pl.ds(2 * ki, R_Y2), :], c2m_ref[ki],
                          preferred_element_type=f32)
    y2 = jnp.maximum(y2 + c2b_ref[...], 0.0)                           # (R_Y2, 256)

    # 2x2 max-pool #2.
    mw_ref[...] = jnp.maximum(y2[:, :LANES], y2[:, LANES:])
    p2 = jnp.maximum(mw_ref[pl.ds(0, R_P2), :],
                     mw_ref[pl.ds(2, R_P2), :])                        # (R_P2, 128)

    # conv->fc transition + fc1: a 0/1 row-gather matmul packs the 5 valid feature rows
    # of every image together, then 5 accumulating matmuls absorb the lane-scattered,
    # flatten-permuted fc1 weight (all folded into f1m at pack time).
    g = jnp.dot(sel_ref[...], p2, preferred_element_type=f32)          # (5*B_TILE, 128)
    h = jnp.dot(g[0:B_TILE, :], f1m_ref[0], preferred_element_type=f32)
    for hp2 in range(1, P2):
        h = h + jnp.dot(g[hp2 * B_TILE:(hp2 + 1) * B_TILE, :], f1m_ref[hp2],
                        preferred_element_type=f32)
    h = jnp.maximum(h + f1b_ref[...], 0.0)                             # (B_TILE, 128)

    # fc2 + ReLU, fc3 -- weights lane-padded to 128, so the final store is lane-dense.
    h = jnp.maximum(jnp.dot(h, f2m_ref[...], preferred_element_type=f32)
                    + f2b_ref[...], 0.0)
    out_ref[...] = jnp.dot(h, f3m_ref[...], preferred_element_type=f32) + f3b_ref[...]


# ------------------------------------ kernel wrapper ------------------------------------

def _lenet_call(xf, p):
    n_pad = xf.shape[0] // H0
    grid = (n_pad // B_TILE,)
    f32 = jnp.float32
    return pl.pallas_call(
        _lenet_kernel,
        out_shape=jax.ShapeDtypeStruct((n_pad, LANES), f32),
        grid_spec=pltpu.PrefetchScalarGridSpec(
            num_scalar_prefetch=0,
            grid=grid,
            in_specs=[
                pl.BlockSpec((ROWS_IN, W0), lambda i: (i, 0)),              # raw images
                pl.BlockSpec((K1, W0, 2 * LANES), lambda i: (0, 0, 0)),     # conv1 bands
                pl.BlockSpec((1, 2 * LANES), lambda i: (0, 0)),             # conv1 bias
                pl.BlockSpec((K2, LANES, 2 * LANES), lambda i: (0, 0, 0)),  # conv2 bands
                pl.BlockSpec((1, 2 * LANES), lambda i: (0, 0)),             # conv2 bias
                pl.BlockSpec((P2 * B_TILE, R_P2), lambda i: (0, 0)),        # fc row-gather
                pl.BlockSpec((P2, LANES, LANES), lambda i: (0, 0, 0)),      # fc1 (by hp2)
                pl.BlockSpec((1, LANES), lambda i: (0, 0)),                 # fc1 bias
                pl.BlockSpec((LANES, LANES), lambda i: (0, 0)),             # fc2
                pl.BlockSpec((1, LANES), lambda i: (0, 0)),                 # fc2 bias
                pl.BlockSpec((LANES, LANES), lambda i: (0, 0)),             # fc3
                pl.BlockSpec((1, LANES), lambda i: (0, 0)),                 # fc3 bias
            ],
            out_specs=pl.BlockSpec((B_TILE, LANES), lambda i: (i, 0)),
            scratch_shapes=[
                pltpu.VMEM((R_Y1, LANES), f32),   # pool1 width-max
                pltpu.VMEM((R_P1, LANES), f32),   # pool1 output
                pltpu.VMEM((R_Y2, LANES), f32),   # pool2 width-max
            ],
        ),
        compiler_params=pltpu.CompilerParams(dimension_semantics=("parallel",)),
    )(xf, p["c1m"], p["c1b"], p["c2m"], p["c2b"], p["sel"],
      p["f1m"], p["f1b"], p["f2m"], p["f2b"], p["f3m"], p["f3b"])


@jax.jit
def net_forward(x, p):
    """Reproduces Net.forward on NCHW input x: (N, 1, 28, 28) -> (N, 10)."""
    n = x.shape[0]
    n_pad = ((n + B_TILE - 1) // B_TILE) * B_TILE
    xi = x.astype(jnp.float32).reshape(n, H0, W0)
    if n_pad != n:                                         # pad batch to a tile multiple
        xi = jnp.concatenate(
            [xi, jnp.zeros((n_pad - n, H0, W0), jnp.float32)], axis=0)
    xf = xi.reshape(n_pad * H0, W0)                        # row = b*28 + h (free reshape)
    logits = _lenet_call(xf, p)                            # (n_pad, 128) lane-dense
    return logits[:n, :10]


# ------------------------------------ parameter packing ------------------------------------

def init_raw_params(key):
    """PyTorch-layout parameters with nn.Conv2d / nn.Linear default uniform init ranges."""
    def uni(k, shape, fan_in):
        bound = 1.0 / np.sqrt(fan_in)
        return jax.random.uniform(k, shape, jnp.float32, -bound, bound)

    ks = jax.random.split(key, 10)
    return {
        "conv1_w": uni(ks[0], (C1, 1, K1, K1), 1 * K1 * K1),
        "conv1_b": uni(ks[1], (C1,), 1 * K1 * K1),
        "conv2_w": uni(ks[2], (C2, C1, K2, K2), C1 * K2 * K2),
        "conv2_b": uni(ks[3], (C2,), C1 * K2 * K2),
        "fc1_w": uni(ks[4], (120, NFEAT), NFEAT),
        "fc1_b": uni(ks[5], (120,), NFEAT),
        "fc2_w": uni(ks[6], (84, 120), 120),
        "fc2_b": uni(ks[7], (84,), 120),
        "fc3_w": uni(ks[8], (10, 84), 84),
        "fc3_b": uni(ks[9], (10,), 84),
    }


def pack_params(raw, b_tile=B_TILE):
    """One-time repack of the PyTorch-layout weights into the banded / lane-padded
    layouts the fused kernel consumes (nothing is repacked per forward call)."""
    f32 = np.float32
    w1 = np.asarray(raw["conv1_w"], f32)   # (6, 1, 5, 5)
    b1 = np.asarray(raw["conv1_b"], f32)
    w2 = np.asarray(raw["conv2_w"], f32)   # (16, 6, 3, 3)
    b2 = np.asarray(raw["conv2_b"], f32)
    fw1 = np.asarray(raw["fc1_w"], f32); fb1 = np.asarray(raw["fc1_b"], f32)
    fw2 = np.asarray(raw["fc2_w"], f32); fb2 = np.asarray(raw["fc2_b"], f32)
    fw3 = np.asarray(raw["fc3_w"], f32); fb3 = np.asarray(raw["fc3_b"], f32)

    # conv1 banded matrices: output lane 128*dw + 6*wp + c holds conv1(c) at width
    # w = 2*wp + dw; c1m[ki, j, lane] = w1[c, 0, ki, j - w] for j - w in [0, K1).
    c1m = np.zeros((K1, W0, 2 * LANES), f32)
    c1b = np.zeros((1, 2 * LANES), f32)
    for dw in range(2):
        for wp in range(P1):
            w = 2 * wp + dw
            col = 128 * dw + C1 * wp
            for c in range(C1):
                c1b[0, col + c] = b1[c]
                for ki in range(K1):
                    for kj in range(K1):
                        c1m[ki, w + kj, col + c] = w1[c, 0, ki, kj]

    # conv2 banded matrices: rows indexed by pool1's lane layout (6*wp + ci), columns by
    # conv2's parity-split lane layout (128*(wo%2) + 16*(wo//2) + co).
    c2m = np.zeros((K2, LANES, 2 * LANES), f32)
    c2b = np.zeros((1, 2 * LANES), f32)
    for wo in range(H2):
        col = 128 * (wo % 2) + C2 * (wo // 2)
        for co in range(C2):
            c2b[0, col + co] = b2[co]
            for ki in range(K2):
                for kj in range(K2):
                    for ci in range(C1):
                        c2m[ki, C1 * (wo + kj) + ci, col + co] = w2[co, ci, ki, kj]

    # fc1 split by pooled row hp2; folds torch's NCHW flatten (feature co*25 + hp2*5 + wp2)
    # and pool2's lane layout (16*wp2 + co) into the weight; lane-padded to 128.
    f1m = np.zeros((P2, LANES, LANES), f32)
    for hp2 in range(P2):
        for wp2 in range(P2):
            for co in range(C2):
                f1m[hp2, C2 * wp2 + co, :120] = fw1[:, co * (P2 * P2) + hp2 * P2 + wp2]
    f1b_p = np.zeros((1, LANES), f32); f1b_p[0, :120] = fb1
    f2m = np.zeros((LANES, LANES), f32); f2m[:120, :84] = fw2.T
    f2b_p = np.zeros((1, LANES), f32); f2b_p[0, :84] = fb2
    f3m = np.zeros((LANES, LANES), f32); f3m[:84, :10] = fw3.T
    f3b_p = np.zeros((1, LANES), f32); f3b_p[0, :10] = fb3

    # 0/1 row-gather matrix: picks pooled-feature row b*28 + 4*hp2 into row hp2*B + b.
    sel = np.zeros((P2 * b_tile, R_P2), f32)
    for hp2 in range(P2):
        for b in range(b_tile):
            sel[hp2 * b_tile + b, b * H0 + 4 * hp2] = 1.0

    packed = {"c1m": c1m, "c1b": c1b, "c2m": c2m, "c2b": c2b, "sel": sel,
              "f1m": f1m, "f1b": f1b_p, "f2m": f2m, "f2b": f2b_p,
              "f3m": f3m, "f3b": f3b_p}
    return {k: jnp.asarray(v) for k, v in packed.items()}


# ------------------------------------ plain-JAX reference ------------------------------------

def reference_forward(x, raw):
    """Plain-JAX reference of the PyTorch module (full f32 precision)."""
    with jax.default_matmul_precision("highest"):
        dn = ("NCHW", "OIHW", "NCHW")
        y = lax.conv_general_dilated(x, raw["conv1_w"], (1, 1), "VALID", dimension_numbers=dn)
        y = jnp.maximum(y + raw["conv1_b"][None, :, None, None], 0.0)
        y = lax.reduce_window(y, -jnp.inf, lax.max, (1, 1, 2, 2), (1, 1, 2, 2), "VALID")
        y = lax.conv_general_dilated(y, raw["conv2_w"], (1, 1), "VALID", dimension_numbers=dn)
        y = jnp.maximum(y + raw["conv2_b"][None, :, None, None], 0.0)
        y = lax.reduce_window(y, -jnp.inf, lax.max, (1, 1, 2, 2), (1, 1, 2, 2), "VALID")
        y = y.reshape(x.shape[0], NFEAT)
        y = jnp.maximum(y @ raw["fc1_w"].T + raw["fc1_b"], 0.0)
        y = jnp.maximum(y @ raw["fc2_w"].T + raw["fc2_b"], 0.0)
        return y @ raw["fc3_w"].T + raw["fc3_b"]


if __name__ == "__main__":
    key = jax.random.PRNGKey(0)
    k_x, k_p = jax.random.split(key)

    # Input must be 28x28 single-channel so the 16*5*5 flatten matches the module.
    x = jax.random.normal(k_x, (2, 1, H0, W0), dtype=jnp.float32)
    raw = init_raw_params(k_p)
    params = pack_params(raw)

    out = net_forward(x, params)
    out = jax.block_until_ready(out)
    assert out.shape == (2, 10), out.shape
    assert bool(jnp.all(jnp.isfinite(out)))

    ref = reference_forward(x, raw)
    err = float(jnp.max(jnp.abs(out - ref)))
    assert bool(jnp.allclose(out, ref, rtol=1e-2, atol=1e-2)), err

    print("KERNEL_OK")
</pallas_src>

<mosaic_0001>
module attributes {stable_mosaic.version = 11 : i64} {
  func.func @_lenet_kernel(%arg0: i32, %arg1: memref<448x28xf32, #tpu.memory_space<vmem>>, %arg2: memref<5x28x256xf32, #tpu.memory_space<vmem>>, %arg3: memref<1x256xf32, #tpu.memory_space<vmem>>, %arg4: memref<3x128x256xf32, #tpu.memory_space<vmem>>, %arg5: memref<1x256xf32, #tpu.memory_space<vmem>>, %arg6: memref<80x437xf32, #tpu.memory_space<vmem>>, %arg7: memref<5x128x128xf32, #tpu.memory_space<vmem>>, %arg8: memref<1x128xf32, #tpu.memory_space<vmem>>, %arg9: memref<128x128xf32, #tpu.memory_space<vmem>>, %arg10: memref<1x128xf32, #tpu.memory_space<vmem>>, %arg11: memref<128x128xf32, #tpu.memory_space<vmem>>, %arg12: memref<1x128xf32, #tpu.memory_space<vmem>>, %arg13: memref<16x128xf32, #tpu.memory_space<vmem>>, %arg14: memref<444x128xf32, #tpu.memory_space<vmem>>, %arg15: memref<443x128xf32, #tpu.memory_space<vmem>>, %arg16: memref<439x128xf32, #tpu.memory_space<vmem>>) attributes {dimension_semantics = [#tpu.dimension_semantics<parallel>], iteration_bounds = array<i64: 1>, scalar_prefetch = 0 : i64, scratch_operands = 3 : i64, tpu.core_type = #tpu.core_type<tc>, window_params = [{transform_indices = @transform_0, window_bounds = array<i64: 448, 28>}, {pipeline_mode = #tpu.pipeline_mode<synchronous>, transform_indices = @transform_1, window_bounds = array<i64: 5, 28, 256>}, {pipeline_mode = #tpu.pipeline_mode<synchronous>, transform_indices = @transform_2, window_bounds = array<i64: 1, 256>}, {pipeline_mode = #tpu.pipeline_mode<synchronous>, transform_indices = @transform_3, window_bounds = array<i64: 3, 128, 256>}, {pipeline_mode = #tpu.pipeline_mode<synchronous>, transform_indices = @transform_4, window_bounds = array<i64: 1, 256>}, {pipeline_mode = #tpu.pipeline_mode<synchronous>, transform_indices = @transform_5, window_bounds = array<i64: 80, 437>}, {pipeline_mode = #tpu.pipeline_mode<synchronous>, transform_indices = @transform_6, window_bounds = array<i64: 5, 128, 128>}, {pipeline_mode = #tpu.pipeline_mode<synchronous>, transform_indices = @transform_7, window_bounds = array<i64: 1, 128>}, {pipeline_mode = #tpu.pipeline_mode<synchronous>, transform_indices = @transform_8, window_bounds = array<i64: 128, 128>}, {pipeline_mode = #tpu.pipeline_mode<synchronous>, transform_indices = @transform_9, window_bounds = array<i64: 1, 128>}, {pipeline_mode = #tpu.pipeline_mode<synchronous>, transform_indices = @transform_10, window_bounds = array<i64: 128, 128>}, {pipeline_mode = #tpu.pipeline_mode<synchronous>, transform_indices = @transform_11, window_bounds = array<i64: 1, 128>}, {transform_indices = @transform_12, window_bounds = array<i64: 16, 128>}]} {
    %c0 = arith.constant 0 : index
    %c0_0 = arith.constant 0 : index
    %0 = vector.load %arg1[%c0, %c0_0] : memref<448x28xf32, #tpu.memory_space<vmem>>, vector<444x28xf32>
    %c0_1 = arith.constant 0 : index
    %c0_2 = arith.constant 0 : index
    %c0_3 = arith.constant 0 : index
    %1 = vector.load %arg2[%c0_1, %c0_2, %c0_3] : memref<5x28x256xf32, #tpu.memory_space<vmem>>, vector<1x28x256xf32>
    %2 = vector.shape_cast %1 : vector<1x28x256xf32> to vector<28x256xf32>
    %cst = arith.constant dense<0.000000e+00> : vector<444x256xf32>
    %3 = tpu.matmul %0, %2, %cst {dimension_numbers = #tpu.dot_dimension_numbers<[1], [0], [0], [1], [0, 0, 1, 1], [], []>} : vector<444x28xf32>, vector<28x256xf32>, vector<444x256xf32> -> vector<444x256xf32>
    %c1 = arith.constant 1 : index
    %c0_4 = arith.constant 0 : index
    %4 = vector.load %arg1[%c1, %c0_4] : memref<448x28xf32, #tpu.memory_space<vmem>>, vector<444x28xf32>
    %c1_5 = arith.constant 1 : index
    %c0_6 = arith.constant 0 : index
    %c0_7 = arith.constant 0 : index
    %5 = vector.load %arg2[%c1_5, %c0_6, %c0_7] : memref<5x28x256xf32, #tpu.memory_space<vmem>>, vector<1x28x256xf32>
    %6 = vector.shape_cast %5 : vector<1x28x256xf32> to vector<28x256xf32>
    %cst_8 = arith.constant dense<0.000000e+00> : vector<444x256xf32>
    %7 = tpu.matmul %4, %6, %cst_8 {dimension_numbers = #tpu.dot_dimension_numbers<[1], [0], [0], [1], [0, 0, 1, 1], [], []>} : vector<444x28xf32>, vector<28x256xf32>, vector<444x256xf32> -> vector<444x256xf32>
    %8 = arith.addf %3, %7 : vector<444x256xf32>
    %c2 = arith.constant 2 : index
    %c0_9 = arith.constant 0 : index
    %9 = vector.load %arg1[%c2, %c0_9] : memref<448x28xf32, #tpu.memory_space<vmem>>, vector<444x28xf32>
    %c2_10 = arith.constant 2 : index
    %c0_11 = arith.constant 0 : index
    %c0_12 = arith.constant 0 : index
    %10 = vector.load %arg2[%c2_10, %c0_11, %c0_12] : memref<5x28x256xf32, #tpu.memory_space<vmem>>, vector<1x28x256xf32>
    %11 = vector.shape_cast %10 : vector<1x28x256xf32> to vector<28x256xf32>
    %cst_13 = arith.constant dense<0.000000e+00> : vector<444x256xf32>
    %12 = tpu.matmul %9, %11, %cst_13 {dimension_numbers = #tpu.dot_dimension_numbers<[1], [0], [0], [1], [0, 0, 1, 1], [], []>} : vector<444x28xf32>, vector<28x256xf32>, vector<444x256xf32> -> vector<444x256xf32>
    %13 = arith.addf %8, %12 : vector<444x256xf32>
    %c3 = arith.constant 3 : index
    %c0_14 = arith.constant 0 : index
    %14 = vector.load %arg1[%c3, %c0_14] : memref<448x28xf32, #tpu.memory_space<vmem>>, vector<444x28xf32>
    %c3_15 = arith.constant 3 : index
    %c0_16 = arith.constant 0 : index
    %c0_17 = arith.constant 0 : index
    %15 = vector.load %arg2[%c3_15, %c0_16, %c0_17] : memref<5x28x256xf32, #tpu.memory_space<vmem>>, vector<1x28x256xf32>
    %16 = vector.shape_cast %15 : vector<1x28x256xf32> to vector<28x256xf32>
    %cst_18 = arith.constant dense<0.000000e+00> : vector<444x256xf32>
    %17 = tpu.matmul %14, %16, %cst_18 {dimension_numbers = #tpu.dot_dimension_numbers<[1], [0], [0], [1], [0, 0, 1, 1], [], []>} : vector<444x28xf32>, vector<28x256xf32>, vector<444x256xf32> -> vector<444x256xf32>
    %18 = arith.addf %13, %17 : vector<444x256xf32>
    %c4 = arith.constant 4 : index
    %c0_19 = arith.constant 0 : index
    %19 = vector.load %arg1[%c4, %c0_19] : memref<448x28xf32, #tpu.memory_space<vmem>>, vector<444x28xf32>
    %c4_20 = arith.constant 4 : index
    %c0_21 = arith.constant 0 : index
    %c0_22 = arith.constant 0 : index
    %20 = vector.load %arg2[%c4_20, %c0_21, %c0_22] : memref<5x28x256xf32, #tpu.memory_space<vmem>>, vector<1x28x256xf32>
    %21 = vector.shape_cast %20 : vector<1x28x256xf32> to vector<28x256xf32>
    %cst_23 = arith.constant dense<0.000000e+00> : vector<444x256xf32>
    %22 = tpu.matmul %19, %21, %cst_23 {dimension_numbers = #tpu.dot_dimension_numbers<[1], [0], [0], [1], [0, 0, 1, 1], [], []>} : vector<444x28xf32>, vector<28x256xf32>, vector<444x256xf32> -> vector<444x256xf32>
    %23 = arith.addf %18, %22 : vector<444x256xf32>
    %c0_24 = arith.constant 0 : index
    %c0_25 = arith.constant 0 : index
    %24 = vector.load %arg3[%c0_24, %c0_25] : memref<1x256xf32, #tpu.memory_space<vmem>>, vector<1x256xf32>
    %25 = vector.broadcast %24 : vector<1x256xf32> to vector<444x256xf32>
    %26 = arith.addf %23, %25 : vector<444x256xf32>
    %cst_26 = arith.constant 0.000000e+00 : f32
    %27 = vector.broadcast %cst_26 : f32 to vector<444x256xf32>
    %28 = arith.maximumf %26, %27 : vector<444x256xf32>
    %29 = vector.extract_strided_slice %28 {offsets = [0, 0], sizes = [444, 128], strides = [1, 1]} : vector<444x256xf32> to vector<444x128xf32>
    %30 = vector.extract_strided_slice %28 {offsets = [0, 128], sizes = [444, 128], strides = [1, 1]} : vector<444x256xf32> to vector<444x128xf32>
    %31 = arith.maximumf %29, %30 : vector<444x128xf32>
    %c0_27 = arith.constant 0 : index
    %c0_28 = arith.constant 0 : index
    %32 = vector.load %arg14[%c0_27, %c0_28] : memref<444x128xf32, #tpu.memory_space<vmem>>, vector<444x128xf32>
    tpu.vector_store %arg14[%c0_27, %c0_28], %31 {strides = array<i32>} : memref<444x128xf32, #tpu.memory_space<vmem>>, vector<444x128xf32>,
    %c0_29 = arith.constant 0 : index
    %c0_30 = arith.constant 0 : index
    %33 = vector.load %arg14[%c0_29, %c0_30] : memref<444x128xf32, #tpu.memory_space<vmem>>, vector<443x128xf32>
    %c1_31 = arith.constant 1 : index
    %c0_32 = arith.constant 0 : index
    %34 = vector.load %arg14[%c1_31, %c0_32] : memref<444x128xf32, #tpu.memory_space<vmem>>, vector<443x128xf32>
    %35 = arith.maximumf %33, %34 : vector<443x128xf32>
    %c0_33 = arith.constant 0 : index
    %c0_34 = arith.constant 0 : index
    %36 = vector.load %arg15[%c0_33, %c0_34] : memref<443x128xf32, #tpu.memory_space<vmem>>, vector<443x128xf32>
    tpu.vector_store %arg15[%c0_33, %c0_34], %35 {strides = array<i32>} : memref<443x128xf32, #tpu.memory_space<vmem>>, vector<443x128xf32>,
    %c0_35 = arith.constant 0 : index
    %c0_36 = arith.constant 0 : index
    %37 = vector.load %arg15[%c0_35, %c0_36] : memref<443x128xf32, #tpu.memory_space<vmem>>, vector<439x128xf32>
    %c0_37 = arith.constant 0 : index
    %c0_38 = arith.constant 0 : index
    %c0_39 = arith.constant 0 : index
    %38 = vector.load %arg4[%c0_37, %c0_38, %c0_39] : memref<3x128x256xf32, #tpu.memory_space<vmem>>, vector<1x128x256xf32>
    %39 = vector.shape_cast %38 : vector<1x128x256xf32> to vector<128x256xf32>
    %cst_40 = arith.constant dense<0.000000e+00> : vector<439x256xf32>
    %40 = tpu.matmul %37, %39, %cst_40 {dimension_numbers = #tpu.dot_dimension_numbers<[1], [0], [0], [1], [0, 0, 1, 1], [], []>} : vector<439x128xf32>, vector<128x256xf32>, vector<439x256xf32> -> vector<439x256xf32>
    %c2_41 = arith.constant 2 : index
    %c0_42 = arith.constant 0 : index
    %41 = vector.load %arg15[%c2_41, %c0_42] : memref<443x128xf32, #tpu.memory_space<vmem>>, vector<439x128xf32>
    %c1_43 = arith.constant 1 : index
    %c0_44 = arith.constant 0 : index
    %c0_45 = arith.constant 0 : index
    %42 = vector.load %arg4[%c1_43, %c0_44, %c0_45] : memref<3x128x256xf32, #tpu.memory_space<vmem>>, vector<1x128x256xf32>
    %43 = vector.shape_cast %42 : vector<1x128x256xf32> to vector<128x256xf32>
    %cst_46 = arith.constant dense<0.000000e+00> : vector<439x256xf32>
    %44 = tpu.matmul %41, %43, %cst_46 {dimension_numbers = #tpu.dot_dimension_numbers<[1], [0], [0], [1], [0, 0, 1, 1], [], []>} : vector<439x128xf32>, vector<128x256xf32>, vector<439x256xf32> -> vector<439x256xf32>
    %45 = arith.addf %40, %44 : vector<439x256xf32>
    %c4_47 = arith.constant 4 : index
    %c0_48 = arith.constant 0 : index
    %46 = vector.load %arg15[%c4_47, %c0_48] : memref<443x128xf32, #tpu.memory_space<vmem>>, vector<439x128xf32>
    %c2_49 = arith.constant 2 : index
    %c0_50 = arith.constant 0 : index
    %c0_51 = arith.constant 0 : index
    %47 = vector.load %arg4[%c2_49, %c0_50, %c0_51] : memref<3x128x256xf32, #tpu.memory_space<vmem>>, vector<1x128x256xf32>
    %48 = vector.shape_cast %47 : vector<1x128x256xf32> to vector<128x256xf32>
    %cst_52 = arith.constant dense<0.000000e+00> : vector<439x256xf32>
    %49 = tpu.matmul %46, %48, %cst_52 {dimension_numbers = #tpu.dot_dimension_numbers<[1], [0], [0], [1], [0, 0, 1, 1], [], []>} : vector<439x128xf32>, vector<128x256xf32>, vector<439x256xf32> -> vector<439x256xf32>
    %50 = arith.addf %45, %49 : vector<439x256xf32>
    %c0_53 = arith.constant 0 : index
    %c0_54 = arith.constant 0 : index
    %51 = vector.load %arg5[%c0_53, %c0_54] : memref<1x256xf32, #tpu.memory_space<vmem>>, vector<1x256xf32>
    %52 = vector.broadcast %51 : vector<1x256xf32> to vector<439x256xf32>
    %53 = arith.addf %50, %52 : vector<439x256xf32>
    %cst_55 = arith.constant 0.000000e+00 : f32
    %54 = vector.broadcast %cst_55 : f32 to vector<439x256xf32>
    %55 = arith.maximumf %53, %54 : vector<439x256xf32>
    %56 = vector.extract_strided_slice %55 {offsets = [0, 0], sizes = [439, 128], strides = [1, 1]} : vector<439x256xf32> to vector<439x128xf32>
    %57 = vector.extract_strided_slice %55 {offsets = [0, 128], sizes = [439, 128], strides = [1, 1]} : vector<439x256xf32> to vector<439x128xf32>
    %58 = arith.maximumf %56, %57 : vector<439x128xf32>
    %c0_56 = arith.constant 0 : index
    %c0_57 = arith.constant 0 : index
    %59 = vector.load %arg16[%c0_56, %c0_57] : memref<439x128xf32, #tpu.memory_space<vmem>>, vector<439x128xf32>
    tpu.vector_store %arg16[%c0_56, %c0_57], %58 {strides = array<i32>} : memref<439x128xf32, #tpu.memory_space<vmem>>, vector<439x128xf32>,
    %c0_58 = arith.constant 0 : index
    %c0_59 = arith.constant 0 : index
    %60 = vector.load %arg16[%c0_58, %c0_59] : memref<439x128xf32, #tpu.memory_space<vmem>>, vector<437x128xf32>
    %c2_60 = arith.constant 2 : index
    %c0_61 = arith.constant 0 : index
    %61 = vector.load %arg16[%c2_60, %c0_61] : memref<439x128xf32, #tpu.memory_space<vmem>>, vector<437x128xf32>
    %62 = arith.maximumf %60, %61 : vector<437x128xf32>
    %c0_62 = arith.constant 0 : index
    %c0_63 = arith.constant 0 : index
    %63 = vector.load %arg6[%c0_62, %c0_63] : memref<80x437xf32, #tpu.memory_space<vmem>>, vector<80x437xf32>
    %cst_64 = arith.constant dense<0.000000e+00> : vector<80x128xf32>
    %64 = tpu.matmul %63, %62, %cst_64 {dimension_numbers = #tpu.dot_dimension_numbers<[1], [0], [0], [1], [0, 0, 1, 1], [], []>} : vector<80x437xf32>, vector<437x128xf32>, vector<80x128xf32> -> vector<80x128xf32>
    %65 = vector.extract_strided_slice %64 {offsets = [0, 0], sizes = [16, 128], strides = [1, 1]} : vector<80x128xf32> to vector<16x128xf32>
    %c0_65 = arith.constant 0 : index
    %c0_66 = arith.constant 0 : index
    %c0_67 = arith.constant 0 : index
    %66 = vector.load %arg7[%c0_65, %c0_66, %c0_67] : memref<5x128x128xf32, #tpu.memory_space<vmem>>, vector<1x128x128xf32>
    %67 = vector.shape_cast %66 : vector<1x128x128xf32> to vector<128x128xf32>
    %cst_68 = arith.constant dense<0.000000e+00> : vector<16x128xf32>
    %68 = tpu.matmul %65, %67, %cst_68 {dimension_numbers = #tpu.dot_dimension_numbers<[1], [0], [0], [1], [0, 0, 1, 1], [], []>} : vector<16x128xf32>, vector<128x128xf32>, vector<16x128xf32> -> vector<16x128xf32>
    %69 = vector.extract_strided_slice %64 {offsets = [16, 0], sizes = [16, 128], strides = [1, 1]} : vector<80x128xf32> to vector<16x128xf32>
    %c1_69 = arith.constant 1 : index
    %c0_70 = arith.constant 0 : index
    %c0_71 = arith.constant 0 : index
    %70 = vector.load %arg7[%c1_69, %c0_70, %c0_71] : memref<5x128x128xf32, #tpu.memory_space<vmem>>, vector<1x128x128xf32>
    %71 = vector.shape_cast %70 : vector<1x128x128xf32> to vector<128x128xf32>
    %cst_72 = arith.constant dense<0.000000e+00> : vector<16x128xf32>
    %72 = tpu.matmul %69, %71, %cst_72 {dimension_numbers = #tpu.dot_dimension_numbers<[1], [0], [0], [1], [0, 0, 1, 1], [], []>} : vector<16x128xf32>, vector<128x128xf32>, vector<16x128xf32> -> vector<16x128xf32>
    %73 = arith.addf %68, %72 : vector<16x128xf32>
    %74 = vector.extract_strided_slice %64 {offsets = [32, 0], sizes = [16, 128], strides = [1, 1]} : vector<80x128xf32> to vector<16x128xf32>
    %c2_73 = arith.constant 2 : index
    %c0_74 = arith.constant 0 : index
    %c0_75 = arith.constant 0 : index
    %75 = vector.load %arg7[%c2_73, %c0_74, %c0_75] : memref<5x128x128xf32, #tpu.memory_space<vmem>>, vector<1x128x128xf32>
    %76 = vector.shape_cast %75 : vector<1x128x128xf32> to vector<128x128xf32>
    %cst_76 = arith.constant dense<0.000000e+00> : vector<16x128xf32>
    %77 = tpu.matmul %74, %76, %cst_76 {dimension_numbers = #tpu.dot_dimension_numbers<[1], [0], [0], [1], [0, 0, 1, 1], [], []>} : vector<16x128xf32>, vector<128x128xf32>, vector<16x128xf32> -> vector<16x128xf32>
    %78 = arith.addf %73, %77 : vector<16x128xf32>
    %79 = vector.extract_strided_slice %64 {offsets = [48, 0], sizes = [16, 128], strides = [1, 1]} : vector<80x128xf32> to vector<16x128xf32>
    %c3_77 = arith.constant 3 : index
    %c0_78 = arith.constant 0 : index
    %c0_79 = arith.constant 0 : index
    %80 = vector.load %arg7[%c3_77, %c0_78, %c0_79] : memref<5x128x128xf32, #tpu.memory_space<vmem>>, vector<1x128x128xf32>
    %81 = vector.shape_cast %80 : vector<1x128x128xf32> to vector<128x128xf32>
    %cst_80 = arith.constant dense<0.000000e+00> : vector<16x128xf32>
    %82 = tpu.matmul %79, %81, %cst_80 {dimension_numbers = #tpu.dot_dimension_numbers<[1], [0], [0], [1], [0, 0, 1, 1], [], []>} : vector<16x128xf32>, vector<128x128xf32>, vector<16x128xf32> -> vector<16x128xf32>
    %83 = arith.addf %78, %82 : vector<16x128xf32>
    %84 = vector.extract_strided_slice %64 {offsets = [64, 0], sizes = [16, 128], strides = [1, 1]} : vector<80x128xf32> to vector<16x128xf32>
    %c4_81 = arith.constant 4 : index
    %c0_82 = arith.constant 0 : index
    %c0_83 = arith.constant 0 : index
    %85 = vector.load %arg7[%c4_81, %c0_82, %c0_83] : memref<5x128x128xf32, #tpu.memory_space<vmem>>, vector<1x128x128xf32>
    %86 = vector.shape_cast %85 : vector<1x128x128xf32> to vector<128x128xf32>
    %cst_84 = arith.constant dense<0.000000e+00> : vector<16x128xf32>
    %87 = tpu.matmul %84, %86, %cst_84 {dimension_numbers = #tpu.dot_dimension_numbers<[1], [0], [0], [1], [0, 0, 1, 1], [], []>} : vector<16x128xf32>, vector<128x128xf32>, vector<16x128xf32> -> vector<16x128xf32>
    %88 = arith.addf %83, %87 : vector<16x128xf32>
    %c0_85 = arith.constant 0 : index
    %c0_86 = arith.constant 0 : index
    %89 = vector.load %arg8[%c0_85, %c0_86] : memref<1x128xf32, #tpu.memory_space<vmem>>, vector<1x128xf32>
    %90 = vector.broadcast %89 : vector<1x128xf32> to vector<16x128xf32>
    %91 = arith.addf %88, %90 : vector<16x128xf32>
    %cst_87 = arith.constant 0.000000e+00 : f32
    %92 = vector.broadcast %cst_87 : f32 to vector<16x128xf32>
    %93 = arith.maximumf %91, %92 : vector<16x128xf32>
    %c0_88 = arith.constant 0 : index
    %c0_89 = arith.constant 0 : index
    %94 = vector.load %arg9[%c0_88, %c0_89] : memref<128x128xf32, #tpu.memory_space<vmem>>, vector<128x128xf32>
    %cst_90 = arith.constant dense<0.000000e+00> : vector<16x128xf32>
    %95 = tpu.matmul %93, %94, %cst_90 {dimension_numbers = #tpu.dot_dimension_numbers<[1], [0], [0], [1], [0, 0, 1, 1], [], []>} : vector<16x128xf32>, vector<128x128xf32>, vector<16x128xf32> -> vector<16x128xf32>
    %c0_91 = arith.constant 0 : index
    %c0_92 = arith.constant 0 : index
    %96 = vector.load %arg10[%c0_91, %c0_92] : memref<1x128xf32, #tpu.memory_space<vmem>>, vector<1x128xf32>
    %97 = vector.broadcast %96 : vector<1x128xf32> to vector<16x128xf32>
    %98 = arith.addf %95, %97 : vector<16x128xf32>
    %cst_93 = arith.constant 0.000000e+00 : f32
    %99 = vector.broadcast %cst_93 : f32 to vector<16x128xf32>
    %100 = arith.maximumf %98, %99 : vector<16x128xf32>
    %c0_94 = arith.constant 0 : index
    %c0_95 = arith.constant 0 : index
    %101 = vector.load %arg11[%c0_94, %c0_95] : memref<128x128xf32, #tpu.memory_space<vmem>>, vector<128x128xf32>
    %cst_96 = arith.constant dense<0.000000e+00> : vector<16x128xf32>
    %102 = tpu.matmul %100, %101, %cst_96 {dimension_numbers = #tpu.dot_dimension_numbers<[1], [0], [0], [1], [0, 0, 1, 1], [], []>} : vector<16x128xf32>, vector<128x128xf32>, vector<16x128xf32> -> vector<16x128xf32>
    %c0_97 = arith.constant 0 : index
    %c0_98 = arith.constant 0 : index
    %103 = vector.load %arg12[%c0_97, %c0_98] : memref<1x128xf32, #tpu.memory_space<vmem>>, vector<1x128xf32>
    %104 = vector.broadcast %103 : vector<1x128xf32> to vector<16x128xf32>
    %105 = arith.addf %102, %104 : vector<16x128xf32>
    %c0_99 = arith.constant 0 : index
    %c0_100 = arith.constant 0 : index
    %106 = vector.load %arg13[%c0_99, %c0_100] : memref<16x128xf32, #tpu.memory_space<vmem>>, vector<16x128xf32>
    tpu.vector_store %arg13[%c0_99, %c0_100], %105 {strides = array<i32>} : memref<16x128xf32, #tpu.memory_space<vmem>>, vector<16x128xf32>,
    return
  }
  func.func @transform_0(%arg0: i32) -> (i32, i32) {
    %c0_i32 = arith.constant 0 : i32
    %c0_i32_0 = arith.constant 0 : i32
    return %arg0, %c0_i32 : i32, i32
  }
  func.func @transform_1(%arg0: i32) -> (i32, i32, i32) {
    %c0_i32 = arith.constant 0 : i32
    %c0_i32_0 = arith.constant 0 : i32
    %c0_i32_1 = arith.constant 0 : i32
    %c0_i32_2 = arith.constant 0 : i32
    return %c0_i32, %c0_i32_0, %c0_i32_1 : i32, i32, i32
  }
  func.func @transform_2(%arg0: i32) -> (i32, i32) {
    %c0_i32 = arith.constant 0 : i32
    %c0_i32_0 = arith.constant 0 : i32
    %c0_i32_1 = arith.constant 0 : i32
    return %c0_i32, %c0_i32_0 : i32, i32
  }
  func.func @transform_3(%arg0: i32) -> (i32, i32, i32) {
    %c0_i32 = arith.constant 0 : i32
    %c0_i32_0 = arith.constant 0 : i32
    %c0_i32_1 = arith.constant 0 : i32
    %c0_i32_2 = arith.constant 0 : i32
    return %c0_i32, %c0_i32_0, %c0_i32_1 : i32, i32, i32
  }
  func.func @transform_4(%arg0: i32) -> (i32, i32) {
    %c0_i32 = arith.constant 0 : i32
    %c0_i32_0 = arith.constant 0 : i32
    %c0_i32_1 = arith.constant 0 : i32
    return %c0_i32, %c0_i32_0 : i32, i32
  }
  func.func @transform_5(%arg0: i32) -> (i32, i32) {
    %c0_i32 = arith.constant 0 : i32
    %c0_i32_0 = arith.constant 0 : i32
    %c0_i32_1 = arith.constant 0 : i32
    return %c0_i32, %c0_i32_0 : i32, i32
  }
  func.func @transform_6(%arg0: i32) -> (i32, i32, i32) {
    %c0_i32 = arith.constant 0 : i32
    %c0_i32_0 = arith.constant 0 : i32
    %c0_i32_1 = arith.constant 0 : i32
    %c0_i32_2 = arith.constant 0 : i32
    return %c0_i32, %c0_i32_0, %c0_i32_1 : i32, i32, i32
  }
  func.func @transform_7(%arg0: i32) -> (i32, i32) {
    %c0_i32 = arith.constant 0 : i32
    %c0_i32_0 = arith.constant 0 : i32
    %c0_i32_1 = arith.constant 0 : i32
    return %c0_i32, %c0_i32_0 : i32, i32
  }
  func.func @transform_8(%arg0: i32) -> (i32, i32) {
    %c0_i32 = arith.constant 0 : i32
    %c0_i32_0 = arith.constant 0 : i32
    %c0_i32_1 = arith.constant 0 : i32
    return %c0_i32, %c0_i32_0 : i32, i32
  }
  func.func @transform_9(%arg0: i32) -> (i32, i32) {
    %c0_i32 = arith.constant 0 : i32
    %c0_i32_0 = arith.constant 0 : i32
    %c0_i32_1 = arith.constant 0 : i32
    return %c0_i32, %c0_i32_0 : i32, i32
  }
  func.func @transform_10(%arg0: i32) -> (i32, i32) {
    %c0_i32 = arith.constant 0 : i32
    %c0_i32_0 = arith.constant 0 : i32
    %c0_i32_1 = arith.constant 0 : i32
    return %c0_i32, %c0_i32_0 : i32, i32
  }
  func.func @transform_11(%arg0: i32) -> (i32, i32) {
    %c0_i32 = arith.constant 0 : i32
    %c0_i32_0 = arith.constant 0 : i32
    %c0_i32_1 = arith.constant 0 : i32
    return %c0_i32, %c0_i32_0 : i32, i32
  }
  func.func @transform_12(%arg0: i32) -> (i32, i32) {
    %c0_i32 = arith.constant 0 : i32
    %c0_i32_0 = arith.constant 0 : i32
    return %arg0, %c0_i32 : i32, i32
  }
}

</mosaic_0001>

<bundles_post_ra>
// kernel: net_forward.1
= control target key start
LH: loop header
LB: loop body
LE: loop exit
PB: predicated region body
PF: predicated region fallthrough
CT: control target
= control target key end

     0   :  { %17 = vsyncpa [#allocation6], 0  ;;  %s12395_s0 = inlined_call_operand.vmem [shape: f32[448,28], index: 0, kind: input, shape index: {}]   ;;  %s12396_s1 = inlined_call_operand.vmem [shape: f32[5,28,256], index: 1, kind: input, shape index: {}]   ;;  %s12397_s2 = inlined_call_operand.vmem [shape: f32[1,256], index: 2, kind: input, shape index: {}]   ;;  %s12398_s3 = inlined_call_operand.vmem [shape: f32[3,128,256], index: 3, kind: input, shape index: {}]   ;;  %s12399_s4 = inlined_call_operand.vmem [shape: f32[1,256], index: 4, kind: input, shape index: {}]   ;;  %s12400_s5 = inlined_call_operand.hbm [shape: f32[80,437], index: 5, kind: input, shape index: {}]   ;;  %s12401_s6 = inlined_call_operand.vmem [shape: f32[5,128,128], index: 6, kind: input, shape index: {}]   ;;  %s12402_s7 = inlined_call_operand.vmem [shape: f32[1,128], index: 7, kind: input, shape index: {}]   ;;  %s12403_s8 = inlined_call_operand.hbm [shape: f32[128,128], index: 8, kind: input, shape index: {}]   ;;  %s12404_s9 = inlined_call_operand.vmem [shape: f32[1,128], index: 9, kind: input, shape index: {}]   ;;  %s12405_s10 = inlined_call_operand.hbm [shape: f32[128,128], index: 10, kind: input, shape index: {}]   ;;  %s12406_s11 = inlined_call_operand.vmem [shape: f32[1,128], index: 11, kind: input, shape index: {}]   ;;  %s12407_s12 = inlined_call_operand.vmem [shape: f32[16,128], index: 12, kind: output, shape index: {}]  }
   0x1   :  { %18 = vsyncpa [#allocation8], 0  ;;  %s9335_s21 = smov [#allocation7]   ;;  %s9265_s25 = scalar_lea.hbm %s12403_s8, 2048 }
   0x2   :  { %s50_s22 = sshll.u32 %s9335_s21, 4  ;;  %p9266_p0 = scmp.ne.s32.totalorder %s12403_s8, %s9265_s25  ;;  %s51_s22 = int_to_ptr.vmem [resolvable:$true] %s50_s22 }
   0x3   :  { %p9269_p1 = scmp.lt.u32.totalorder %s9265_s25, %s12403_s8 }
   0x5   :  { %p9271_p2 = pnand %p9269_p1, %p9266_p0 }
   0x7   :  { %9274 = shalt.err (!%p9271_p2)
}
   0x8   :  { %s9275_s30 = scalar_lea.vmem %s51_s22, 2048  ;;  %p9280_p4 = scmp.lt.s32.totalorder %s51_s22, %s51_s22 }
   0x9   :  { %p9276_p3 = scmp.ne.s32.totalorder %s51_s22, %s9275_s30  ;;  %p9281_p5 = scmp.lt.s32.totalorder %s9275_s30, %s9275_s30 }
   0xb   :  { %p9282_p6 = por %p9281_p5, %p9280_p4 }
   0xd   :  { %p9283_p7 = pnand %p9282_p6, %p9276_p3 }
   0xf   :  { %9286 = shalt.err (!%p9283_p7)
}
  0x10   :  { %s9336_s13 = smov 128   ;;  %s9337_s14 = smov 8  }
  0x11   :  { %56 = dma.hbm_to_vmem [thread:$0]  %s12403_s8, 2048, %s51_s22, [#allocation8], %s9336_s13, %s9336_s13, %s9337_s14  }
  0x12   :  { %s9338_s17 = smov [#allocation5]   ;;  %s9287_s21 = scalar_lea.hbm %s12400_s5, 5120 }
  0x13   :  { %s34_s18 = sshll.u32 %s9338_s17, 4  ;;  %p9288_p8 = scmp.ne.s32.totalorder %s12400_s5, %s9287_s21  ;;  %s35_s18 = int_to_ptr.vmem [resolvable:$true] %s34_s18 }
  0x14   :  { %p9291_p9 = scmp.lt.u32.totalorder %s9287_s21, %s12400_s5 }
  0x16   :  { %p9293_p10 = pnand %p9291_p9, %p9288_p8 }
  0x18   :  { %9296 = shalt.err (!%p9293_p10)
}
  0x19   :  { %s9297_s27 = scalar_lea.vmem %s35_s18, 5120  ;;  %p9302_p12 = scmp.lt.s32.totalorder %s35_s18, %s35_s18 }
  0x1a   :  { %p9298_p11 = scmp.ne.s32.totalorder %s35_s18, %s9297_s27  ;;  %p9303_p13 = scmp.lt.s32.totalorder %s9297_s27, %s9297_s27 }
  0x1c   :  { %p9304_p0 = por %p9303_p13, %p9302_p12 }
  0x1e   :  { %p9305_p1 = pnand %p9304_p0, %p9298_p11 }
  0x20   :  { %9308 = shalt.err (!%p9305_p1)
}
  0x21   :  { %s9339_s8 = smov 512   ;;  %s9340_s22 = smov 32  }
  0x22   :  { %40 = dma.hbm_to_vmem [thread:$0]  %s12400_s5, 5120, %s35_s18, [#allocation6], %s9339_s8, %s9339_s8, %s9340_s22  }
  0x23   :  { %s9341_s30 = smov [#allocation9]   ;;  %s9309_s19 = scalar_lea.hbm %s12405_s10, 2048 }
  0x24   :  { %s64_s15 = sshll.u32 %s9341_s30, 4  ;;  %p9310_p2 = scmp.ne.s32.totalorder %s12405_s10, %s9309_s19  ;;  %s65_s15 = int_to_ptr.vmem [resolvable:$true] %s64_s15 }
  0x25   :  { %p9313_p3 = scmp.lt.u32.totalorder %s9309_s19, %s12405_s10 }
  0x27   :  { %p9315_p4 = pnand %p9313_p3, %p9310_p2 }
  0x29   :  { %9318 = shalt.err (!%p9315_p4)
}
  0x2a   :  { %s9319_s25 = scalar_lea.vmem %s65_s15, 2048  ;;  %p9324_p6 = scmp.lt.s32.totalorder %s65_s15, %s65_s15 }
  0x2b   :  { %p9320_p5 = scmp.ne.s32.totalorder %s65_s15, %s9319_s25  ;;  %p9325_p7 = scmp.lt.s32.totalorder %s9319_s25, %s9319_s25 }
  0x2d   :  { %p9326_p8 = por %p9325_p7, %p9324_p6 }
  0x2f   :  { %p9327_p9 = pnand %p9326_p8, %p9320_p5 }
  0x31   :  { %9330 = shalt.err (!%p9327_p9)
}
  0x32   :  { %70 = dma.hbm_to_vmem [thread:$0]  %s12405_s10, 2048, %s65_s15, [#allocation8], %s9336_s13, %s9336_s13, %s9337_s14  }
  0x33   :  { %9331 = dma.done.wait [#allocation6], 5120  }
  0x34   :  { %9332 = vsyncadd [#allocation6], 4294962176 }
  0x35   :  { %9333 = dma.done.wait [#allocation8], 4096  }
  0x36   :  { %9334 = vsyncadd [#allocation8], 4294963200  ;;  %v12410_v0 = vmov 0.0   ;;  %vm380_vm0 = vcmask 1043456   ;;  %v7244_v1 = vld [vmem:[%s12396_s1 + $0x48] sm:$0xff]  ;;  %v7246_v2 = vld [vmem:[%s12396_s1 + $0x58] sm:$0xff] }
  0x37   :  { %451 = vmatprep.mubr.f32.mxu0 %v12410_v0  ;;  %655 = vmatprep.mubr.f32.mxu1 %v12410_v0  ;;  %v7243_v3 = vld [vmem:[%s12396_s1 + $0x40] sm:$0xff]  ;;  %v8140_v4 = vpack.c.bf16 %v7246_v2, %v7244_v1  ;;  %v7245_v5 = vld [vmem:[%s12396_s1 + $0x50] sm:$0xff]  ;;  %v7248_v6 = vld [vmem:[%s12396_s1 + $0x68] sm:$0xff]  ;;  %vm9343_vm1 = vmmov 1   ;;  %vm211_vm3 = vcmask 228352   ;;  %vm6296_vm4 = vcmask 433152  }
  0x38   :  { %v7250_v7 = vld [vmem:[%s12396_s1 + $0x78] sm:$0xf]  ;;  %v8142_v8 = vpack.c.bf16 %v7245_v5, %v7243_v3  ;;  %vm9472_vm2 = vmpackc.low %vm380_vm0, %vm9343_vm1  ;;  %v7247_v11 = vld [vmem:[%s12396_s1 + $0x60] sm:$0xff]  ;;  %vm6327_vm5 = vcmask 1044480  }
  0x39   :  { %v8144_v9 = vpack.c.bf16 %v7250_v7, %v7248_v6  ;;  %v7249_v12 = vld [vmem:[%s12396_s1 + $0x70] sm:$0xf]  ;;  %8141 = vmatprep.subr.bf16.mxu0 %v8140_v4  ;;  %8575 = vmatprep.subr.bf16.mxu1 %v8140_v4  ;;  %v146_v14 = vld [vmem:[%s12395_s0 + $0x1] sm:$0xff]  ;;  %v141_v17 = vld [vmem:[%s12396_s1 + $0x18] sm:$0xff] }
  0x3a   :  { %8143 = vmatpush1.bf16.msra.mxu0 %v8142_v8  ;;  %v8147_v13 = vpack.c.bf16 %v7249_v12, %v7247_v11  ;;  %8577 = vmatpush1.bf16.msra.mxu1 %v8142_v8  ;;  %v147_v15 = vld [vmem:[%s12395_s0 + $0x9] sm:$0xff]  ;;  %v138_v18 = vld [vmem:[%s12396_s1] sm:$0xff]  ;;  %v145_v23 = vld [vmem:[%s12396_s1 + $0x38] sm:$0xf] }
  0x3b   :  { %8146 = vmatprep.subr.msk.bf16.mxu0 %vm9472_vm2, %v8144_v9  ;;  %8576 = vmatprep.subr.msk.bf16.mxu1 %vm9472_vm2, %v8144_v9  ;;  %v139_v16 = vld [vmem:[%s12396_s1 + $0x8] sm:$0xff]  ;;  %v140_v19 = vld [vmem:[%s12396_s1 + $0x10] sm:$0xff]  ;;  %v142_v26 = vld [vmem:[%s12396_s1 + $0x20] sm:$0xff] }
  0x3c   :  { %v8150_v20 = vpack.c.bf16 %v141_v17, %v139_v16  ;;  %v8152_v21 = vpack.c.bf16 %v140_v19, %v138_v18  ;;  %v143_v22 = vld [vmem:[%s12396_s1 + $0x28] sm:$0xff]  ;;  %v148_v24 = vld [vmem:[%s12395_s0 + $0x11] sm:$0xff]  ;;  %v149_v29 = vld [vmem:[%s12395_s0 + $0x19] sm:$0xff] }
  0x3d   :  { %v8154_v25 = vpack.c.bf16 %v145_v23, %v143_v22  ;;  %v144_v27 = vld [vmem:[%s12396_s1 + $0x30] sm:$0xf]  ;;  %v150_v30 = vld [vmem:[%s12395_s0 + $0x21] sm:$0xff]  ;;  %v153_v33 = vld [vmem:[%s12395_s0 + $0x39] sm:$0xff] }
  0x3e   :  { %8149 = vmatpush1.bf16.msk.msra.mxu0 %vm9472_vm2, %v8147_v13  ;;  %8578 = vmatpush1.bf16.msk.msra.mxu1 %vm9472_vm2, %v8147_v13  ;;  %v8157_v28 = vpack.c.bf16 %v144_v27, %v142_v26  ;;  %v151_v31 = vld [vmem:[%s12395_s0 + $0x29] sm:$0xff]  ;;  %v152_v32 = vld [vmem:[%s12395_s0 + $0x31] sm:$0xff]  ;;  %v154_v34 = vld [vmem:[%s12395_s0 + $0x41] sm:$0xff] }
  0x3f   :  { %8151 = vmatprep.subr.bf16.mxu0 %v8150_v20  ;;  %v155_v35 = vld [vmem:[%s12395_s0 + $0x49] sm:$0xff]  ;;  %v156_v36 = vld [vmem:[%s12395_s0 + $0x51] sm:$0xff]  ;;  %v157_v37 = vld [vmem:[%s12395_s0 + $0x59] sm:$0xff] }
  0x40   :  { %v158_v38 = vld [vmem:[%s12395_s0 + $0x61] sm:$0xff]  ;;  %v159_v39 = vld [vmem:[%s12395_s0 + $0x69] sm:$0xff]  ;;  %v160_v40 = vld [vmem:[%s12395_s0 + $0x71] sm:$0xff] }
  0x41   :  { %7253 = vmatmul.mubr.msk.f32.vlgmr.msra.gmra.mrb[0].mxu0 %vm211_vm3, %v146_v14  ;;  %v161_v41 = vld [vmem:[%s12395_s0 + $0x79] sm:$0xff]  ;;  %v162_v42 = vld [vmem:[%s12395_s0 + $0x81] sm:$0xff]  ;;  %v163_v43 = vld [vmem:[%s12395_s0 + $0x89] sm:$0xff] }
  0x42   :  { %457 = vmatprep.mubr.f32.mxu0 %v12410_v0  ;;  %8153 = vmatpush1.bf16.msra.mxu0 %v8152_v21  ;;  %v164_v44 = vld [vmem:[%s12395_s0 + $0x91] sm:$0xff]  ;;  %v165_v45 = vld [vmem:[%s12395_s0 + $0x99] sm:$0xff]  ;;  %v166_v46 = vld [vmem:[%s12395_s0 + $0xa1] sm:$0xff] }
  0x43   :  { %8156 = vmatprep.subr.msk.bf16.mxu0 %vm9472_vm2, %v8154_v25  ;;  %v167_v47 = vld [vmem:[%s12395_s0 + $0xa9] sm:$0xff]  ;;  %v168_v48 = vld [vmem:[%s12395_s0 + $0xb1] sm:$0xff]  ;;  %v169_v49 = vld [vmem:[%s12395_s0 + $0xb9] sm:$0xff] }
  0x44   :  { %v170_v50 = vld [vmem:[%s12395_s0 + $0xc1] sm:$0xff]  ;;  %v171_v51 = vld [vmem:[%s12395_s0 + $0xc9] sm:$0xff]  ;;  %v172_v52 = vld [vmem:[%s12395_s0 + $0xd1] sm:$0xff] }
  0x45   :  { %7254 = vmatmul.mubr.msk.f32.gmra.mrb[2].mxu0 %vm211_vm3, %v147_v15  ;;  %v173_v53 = vld [vmem:[%s12395_s0 + $0xd9] sm:$0xff]  ;;  %v174_v54 = vld [vmem:[%s12395_s0 + $0xe1] sm:$0xff]  ;;  %v175_v55 = vld [vmem:[%s12395_s0 + $0xe9] sm:$0xff] }
  0x46   :  { %463 = vmatprep.mubr.f32.mxu0 %v12410_v0  ;;  %8159 = vmatpush1.bf16.msk.msra.mxu0 %vm9472_vm2, %v8157_v28  ;;  %v176_v56 = vld [vmem:[%s12395_s0 + $0xf1] sm:$0xff]  ;;  %v177_v57 = vld [vmem:[%s12395_s0 + $0xf9] sm:$0xff]  ;;  %v7368_v58 = vld [vmem:[%s12396_s1 + $0x88] sm:$0xff] }
  0x47   :  { %v7370_v59 = vld [vmem:[%s12396_s1 + $0x98] sm:$0xff]  ;;  %v178_v60 = vld [vmem:[%s12395_s0 + $0x101] sm:$0xff]  ;;  %v179_v62 = vld [vmem:[%s12395_s0 + $0x109] sm:$0xff] }
  0x48   :  { %v8160_v61 = vpack.c.bf16 %v7370_v59, %v7368_v58  ;;  %v7367_v63 = vld [vmem:[%s12396_s1 + $0x80] sm:$0xff]  ;;  %v7369_v1 = vld [vmem:[%s12396_s1 + $0x90] sm:$0xff]  ;;  %v83_v4 = vld [vmem:[%s12395_s0 + $0x8] sm:$0xff] }
  0x49   :  { %7255 = vmatmul.mubr.msk.f32.gmra.mrb[4].mxu0 %vm211_vm3, %v148_v24  ;;  %v82_v2 = vld [vmem:[%s12395_s0] sm:$0xff]  ;;  %v8162_v3 = vpack.c.bf16 %v7369_v1, %v7367_v63  ;;  %v84_v5 = vld [vmem:[%s12395_s0 + $0x10] sm:$0xff]  ;;  %v85_v6 = vld [vmem:[%s12395_s0 + $0x18] sm:$0xff] }
  0x4a   :  { %469 = vmatprep.mubr.f32.mxu0 %v12410_v0  ;;  %8161 = vmatprep.subr.bf16.mxu0 %v8160_v61  ;;  %v86_v7 = vld [vmem:[%s12395_s0 + $0x20] sm:$0xff]  ;;  %v87_v8 = vld [vmem:[%s12395_s0 + $0x28] sm:$0xff]  ;;  %v88_v9 = vld [vmem:[%s12395_s0 + $0x30] sm:$0xff] }
  0x4b   :  { %v89_v11 = vld [vmem:[%s12395_s0 + $0x38] sm:$0xff]  ;;  %v90_v12 = vld [vmem:[%s12395_s0 + $0x40] sm:$0xff]  ;;  %v91_v13 = vld [vmem:[%s12395_s0 + $0x48] sm:$0xff] }
  0x4c   :  { %v92_v14 = vld [vmem:[%s12395_s0 + $0x50] sm:$0xff]  ;;  %v93_v15 = vld [vmem:[%s12395_s0 + $0x58] sm:$0xff]  ;;  %v94_v16 = vld [vmem:[%s12395_s0 + $0x60] sm:$0xff] }
  0x4d   :  { %7256 = vmatmul.mubr.msk.f32.gmra.mrb[6].mxu0 %vm211_vm3, %v149_v29  ;;  %v95_v17 = vld [vmem:[%s12395_s0 + $0x68] sm:$0xff]  ;;  %v96_v18 = vld [vmem:[%s12395_s0 + $0x70] sm:$0xff]  ;;  %v97_v19 = vld [vmem:[%s12395_s0 + $0x78] sm:$0xff] }
  0x4e   :  { %475 = vmatprep.mubr.f32.mxu0 %v12410_v0  ;;  %v98_v20 = vld [vmem:[%s12395_s0 + $0x80] sm:$0xff]  ;;  %v99_v21 = vld [vmem:[%s12395_s0 + $0x88] sm:$0xff]  ;;  %v100_v22 = vld [vmem:[%s12395_s0 + $0x90] sm:$0xff] }
  0x4f   :  { %v101_v23 = vld [vmem:[%s12395_s0 + $0x98] sm:$0xff]  ;;  %v102_v24 = vld [vmem:[%s12395_s0 + $0xa0] sm:$0xff]  ;;  %v103_v25 = vld [vmem:[%s12395_s0 + $0xa8] sm:$0xff] }
  0x50   :  { %v104_v26 = vld [vmem:[%s12395_s0 + $0xb0] sm:$0xff]  ;;  %v105_v27 = vld [vmem:[%s12395_s0 + $0xb8] sm:$0xff]  ;;  %v7372_v28 = vld [vmem:[%s12396_s1 + $0xa8] sm:$0xff] }
  0x51   :  { %7257 = vmatmul.mubr.msk.f32.gmra.mrb[8].mxu0 %vm211_vm3, %v150_v30  ;;  %v7374_v29 = vld [vmem:[%s12396_s1 + $0xb8] sm:$0xf]  ;;  %v130_v58 = vld [vmem:[%s12395_s0 + $0x180] sm:$0xff]  ;;  %v131_v59 = vld [vmem:[%s12395_s0 + $0x188] sm:$0xff] }
  0x52   :  { %481 = vmatprep.mubr.f32.mxu0 %v12410_v0  ;;  %v8164_v30 = vpack.c.bf16 %v7374_v29, %v7372_v28  ;;  %v133_v61 = vld [vmem:[%s12395_s0 + $0x198] sm:$0xff]  ;;  %v135_v63 = vld [vmem:[%s12395_s0 + $0x1a8] sm:$0xff] }
  0x53   :  { %v7434_v1 = vld [vmem:[%s12396_s1 + $0xc8] sm:$0xff]  ;;  %v1381_v28 = vld [vmem:[%s12395_s0 + $0x92] sm:$0xff]  ;;  %v1382_v29 = vld [vmem:[%s12395_s0 + $0x9a] sm:$0xff] }
  0x54   :  { %v2142_v10 = vld [vmem:[%s12395_s0 + $0xdb] sm:$0xff] }
  0x55   :  { %7258 = vmatmul.mubr.msk.f32.gmra.mrb[10].mxu0 %vm211_vm3, %v151_v31  ;;  %v7371_v31 = vld [vmem:[%s12396_s1 + $0xa0] sm:$0xff] }
  0x56   :  { %487 = vmatprep.mubr.f32.mxu0 %v12410_v0 }
  0x59   :  { %7259 = vmatmul.mubr.msk.f32.gmra.mrb[12].mxu0 %vm211_vm3, %v152_v32  ;;  %v7373_v32 = vld [vmem:[%s12396_s1 + $0xb0] sm:$0xf] }
  0x5a   :  { %493 = vmatprep.mubr.f32.mxu0 %v12410_v0 }
  0x5d   :  { %7260 = vmatmul.mubr.msk.f32.gmra.mrb[14].mxu0 %vm211_vm3, %v153_v33  ;;  %v8167_v33 = vpack.c.bf16 %v7373_v32, %v7371_v31  ;;  %v1384_v31 = vld [vmem:[%s12395_s0 + $0xaa] sm:$0xff]  ;;  %v1385_v32 = vld [vmem:[%s12395_s0 + $0xb2] sm:$0xff] }
  0x5e   :  { %499 = vmatprep.mubr.f32.mxu0 %v12410_v0 }
  0x61   :  { %7261 = vmatmul.mubr.msk.f32.gmra.mrb[16].mxu0 %vm211_vm3, %v154_v34  ;;  %v106_v34 = vld [vmem:[%s12395_s0 + $0xc0] sm:$0xff] }
  0x62   :  { %505 = vmatprep.mubr.f32.mxu0 %v12410_v0 }
  0x65   :  { %7262 = vmatmul.mubr.msk.f32.gmra.mrb[18].mxu0 %vm211_vm3, %v155_v35  ;;  %v107_v35 = vld [vmem:[%s12395_s0 + $0xc8] sm:$0xff] }
  0x66   :  { %511 = vmatprep.mubr.f32.mxu0 %v12410_v0 }
  0x69   :  { %7263 = vmatmul.mubr.msk.f32.gmra.mrb[20].mxu0 %vm211_vm3, %v156_v36  ;;  %v108_v36 = vld [vmem:[%s12395_s0 + $0xd0] sm:$0xff] }
  0x6a   :  { %517 = vmatprep.mubr.f32.mxu0 %v12410_v0 }
  0x6d   :  { %7264 = vmatmul.mubr.msk.f32.gmra.mrb[22].mxu0 %vm211_vm3, %v157_v37  ;;  %v109_v37 = vld [vmem:[%s12395_s0 + $0xd8] sm:$0xff] }
  0x6e   :  { %523 = vmatprep.mubr.f32.mxu0 %v12410_v0 }
  0x71   :  { %7265 = vmatmul.mubr.msk.f32.gmra.mrb[24].mxu0 %vm211_vm3, %v158_v38  ;;  %v110_v38 = vld [vmem:[%s12395_s0 + $0xe0] sm:$0xff] }
  0x72   :  { %529 = vmatprep.mubr.f32.mxu0 %v12410_v0 }
  0x75   :  { %7266 = vmatmul.mubr.msk.f32.gmra.mrb[26].mxu0 %vm211_vm3, %v159_v39  ;;  %v111_v39 = vld [vmem:[%s12395_s0 + $0xe8] sm:$0xff] }
  0x76   :  { %535 = vmatprep.mubr.f32.mxu0 %v12410_v0 }
  0x79   :  { %7267 = vmatmul.mubr.msk.f32.gmra.mrb[28].mxu0 %vm211_vm3, %v160_v40  ;;  %v112_v40 = vld [vmem:[%s12395_s0 + $0xf0] sm:$0xff] }
  0x7a   :  { %541 = vmatprep.mubr.f32.mxu0 %v12410_v0 }
  0x7d   :  { %7268 = vmatmul.mubr.msk.f32.gmra.mrb[30].mxu0 %vm211_vm3, %v161_v41  ;;  %v113_v41 = vld [vmem:[%s12395_s0 + $0xf8] sm:$0xff] }
  0x7e   :  { %547 = vmatprep.mubr.f32.mxu0 %v12410_v0 }
  0x81   :  { %7269 = vmatmul.mubr.msk.f32.gmra.mrb[32].mxu0 %vm211_vm3, %v162_v42  ;;  %v114_v42 = vld [vmem:[%s12395_s0 + $0x100] sm:$0xff] }
  0x82   :  { %553 = vmatprep.mubr.f32.mxu0 %v12410_v0 }
  0x85   :  { %7270 = vmatmul.mubr.msk.f32.gmra.mrb[34].mxu0 %vm211_vm3, %v163_v43  ;;  %v115_v43 = vld [vmem:[%s12395_s0 + $0x108] sm:$0xff] }
  0x86   :  { %559 = vmatprep.mubr.f32.mxu0 %v12410_v0 }
  0x89   :  { %7271 = vmatmul.mubr.msk.f32.gmra.mrb[36].mxu0 %vm211_vm3, %v164_v44  ;;  %v116_v44 = vld [vmem:[%s12395_s0 + $0x110] sm:$0xff] }
  0x8a   :  { %565 = vmatprep.mubr.f32.mxu0 %v12410_v0 }
  0x8d   :  { %7272 = vmatmul.mubr.msk.f32.gmra.mrb[38].mxu0 %vm211_vm3, %v165_v45  ;;  %v117_v45 = vld [vmem:[%s12395_s0 + $0x118] sm:$0xff] }
  0x8e   :  { %571 = vmatprep.mubr.f32.mxu0 %v12410_v0 }
  0x91   :  { %7273 = vmatmul.mubr.msk.f32.gmra.mrb[40].mxu0 %vm211_vm3, %v166_v46  ;;  %v118_v46 = vld [vmem:[%s12395_s0 + $0x120] sm:$0xff] }
  0x92   :  { %577 = vmatprep.mubr.f32.mxu0 %v12410_v0 }
  0x95   :  { %7274 = vmatmul.mubr.msk.f32.gmra.mrb[42].mxu0 %vm211_vm3, %v167_v47  ;;  %v119_v47 = vld [vmem:[%s12395_s0 + $0x128] sm:$0xff] }
  0x96   :  { %583 = vmatprep.mubr.f32.mxu0 %v12410_v0 }
  0x99   :  { %7275 = vmatmul.mubr.msk.f32.gmra.mrb[44].mxu0 %vm211_vm3, %v168_v48  ;;  %v120_v48 = vld [vmem:[%s12395_s0 + $0x130] sm:$0xff] }
  0x9a   :  { %589 = vmatprep.mubr.f32.mxu0 %v12410_v0 }
  0x9d   :  { %7276 = vmatmul.mubr.msk.f32.gmra.mrb[46].mxu0 %vm211_vm3, %v169_v49  ;;  %v121_v49 = vld [vmem:[%s12395_s0 + $0x138] sm:$0xff] }
  0x9e   :  { %595 = vmatprep.mubr.f32.mxu0 %v12410_v0 }
  0xa1   :  { %7277 = vmatmul.mubr.msk.f32.gmra.mrb[48].mxu0 %vm211_vm3, %v170_v50  ;;  %v122_v50 = vld [vmem:[%s12395_s0 + $0x140] sm:$0xff] }
  0xa2   :  { %601 = vmatprep.mubr.f32.mxu0 %v12410_v0 }
  0xa5   :  { %7278 = vmatmul.mubr.msk.f32.gmra.mrb[50].mxu0 %vm211_vm3, %v171_v51  ;;  %v123_v51 = vld [vmem:[%s12395_s0 + $0x148] sm:$0xff] }
  0xa6   :  { %607 = vmatprep.mubr.f32.mxu0 %v12410_v0 }
  0xa9   :  { %7279 = vmatmul.mubr.msk.f32.gmra.mrb[52].mxu0 %vm211_vm3, %v172_v52  ;;  %v124_v52 = vld [vmem:[%s12395_s0 + $0x150] sm:$0xff] }
  0xaa   :  { %613 = vmatprep.mubr.f32.mxu0 %v12410_v0 }
  0xad   :  { %7280 = vmatmul.mubr.msk.f32.gmra.mrb[54].mxu0 %vm211_vm3, %v173_v53  ;;  %v125_v53 = vld [vmem:[%s12395_s0 + $0x158] sm:$0xff] }
  0xae   :  { %619 = vmatprep.mubr.f32.mxu0 %v12410_v0 }
  0xb1   :  { %7281 = vmatmul.mubr.msk.f32.gmra.mrb[56].mxu0 %vm211_vm3, %v174_v54  ;;  %v126_v54 = vld [vmem:[%s12395_s0 + $0x160] sm:$0xff] }
  0xb2   :  { %625 = vmatprep.mubr.f32.mxu0 %v12410_v0 }
  0xb5   :  { %7282 = vmatmul.mubr.msk.f32.gmra.mrb[58].mxu0 %vm211_vm3, %v175_v55  ;;  %v127_v55 = vld [vmem:[%s12395_s0 + $0x168] sm:$0xff] }
  0xb6   :  { %631 = vmatprep.mubr.f32.mxu0 %v12410_v0 }
  0xb9   :  { %7283 = vmatmul.mubr.msk.f32.gmra.mrb[60].mxu0 %vm211_vm3, %v176_v56  ;;  %v128_v56 = vld [vmem:[%s12395_s0 + $0x170] sm:$0xff] }
  0xba   :  { %637 = vmatprep.mubr.f32.mxu0 %v12410_v0 }
  0xbd   :  { %7284 = vmatmul.mubr.msk.f32.gmra.mrb[62].mxu0 %vm211_vm3, %v177_v57  ;;  %v129_v57 = vld [vmem:[%s12395_s0 + $0x178] sm:$0xff] }
  0xbe   :  { %643 = vmatprep.mubr.f32.mxu0 %v12410_v0 }
  0xc1   :  { %7285 = vmatmul.mubr.msk.f32.gmra.mrb[64].mxu0 %vm211_vm3, %v178_v60  ;;  %v132_v60 = vld [vmem:[%s12395_s0 + $0x190] sm:$0xff] }
  0xc2   :  { %649 = vmatprep.mubr.f32.mxu0 %v12410_v0 }
  0xc5   :  { %7286 = vmatmul.mubr.msk.f32.gmra.mrb[66].mxu0 %vm211_vm3, %v179_v62  ;;  %v134_v62 = vld [vmem:[%s12395_s0 + $0x1a0] sm:$0xff] }
  0xc6   :  { %1026 = vmatprep.mubr.f32.mxu0 %v12410_v0 }
  0xc9   :  { %7311 = vmatmul.mubr.msk.f32.vlgmr.msra.gmra.mrb[0].mxu0 %vm211_vm3, %v82_v2  ;;  %v7436_v2 = vld [vmem:[%s12396_s1 + $0xd8] sm:$0xff] }
  0xca   :  { %1032 = vmatprep.mubr.f32.mxu0 %v12410_v0  ;;  %8163 = vmatpush1.bf16.msra.mxu0 %v8162_v3  ;;  %v136_v3 = vld [vmem:[%s12395_s0 + $0x1b0] sm:$0xff] }
  0xcb   :  { %8166 = vmatprep.subr.msk.bf16.mxu0 %vm9472_vm2, %v8164_v30  ;;  %v1383_v30 = vld [vmem:[%s12395_s0 + $0xa2] sm:$0xff] }
  0xcd   :  { %7312 = vmatmul.mubr.msk.f32.gmra.mrb[2].mxu0 %vm211_vm3, %v83_v4  ;;  %v8170_v4 = vpack.c.bf16 %v7436_v2, %v7434_v1  ;;  %v1411_v1 = vld [vmem:[%s12395_s0 + $0x182] sm:$0xff]  ;;  %v1412_v2 = vld [vmem:[%s12395_s0 + $0x18a] sm:$0xff] }
  0xce   :  { %1038 = vmatprep.mubr.f32.mxu0 %v12410_v0  ;;  %8169 = vmatpush1.bf16.msk.msra.mxu0 %vm9472_vm2, %v8167_v33  ;;  %v1386_v33 = vld [vmem:[%s12395_s0 + $0xba] sm:$0xff] }
  0xcf   :  { %8171 = vmatprep.subr.bf16.mxu0 %v8170_v4  ;;  %v1414_v4 = vld [vmem:[%s12395_s0 + $0x19a] sm:$0xff] }
  0xd1   :  { %7313 = vmatmul.mubr.msk.f32.gmra.mrb[4].mxu0 %vm211_vm3, %v84_v5  ;;  %v137_v5 = vld [vmem:[%s12395_s0 + $0x1b8] sm:$0xf] }
  0xd2   :  { %1044 = vmatprep.mubr.f32.mxu0 %v12410_v0 }
  0xd5   :  { %7314 = vmatmul.mubr.msk.f32.gmra.mrb[6].mxu0 %vm211_vm3, %v85_v6  ;;  %v7433_v6 = vld [vmem:[%s12396_s1 + $0xc0] sm:$0xff] }
  0xd6   :  { %1050 = vmatprep.mubr.f32.mxu0 %v12410_v0 }
  0xd9   :  { %7315 = vmatmul.mubr.msk.f32.gmra.mrb[8].mxu0 %vm211_vm3, %v86_v7  ;;  %v7435_v7 = vld [vmem:[%s12396_s1 + $0xd0] sm:$0xff] }
  0xda   :  { %1056 = vmatprep.mubr.f32.mxu0 %v12410_v0 }
  0xdd   :  { %7316 = vmatmul.mubr.msk.f32.gmra.mrb[10].mxu0 %vm211_vm3, %v87_v8  ;;  %v1363_v8 = vld [vmem:[%s12395_s0 + $0x2] sm:$0xff] }
  0xde   :  { %1062 = vmatprep.mubr.f32.mxu0 %v12410_v0 }
  0xe1   :  { %7317 = vmatmul.mubr.msk.f32.gmra.mrb[12].mxu0 %vm211_vm3, %v88_v9  ;;  %v8172_v9 = vpack.c.bf16 %v7435_v7, %v7433_v6  ;;  %v1416_v6 = vld [vmem:[%s12395_s0 + $0x1aa] sm:$0xff] }
  0xe2   :  { %1068 = vmatprep.mubr.f32.mxu0 %v12410_v0  ;;  %v7500_v7 = vld [vmem:[%s12396_s1 + $0x108] sm:$0xff] }
  0xe5   :  { %7318 = vmatmul.mubr.msk.f32.gmra.mrb[14].mxu0 %vm211_vm3, %v89_v11  ;;  %v1364_v11 = vld [vmem:[%s12395_s0 + $0xa] sm:$0xff] }
  0xe6   :  { %1074 = vmatprep.mubr.f32.mxu0 %v12410_v0 }
  0xe9   :  { %7319 = vmatmul.mubr.msk.f32.gmra.mrb[16].mxu0 %vm211_vm3, %v90_v12  ;;  %v1365_v12 = vld [vmem:[%s12395_s0 + $0x12] sm:$0xff] }
  0xea   :  { %1080 = vmatprep.mubr.f32.mxu0 %v12410_v0 }
  0xed   :  { %7320 = vmatmul.mubr.msk.f32.gmra.mrb[18].mxu0 %vm211_vm3, %v91_v13  ;;  %v1366_v13 = vld [vmem:[%s12395_s0 + $0x1a] sm:$0xff] }
  0xee   :  { %1086 = vmatprep.mubr.f32.mxu0 %v12410_v0 }
  0xf1   :  { %7321 = vmatmul.mubr.msk.f32.gmra.mrb[20].mxu0 %vm211_vm3, %v92_v14  ;;  %v1367_v14 = vld [vmem:[%s12395_s0 + $0x22] sm:$0xff] }
  0xf2   :  { %1092 = vmatprep.mubr.f32.mxu0 %v12410_v0 }
  0xf5   :  { %7322 = vmatmul.mubr.msk.f32.gmra.mrb[22].mxu0 %vm211_vm3, %v93_v15  ;;  %v1368_v15 = vld [vmem:[%s12395_s0 + $0x2a] sm:$0xff] }
  0xf6   :  { %1098 = vmatprep.mubr.f32.mxu0 %v12410_v0 }
  0xf9   :  { %7323 = vmatmul.mubr.msk.f32.gmra.mrb[24].mxu0 %vm211_vm3, %v94_v16  ;;  %v1369_v16 = vld [vmem:[%s12395_s0 + $0x32] sm:$0xff] }
  0xfa   :  { %1104 = vmatprep.mubr.f32.mxu0 %v12410_v0 }
  0xfd   :  { %7324 = vmatmul.mubr.msk.f32.gmra.mrb[26].mxu0 %vm211_vm3, %v95_v17  ;;  %v1370_v17 = vld [vmem:[%s12395_s0 + $0x3a] sm:$0xff] }
  0xfe   :  { %1110 = vmatprep.mubr.f32.mxu0 %v12410_v0 }
 0x101   :  { %7325 = vmatmul.mubr.msk.f32.gmra.mrb[28].mxu0 %vm211_vm3, %v96_v18  ;;  %v1371_v18 = vld [vmem:[%s12395_s0 + $0x42] sm:$0xff] }
 0x102   :  { %1116 = vmatprep.mubr.f32.mxu0 %v12410_v0 }
 0x105   :  { %7326 = vmatmul.mubr.msk.f32.gmra.mrb[30].mxu0 %vm211_vm3, %v97_v19  ;;  %v1372_v19 = vld [vmem:[%s12395_s0 + $0x4a] sm:$0xff] }
 0x106   :  { %1122 = vmatprep.mubr.f32.mxu0 %v12410_v0 }
 0x109   :  { %7327 = vmatmul.mubr.msk.f32.gmra.mrb[32].mxu0 %vm211_vm3, %v98_v20  ;;  %v1373_v20 = vld [vmem:[%s12395_s0 + $0x52] sm:$0xff] }
 0x10a   :  { %1128 = vmatprep.mubr.f32.mxu0 %v12410_v0 }
 0x10d   :  { %7328 = vmatmul.mubr.msk.f32.gmra.mrb[34].mxu0 %vm211_vm3, %v99_v21  ;;  %v1374_v21 = vld [vmem:[%s12395_s0 + $0x5a] sm:$0xff] }
 0x10e   :  { %1134 = vmatprep.mubr.f32.mxu0 %v12410_v0 }
 0x111   :  { %7329 = vmatmul.mubr.msk.f32.gmra.mrb[36].mxu0 %vm211_vm3, %v100_v22  ;;  %v1375_v22 = vld [vmem:[%s12395_s0 + $0x62] sm:$0xff] }
 0x112   :  { %1140 = vmatprep.mubr.f32.mxu0 %v12410_v0 }
 0x115   :  { %7330 = vmatmul.mubr.msk.f32.gmra.mrb[38].mxu0 %vm211_vm3, %v101_v23  ;;  %v1376_v23 = vld [vmem:[%s12395_s0 + $0x6a] sm:$0xff] }
 0x116   :  { %1146 = vmatprep.mubr.f32.mxu0 %v12410_v0 }
 0x119   :  { %7331 = vmatmul.mubr.msk.f32.gmra.mrb[40].mxu0 %vm211_vm3, %v102_v24  ;;  %v1377_v24 = vld [vmem:[%s12395_s0 + $0x72] sm:$0xff] }
 0x11a   :  { %1152 = vmatprep.mubr.f32.mxu0 %v12410_v0 }
 0x11d   :  { %7332 = vmatmul.mubr.msk.f32.gmra.mrb[42].mxu0 %vm211_vm3, %v103_v25  ;;  %v1378_v25 = vld [vmem:[%s12395_s0 + $0x7a] sm:$0xff] }
 0x11e   :  { %1158 = vmatprep.mubr.f32.mxu0 %v12410_v0 }
 0x121   :  { %7333 = vmatmul.mubr.msk.f32.gmra.mrb[44].mxu0 %vm211_vm3, %v104_v26  ;;  %v1379_v26 = vld [vmem:[%s12395_s0 + $0x82] sm:$0xff] }
 0x122   :  { %1164 = vmatprep.mubr.f32.mxu0 %v12410_v0 }
 0x125   :  { %7334 = vmatmul.mubr.msk.f32.gmra.mrb[46].mxu0 %vm211_vm3, %v105_v27  ;;  %v1380_v27 = vld [vmem:[%s12395_s0 + $0x8a] sm:$0xff] }
 0x126   :  { %1170 = vmatprep.mubr.f32.mxu0 %v12410_v0 }
 0x129   :  { %7335 = vmatmul.mubr.msk.f32.gmra.mrb[48].mxu0 %vm211_vm3, %v106_v34  ;;  %v7438_v34 = vld [vmem:[%s12396_s1 + $0xe8] sm:$0xff] }
 0x12a   :  { %1176 = vmatprep.mubr.f32.mxu0 %v12410_v0 }
 0x12d   :  { %7336 = vmatmul.mubr.msk.f32.gmra.mrb[50].mxu0 %vm211_vm3, %v107_v35  ;;  %v7440_v35 = vld [vmem:[%s12396_s1 + $0xf8] sm:$0xf] }
 0x12e   :  { %1182 = vmatprep.mubr.f32.mxu0 %v12410_v0 }
 0x131   :  { %7337 = vmatmul.mubr.msk.f32.gmra.mrb[52].mxu0 %vm211_vm3, %v108_v36  ;;  %v8174_v36 = vpack.c.bf16 %v7440_v35, %v7438_v34  ;;  %v2133_v34 = vld [vmem:[%s12395_s0 + $0x93] sm:$0xff]  ;;  %v2134_v35 = vld [vmem:[%s12395_s0 + $0x9b] sm:$0xff] }
 0x132   :  { %1188 = vmatprep.mubr.f32.mxu0 %v12410_v0 }
 0x135   :  { %7338 = vmatmul.mubr.msk.f32.gmra.mrb[54].mxu0 %vm211_vm3, %v109_v37  ;;  %v7437_v37 = vld [vmem:[%s12396_s1 + $0xe0] sm:$0xff] }
 0x136   :  { %1194 = vmatprep.mubr.f32.mxu0 %v12410_v0 }
 0x139   :  { %7339 = vmatmul.mubr.msk.f32.gmra.mrb[56].mxu0 %vm211_vm3, %v110_v38  ;;  %v7439_v38 = vld [vmem:[%s12396_s1 + $0xf0] sm:$0xf] }
 0x13a   :  { %1200 = vmatprep.mubr.f32.mxu0 %v12410_v0 }
 0x13d   :  { %7340 = vmatmul.mubr.msk.f32.gmra.mrb[58].mxu0 %vm211_vm3, %v111_v39  ;;  %v8177_v39 = vpack.c.bf16 %v7439_v38, %v7437_v37  ;;  %v2136_v37 = vld [vmem:[%s12395_s0 + $0xab] sm:$0xff]  ;;  %v2137_v38 = vld [vmem:[%s12395_s0 + $0xb3] sm:$0xff] }
 0x13e   :  { %1206 = vmatprep.mubr.f32.mxu0 %v12410_v0 }
 0x141   :  { %7341 = vmatmul.mubr.msk.f32.gmra.mrb[60].mxu0 %vm211_vm3, %v112_v40  ;;  %v1387_v40 = vld [vmem:[%s12395_s0 + $0xc2] sm:$0xff] }
 0x142   :  { %1212 = vmatprep.mubr.f32.mxu0 %v12410_v0 }
 0x145   :  { %7342 = vmatmul.mubr.msk.f32.gmra.mrb[62].mxu0 %vm211_vm3, %v113_v41  ;;  %v1388_v41 = vld [vmem:[%s12395_s0 + $0xca] sm:$0xff] }
 0x146   :  { %1218 = vmatprep.mubr.f32.mxu0 %v12410_v0 }
 0x149   :  { %7343 = vmatmul.mubr.msk.f32.gmra.mrb[64].mxu0 %vm211_vm3, %v114_v42  ;;  %v1389_v42 = vld [vmem:[%s12395_s0 + $0xd2] sm:$0xff] }
 0x14a   :  { %1224 = vmatprep.mubr.f32.mxu0 %v12410_v0 }
 0x14d   :  { %7344 = vmatmul.mubr.msk.f32.gmra.mrb[66].mxu0 %vm211_vm3, %v115_v43  ;;  %v1390_v43 = vld [vmem:[%s12395_s0 + $0xda] sm:$0xff] }
 0x14e   :  { %1230 = vmatprep.mubr.f32.mxu0 %v12410_v0 }
 0x151   :  { %7345 = vmatmul.mubr.msk.f32.gmra.mrb[68].mxu0 %vm211_vm3, %v116_v44  ;;  %v1391_v44 = vld [vmem:[%s12395_s0 + $0xe2] sm:$0xff] }
 0x152   :  { %1236 = vmatprep.mubr.f32.mxu0 %v12410_v0 }
 0x155   :  { %7346 = vmatmul.mubr.msk.f32.gmra.mrb[70].mxu0 %vm211_vm3, %v117_v45  ;;  %v1392_v45 = vld [vmem:[%s12395_s0 + $0xea] sm:$0xff] }
 0x156   :  { %1242 = vmatprep.mubr.f32.mxu0 %v12410_v0 }
 0x159   :  { %7347 = vmatmul.mubr.msk.f32.gmra.mrb[72].mxu0 %vm211_vm3, %v118_v46  ;;  %v1393_v46 = vld [vmem:[%s12395_s0 + $0xf2] sm:$0xff] }
 0x15a   :  { %1248 = vmatprep.mubr.f32.mxu0 %v12410_v0 }
 0x15d   :  { %7348 = vmatmul.mubr.msk.f32.gmra.mrb[74].mxu0 %vm211_vm3, %v119_v47  ;;  %v1394_v47 = vld [vmem:[%s12395_s0 + $0xfa] sm:$0xff] }
 0x15e   :  { %1254 = vmatprep.mubr.f32.mxu0 %v12410_v0 }
 0x161   :  { %7349 = vmatmul.mubr.msk.f32.gmra.mrb[76].mxu0 %vm211_vm3, %v120_v48  ;;  %v1395_v48 = vld [vmem:[%s12395_s0 + $0x102] sm:$0xff] }
 0x162   :  { %1260 = vmatprep.mubr.f32.mxu0 %v12410_v0 }
 0x165   :  { %7350 = vmatmul.mubr.msk.f32.gmra.mrb[78].mxu0 %vm211_vm3, %v121_v49  ;;  %v1396_v49 = vld [vmem:[%s12395_s0 + $0x10a] sm:$0xff] }
 0x166   :  { %1266 = vmatprep.mubr.f32.mxu0 %v12410_v0 }
 0x169   :  { %7351 = vmatmul.mubr.msk.f32.gmra.mrb[80].mxu0 %vm211_vm3, %v122_v50  ;;  %v1397_v50 = vld [vmem:[%s12395_s0 + $0x112] sm:$0xff] }
 0x16a   :  { %1272 = vmatprep.mubr.f32.mxu0 %v12410_v0 }
 0x16d   :  { %7352 = vmatmul.mubr.msk.f32.gmra.mrb[82].mxu0 %vm211_vm3, %v123_v51  ;;  %v1398_v51 = vld [vmem:[%s12395_s0 + $0x11a] sm:$0xff] }
 0x16e   :  { %1278 = vmatprep.mubr.f32.mxu0 %v12410_v0 }
 0x171   :  { %7353 = vmatmul.mubr.msk.f32.gmra.mrb[84].mxu0 %vm211_vm3, %v124_v52  ;;  %v1399_v52 = vld [vmem:[%s12395_s0 + $0x122] sm:$0xff] }
 0x172   :  { %1284 = vmatprep.mubr.f32.mxu0 %v12410_v0 }
 0x175   :  { %7354 = vmatmul.mubr.msk.f32.gmra.mrb[86].mxu0 %vm211_vm3, %v125_v53  ;;  %v1400_v53 = vld [vmem:[%s12395_s0 + $0x12a] sm:$0xff] }
 0x176   :  { %1290 = vmatprep.mubr.f32.mxu0 %v12410_v0 }
 0x179   :  { %7355 = vmatmul.mubr.msk.f32.gmra.mrb[88].mxu0 %vm211_vm3, %v126_v54  ;;  %v1401_v54 = vld [vmem:[%s12395_s0 + $0x132] sm:$0xff] }
 0x17a   :  { %1296 = vmatprep.mubr.f32.mxu0 %v12410_v0 }
 0x17d   :  { %7356 = vmatmul.mubr.msk.f32.gmra.mrb[90].mxu0 %vm211_vm3, %v127_v55  ;;  %v1402_v55 = vld [vmem:[%s12395_s0 + $0x13a] sm:$0xff] }
 0x17e   :  { %1302 = vmatprep.mubr.f32.mxu0 %v12410_v0 }
 0x181   :  { %7357 = vmatmul.mubr.msk.f32.gmra.mrb[92].mxu0 %vm211_vm3, %v128_v56  ;;  %v1403_v56 = vld [vmem:[%s12395_s0 + $0x142] sm:$0xff] }
 0x182   :  { %1308 = vmatprep.mubr.f32.mxu0 %v12410_v0 }
 0x185   :  { %7358 = vmatmul.mubr.msk.f32.gmra.mrb[94].mxu0 %vm211_vm3, %v129_v57  ;;  %v1404_v57 = vld [vmem:[%s12395_s0 + $0x14a] sm:$0xff] }
 0x186   :  { %1314 = vmatprep.mubr.f32.mxu0 %v12410_v0 }
 0x189   :  { %7359 = vmatmul.mubr.msk.f32.gmra.mrb[96].mxu0 %vm211_vm3, %v130_v58  ;;  %v1405_v58 = vld [vmem:[%s12395_s0 + $0x152] sm:$0xff] }
 0x18a   :  { %1320 = vmatprep.mubr.f32.mxu0 %v12410_v0 }
 0x18d   :  { %7360 = vmatmul.mubr.msk.f32.gmra.mrb[98].mxu0 %vm211_vm3, %v131_v59  ;;  %v1406_v59 = vld [vmem:[%s12395_s0 + $0x15a] sm:$0xff] }
 0x18e   :  { %1326 = vmatprep.mubr.f32.mxu0 %v12410_v0 }
 0x191   :  { %7361 = vmatmul.mubr.msk.f32.gmra.mrb[100].mxu0 %vm211_vm3, %v132_v60  ;;  %v1407_v60 = vld [vmem:[%s12395_s0 + $0x162] sm:$0xff] }
 0x192   :  { %1332 = vmatprep.mubr.f32.mxu0 %v12410_v0 }
 0x195   :  { %7362 = vmatmul.mubr.msk.f32.gmra.mrb[102].mxu0 %vm211_vm3, %v133_v61  ;;  %v1408_v61 = vld [vmem:[%s12395_s0 + $0x16a] sm:$0xff] }
 0x196   :  { %1338 = vmatprep.mubr.f32.mxu0 %v12410_v0 }
 0x199   :  { %7363 = vmatmul.mubr.msk.f32.gmra.mrb[104].mxu0 %vm211_vm3, %v134_v62  ;;  %v1409_v62 = vld [vmem:[%s12395_s0 + $0x172] sm:$0xff] }
 0x19a   :  { %1344 = vmatprep.mubr.f32.mxu0 %v12410_v0 }
 0x19d   :  { %7364 = vmatmul.mubr.msk.f32.gmra.mrb[106].mxu0 %vm211_vm3, %v135_v63  ;;  %v1410_v63 = vld [vmem:[%s12395_s0 + $0x17a] sm:$0xff] }
 0x19e   :  { %1350 = vmatprep.mubr.f32.mxu0 %v12410_v0 }
 0x1a1   :  { %7365 = vmatmul.mubr.msk.f32.gmra.mrb[108].mxu0 %vm211_vm3, %v136_v3  ;;  %v1413_v3 = vld [vmem:[%s12395_s0 + $0x192] sm:$0xff] }
 0x1a2   :  { %1356 = vmatprep.mubr.f32.mxu0 %v12410_v0 }
 0x1a5   :  { %7366 = vmatmul.mubr.msk.f32.gmra.mrb[110].mxu0 %vm211_vm3, %v137_v5  ;;  %v1415_v5 = vld [vmem:[%s12395_s0 + $0x1a2] sm:$0xff] }
 0x1a6   :  { %1666 = vmatprep.mubr.f32.mxu0 %v12410_v0 }
 0x1a9   :  { %7377 = vmatmul.mubr.msk.f32.vlgmr.msra.gmra.mrb[0].mxu0 %vm211_vm3, %v1363_v8  ;;  %v7502_v8 = vld [vmem:[%s12396_s1 + $0x118] sm:$0xff] }
 0x1aa   :  { %1672 = vmatprep.mubr.f32.mxu0 %v12410_v0  ;;  %8173 = vmatpush1.bf16.msra.mxu0 %v8172_v9  ;;  %v1417_v9 = vld [vmem:[%s12395_s0 + $0x1b2] sm:$0xff] }
 0x1ab   :  { %8176 = vmatprep.subr.msk.bf16.mxu0 %vm9472_vm2, %v8174_v36  ;;  %v2135_v36 = vld [vmem:[%s12395_s0 + $0xa3] sm:$0xff] }
 0x1ad   :  { %7378 = vmatmul.mubr.msk.f32.gmra.mrb[2].mxu0 %vm211_vm3, %v1364_v11  ;;  %v8180_v11 = vpack.c.bf16 %v7502_v8, %v7500_v7  ;;  %v2164_v7 = vld [vmem:[%s12395_s0 + $0x18b] sm:$0xff]  ;;  %v2165_v8 = vld [vmem:[%s12395_s0 + $0x193] sm:$0xff] }
 0x1ae   :  { %1678 = vmatprep.mubr.f32.mxu0 %v12410_v0  ;;  %8179 = vmatpush1.bf16.msk.msra.mxu0 %vm9472_vm2, %v8177_v39  ;;  %v2138_v39 = vld [vmem:[%s12395_s0 + $0xbb] sm:$0xff] }
 0x1af   :  { %8181 = vmatprep.subr.bf16.mxu0 %v8180_v11  ;;  %v2167_v11 = vld [vmem:[%s12395_s0 + $0x1a3] sm:$0xff] }
 0x1b1   :  { %7379 = vmatmul.mubr.msk.f32.gmra.mrb[4].mxu0 %vm211_vm3, %v1365_v12  ;;  %v1418_v12 = vld [vmem:[%s12395_s0 + $0x1ba] sm:$0xf] }
 0x1b2   :  { %1684 = vmatprep.mubr.f32.mxu0 %v12410_v0 }
 0x1b5   :  { %7380 = vmatmul.mubr.msk.f32.gmra.mrb[6].mxu0 %vm211_vm3, %v1366_v13  ;;  %v7499_v13 = vld [vmem:[%s12396_s1 + $0x100] sm:$0xff] }
 0x1b6   :  { %1690 = vmatprep.mubr.f32.mxu0 %v12410_v0 }
 0x1b9   :  { %7381 = vmatmul.mubr.msk.f32.gmra.mrb[8].mxu0 %vm211_vm3, %v1367_v14  ;;  %v7501_v14 = vld [vmem:[%s12396_s1 + $0x110] sm:$0xff] }
 0x1ba   :  { %1696 = vmatprep.mubr.f32.mxu0 %v12410_v0 }
 0x1bd   :  { %7382 = vmatmul.mubr.msk.f32.gmra.mrb[10].mxu0 %vm211_vm3, %v1368_v15  ;;  %v2115_v15 = vld [vmem:[%s12395_s0 + $0x3] sm:$0xff] }
 0x1be   :  { %1702 = vmatprep.mubr.f32.mxu0 %v12410_v0 }
 0x1c1   :  { %7383 = vmatmul.mubr.msk.f32.gmra.mrb[12].mxu0 %vm211_vm3, %v1369_v16  ;;  %v8182_v16 = vpack.c.bf16 %v7501_v14, %v7499_v13  ;;  %v2169_v13 = vld [vmem:[%s12395_s0 + $0x1b3] sm:$0xff]  ;;  %v2170_v14 = vld [vmem:[%s12395_s0 + $0x1bb] sm:$0xf] }
 0x1c2   :  { %1708 = vmatprep.mubr.f32.mxu0 %v12410_v0 }
 0x1c5   :  { %7384 = vmatmul.mubr.msk.f32.gmra.mrb[14].mxu0 %vm211_vm3, %v1370_v17  ;;  %v2116_v17 = vld [vmem:[%s12395_s0 + $0xb] sm:$0xff] }
 0x1c6   :  { %1714 = vmatprep.mubr.f32.mxu0 %v12410_v0 }
 0x1c9   :  { %7385 = vmatmul.mubr.msk.f32.gmra.mrb[16].mxu0 %vm211_vm3, %v1371_v18  ;;  %v2117_v18 = vld [vmem:[%s12395_s0 + $0x13] sm:$0xff] }
 0x1ca   :  { %1720 = vmatprep.mubr.f32.mxu0 %v12410_v0 }
 0x1cd   :  { %7386 = vmatmul.mubr.msk.f32.gmra.mrb[18].mxu0 %vm211_vm3, %v1372_v19  ;;  %v2118_v19 = vld [vmem:[%s12395_s0 + $0x1b] sm:$0xff] }
 0x1ce   :  { %1726 = vmatprep.mubr.f32.mxu0 %v12410_v0 }
 0x1d1   :  { %7387 = vmatmul.mubr.msk.f32.gmra.mrb[20].mxu0 %vm211_vm3, %v1373_v20  ;;  %v2119_v20 = vld [vmem:[%s12395_s0 + $0x23] sm:$0xff] }
 0x1d2   :  { %1732 = vmatprep.mubr.f32.mxu0 %v12410_v0 }
 0x1d5   :  { %7388 = vmatmul.mubr.msk.f32.gmra.mrb[22].mxu0 %vm211_vm3, %v1374_v21  ;;  %v2120_v21 = vld [vmem:[%s12395_s0 + $0x2b] sm:$0xff] }
 0x1d6   :  { %1738 = vmatprep.mubr.f32.mxu0 %v12410_v0 }
 0x1d9   :  { %7389 = vmatmul.mubr.msk.f32.gmra.mrb[24].mxu0 %vm211_vm3, %v1375_v22  ;;  %v2121_v22 = vld [vmem:[%s12395_s0 + $0x33] sm:$0xff] }
 0x1da   :  { %1744 = vmatprep.mubr.f32.mxu0 %v12410_v0 }
 0x1dd   :  { %7390 = vmatmul.mubr.msk.f32.gmra.mrb[26].mxu0 %vm211_vm3, %v1376_v23  ;;  %v2122_v23 = vld [vmem:[%s12395_s0 + $0x3b] sm:$0xff] }
 0x1de   :  { %1750 = vmatprep.mubr.f32.mxu0 %v12410_v0 }
 0x1e1   :  { %7391 = vmatmul.mubr.msk.f32.gmra.mrb[28].mxu0 %vm211_vm3, %v1377_v24  ;;  %v2123_v24 = vld [vmem:[%s12395_s0 + $0x43] sm:$0xff] }
 0x1e2   :  { %1756 = vmatprep.mubr.f32.mxu0 %v12410_v0 }
 0x1e5   :  { %7392 = vmatmul.mubr.msk.f32.gmra.mrb[30].mxu0 %vm211_vm3, %v1378_v25  ;;  %v2124_v25 = vld [vmem:[%s12395_s0 + $0x4b] sm:$0xff] }
 0x1e6   :  { %1762 = vmatprep.mubr.f32.mxu0 %v12410_v0 }
 0x1e9   :  { %7393 = vmatmul.mubr.msk.f32.gmra.mrb[32].mxu0 %vm211_vm3, %v1379_v26  ;;  %v2125_v26 = vld [vmem:[%s12395_s0 + $0x53] sm:$0xff] }
 0x1ea   :  { %1768 = vmatprep.mubr.f32.mxu0 %v12410_v0 }
 0x1ed   :  { %7394 = vmatmul.mubr.msk.f32.gmra.mrb[34].mxu0 %vm211_vm3, %v1380_v27  ;;  %v2126_v27 = vld [vmem:[%s12395_s0 + $0x5b] sm:$0xff] }
 0x1ee   :  { %1774 = vmatprep.mubr.f32.mxu0 %v12410_v0 }
 0x1f1   :  { %7395 = vmatmul.mubr.msk.f32.gmra.mrb[36].mxu0 %vm211_vm3, %v1381_v28  ;;  %v2127_v28 = vld [vmem:[%s12395_s0 + $0x63] sm:$0xff] }
 0x1f2   :  { %1780 = vmatprep.mubr.f32.mxu0 %v12410_v0 }
 0x1f5   :  { %7396 = vmatmul.mubr.msk.f32.gmra.mrb[38].mxu0 %vm211_vm3, %v1382_v29  ;;  %v2128_v29 = vld [vmem:[%s12395_s0 + $0x6b] sm:$0xff] }
 0x1f6   :  { %1786 = vmatprep.mubr.f32.mxu0 %v12410_v0 }
 0x1f9   :  { %7397 = vmatmul.mubr.msk.f32.gmra.mrb[40].mxu0 %vm211_vm3, %v1383_v30  ;;  %v2129_v30 = vld [vmem:[%s12395_s0 + $0x73] sm:$0xff] }
 0x1fa   :  { %1792 = vmatprep.mubr.f32.mxu0 %v12410_v0 }
 0x1fd   :  { %7398 = vmatmul.mubr.msk.f32.gmra.mrb[42].mxu0 %vm211_vm3, %v1384_v31  ;;  %v2130_v31 = vld [vmem:[%s12395_s0 + $0x7b] sm:$0xff] }
 0x1fe   :  { %1798 = vmatprep.mubr.f32.mxu0 %v12410_v0 }
 0x201   :  { %7399 = vmatmul.mubr.msk.f32.gmra.mrb[44].mxu0 %vm211_vm3, %v1385_v32  ;;  %v2131_v32 = vld [vmem:[%s12395_s0 + $0x83] sm:$0xff] }
 0x202   :  { %1804 = vmatprep.mubr.f32.mxu0 %v12410_v0 }
 0x205   :  { %7400 = vmatmul.mubr.msk.f32.gmra.mrb[46].mxu0 %vm211_vm3, %v1386_v33  ;;  %v2132_v33 = vld [vmem:[%s12395_s0 + $0x8b] sm:$0xff] }
 0x206   :  { %1810 = vmatprep.mubr.f32.mxu0 %v12410_v0 }
 0x209   :  { %7401 = vmatmul.mubr.msk.f32.gmra.mrb[48].mxu0 %vm211_vm3, %v1387_v40  ;;  %v7504_v40 = vld [vmem:[%s12396_s1 + $0x128] sm:$0xff] }
 0x20a   :  { %1816 = vmatprep.mubr.f32.mxu0 %v12410_v0 }
 0x20d   :  { %7402 = vmatmul.mubr.msk.f32.gmra.mrb[50].mxu0 %vm211_vm3, %v1388_v41  ;;  %v7506_v41 = vld [vmem:[%s12396_s1 + $0x138] sm:$0xf] }
 0x20e   :  { %1822 = vmatprep.mubr.f32.mxu0 %v12410_v0 }
 0x211   :  { %7403 = vmatmul.mubr.msk.f32.gmra.mrb[52].mxu0 %vm211_vm3, %v1389_v42  ;;  %v8184_v42 = vpack.c.bf16 %v7506_v41, %v7504_v40  ;;  %v2880_v40 = vld [vmem:[%s12395_s0 + $0x6c] sm:$0xff] }
 0x212   :  { %1828 = vmatprep.mubr.f32.mxu0 %v12410_v0  ;;  %v192_v41 = vld [vmem:[%s12395_s0 + $0x171] sm:$0xff] }
 0x215   :  { %7404 = vmatmul.mubr.msk.f32.gmra.mrb[54].mxu0 %vm211_vm3, %v1390_v43  ;;  %v7503_v43 = vld [vmem:[%s12396_s1 + $0x120] sm:$0xff] }
 0x216   :  { %1834 = vmatprep.mubr.f32.mxu0 %v12410_v0 }
 0x219   :  { %7405 = vmatmul.mubr.msk.f32.gmra.mrb[56].mxu0 %vm211_vm3, %v1391_v44  ;;  %v7505_v44 = vld [vmem:[%s12396_s1 + $0x130] sm:$0xf] }
 0x21a   :  { %1840 = vmatprep.mubr.f32.mxu0 %v12410_v0 }
 0x21d   :  { %7406 = vmatmul.mubr.msk.f32.gmra.mrb[58].mxu0 %vm211_vm3, %v1392_v45  ;;  %v8187_v45 = vpack.c.bf16 %v7505_v44, %v7503_v43  ;;  %v193_v43 = vld [vmem:[%s12395_s0 + $0x179] sm:$0xff] }
 0x21e   :  { %1846 = vmatprep.mubr.f32.mxu0 %v12410_v0  ;;  %v2882_v44 = vld [vmem:[%s12395_s0 + $0x7c] sm:$0xff] }
 0x221   :  { %7407 = vmatmul.mubr.msk.f32.gmra.mrb[60].mxu0 %vm211_vm3, %v1393_v46  ;;  %v2139_v46 = vld [vmem:[%s12395_s0 + $0xc3] sm:$0xff] }
 0x222   :  { %1852 = vmatprep.mubr.f32.mxu0 %v12410_v0 }
 0x225   :  { %7408 = vmatmul.mubr.msk.f32.gmra.mrb[62].mxu0 %vm211_vm3, %v1394_v47  ;;  %v2140_v47 = vld [vmem:[%s12395_s0 + $0xcb] sm:$0xff] }
 0x226   :  { %1858 = vmatprep.mubr.f32.mxu0 %v12410_v0 }
 0x229   :  { %7409 = vmatmul.mubr.msk.f32.gmra.mrb[64].mxu0 %vm211_vm3, %v1395_v48  ;;  %v2141_v48 = vld [vmem:[%s12395_s0 + $0xd3] sm:$0xff] }
 0x22a   :  { %1864 = vmatprep.mubr.f32.mxu0 %v12410_v0 }
 0x22d   :  { %7410 = vmatmul.mubr.msk.f32.gmra.mrb[66].mxu0 %vm211_vm3, %v1396_v49  ;;  %v2143_v49 = vld [vmem:[%s12395_s0 + $0xe3] sm:$0xff] }
 0x22e   :  { %1870 = vmatprep.mubr.f32.mxu0 %v12410_v0 }
 0x231   :  { %7411 = vmatmul.mubr.msk.f32.gmra.mrb[68].mxu0 %vm211_vm3, %v1397_v50  ;;  %v2144_v50 = vld [vmem:[%s12395_s0 + $0xeb] sm:$0xff] }
 0x232   :  { %1876 = vmatprep.mubr.f32.mxu0 %v12410_v0 }
 0x235   :  { %7412 = vmatmul.mubr.msk.f32.gmra.mrb[70].mxu0 %vm211_vm3, %v1398_v51  ;;  %v2145_v51 = vld [vmem:[%s12395_s0 + $0xf3] sm:$0xff] }
 0x236   :  { %1882 = vmatprep.mubr.f32.mxu0 %v12410_v0 }
 0x239   :  { %7413 = vmatmul.mubr.msk.f32.gmra.mrb[72].mxu0 %vm211_vm3, %v1399_v52  ;;  %v2146_v52 = vld [vmem:[%s12395_s0 + $0xfb] sm:$0xff] }
 0x23a   :  { %1888 = vmatprep.mubr.f32.mxu0 %v12410_v0 }
 0x23d   :  { %7414 = vmatmul.mubr.msk.f32.gmra.mrb[74].mxu0 %vm211_vm3, %v1400_v53  ;;  %v2147_v53 = vld [vmem:[%s12395_s0 + $0x103] sm:$0xff] }
 0x23e   :  { %1894 = vmatprep.mubr.f32.mxu0 %v12410_v0 }
 0x241   :  { %7415 = vmatmul.mubr.msk.f32.gmra.mrb[76].mxu0 %vm211_vm3, %v1401_v54  ;;  %v2148_v54 = vld [vmem:[%s12395_s0 + $0x10b] sm:$0xff] }
 0x242   :  { %1900 = vmatprep.mubr.f32.mxu0 %v12410_v0 }
 0x245   :  { %7416 = vmatmul.mubr.msk.f32.gmra.mrb[78].mxu0 %vm211_vm3, %v1402_v55  ;;  %v2149_v55 = vld [vmem:[%s12395_s0 + $0x113] sm:$0xff] }
 0x246   :  { %1906 = vmatprep.mubr.f32.mxu0 %v12410_v0 }
 0x249   :  { %7417 = vmatmul.mubr.msk.f32.gmra.mrb[80].mxu0 %vm211_vm3, %v1403_v56  ;;  %v2150_v56 = vld [vmem:[%s12395_s0 + $0x11b] sm:$0xff] }
 0x24a   :  { %1912 = vmatprep.mubr.f32.mxu0 %v12410_v0 }
 0x24d   :  { %7418 = vmatmul.mubr.msk.f32.gmra.mrb[82].mxu0 %vm211_vm3, %v1404_v57  ;;  %v2151_v57 = vld [vmem:[%s12395_s0 + $0x123] sm:$0xff] }
 0x24e   :  { %1918 = vmatprep.mubr.f32.mxu0 %v12410_v0 }
 0x251   :  { %7419 = vmatmul.mubr.msk.f32.gmra.mrb[84].mxu0 %vm211_vm3, %v1405_v58  ;;  %v2152_v58 = vld [vmem:[%s12395_s0 + $0x12b] sm:$0xff] }
 0x252   :  { %1924 = vmatprep.mubr.f32.mxu0 %v12410_v0 }
 0x255   :  { %7420 = vmatmul.mubr.msk.f32.gmra.mrb[86].mxu0 %vm211_vm3, %v1406_v59  ;;  %v2153_v59 = vld [vmem:[%s12395_s0 + $0x133] sm:$0xff] }
 0x256   :  { %1930 = vmatprep.mubr.f32.mxu0 %v12410_v0 }
 0x259   :  { %7421 = vmatmul.mubr.msk.f32.gmra.mrb[88].mxu0 %vm211_vm3, %v1407_v60  ;;  %v2154_v60 = vld [vmem:[%s12395_s0 + $0x13b] sm:$0xff] }
 0x25a   :  { %1936 = vmatprep.mubr.f32.mxu0 %v12410_v0 }
 0x25d   :  { %7422 = vmatmul.mubr.msk.f32.gmra.mrb[90].mxu0 %vm211_vm3, %v1408_v61  ;;  %v2155_v61 = vld [vmem:[%s12395_s0 + $0x143] sm:$0xff] }
 0x25e   :  { %1942 = vmatprep.mubr.f32.mxu0 %v12410_v0 }
 0x261   :  { %7423 = vmatmul.mubr.msk.f32.gmra.mrb[92].mxu0 %vm211_vm3, %v1409_v62  ;;  %v2156_v62 = vld [vmem:[%s12395_s0 + $0x14b] sm:$0xff] }
 0x262   :  { %1948 = vmatprep.mubr.f32.mxu0 %v12410_v0 }
 0x265   :  { %7424 = vmatmul.mubr.msk.f32.gmra.mrb[94].mxu0 %vm211_vm3, %v1410_v63  ;;  %v2157_v63 = vld [vmem:[%s12395_s0 + $0x153] sm:$0xff] }
 0x266   :  { %1954 = vmatprep.mubr.f32.mxu0 %v12410_v0 }
 0x269   :  { %7425 = vmatmul.mubr.msk.f32.gmra.mrb[96].mxu0 %vm211_vm3, %v1411_v1  ;;  %v2158_v1 = vld [vmem:[%s12395_s0 + $0x15b] sm:$0xff] }
 0x26a   :  { %1960 = vmatprep.mubr.f32.mxu0 %v12410_v0 }
 0x26d   :  { %7426 = vmatmul.mubr.msk.f32.gmra.mrb[98].mxu0 %vm211_vm3, %v1412_v2  ;;  %v2159_v2 = vld [vmem:[%s12395_s0 + $0x163] sm:$0xff] }
 0x26e   :  { %1966 = vmatprep.mubr.f32.mxu0 %v12410_v0 }
 0x271   :  { %7427 = vmatmul.mubr.msk.f32.gmra.mrb[100].mxu0 %vm211_vm3, %v1413_v3  ;;  %v2160_v3 = vld [vmem:[%s12395_s0 + $0x16b] sm:$0xff] }
 0x272   :  { %1972 = vmatprep.mubr.f32.mxu0 %v12410_v0 }
 0x275   :  { %7428 = vmatmul.mubr.msk.f32.gmra.mrb[102].mxu0 %vm211_vm3, %v1414_v4  ;;  %v2161_v4 = vld [vmem:[%s12395_s0 + $0x173] sm:$0xff] }
 0x276   :  { %1978 = vmatprep.mubr.f32.mxu0 %v12410_v0 }
 0x279   :  { %7429 = vmatmul.mubr.msk.f32.gmra.mrb[104].mxu0 %vm211_vm3, %v1415_v5  ;;  %v2162_v5 = vld [vmem:[%s12395_s0 + $0x17b] sm:$0xff] }
 0x27a   :  { %1984 = vmatprep.mubr.f32.mxu0 %v12410_v0 }
 0x27d   :  { %7430 = vmatmul.mubr.msk.f32.gmra.mrb[106].mxu0 %vm211_vm3, %v1416_v6  ;;  %v2163_v6 = vld [vmem:[%s12395_s0 + $0x183] sm:$0xff] }
 0x27e   :  { %1990 = vmatprep.mubr.f32.mxu0 %v12410_v0 }
 0x281   :  { %7431 = vmatmul.mubr.msk.f32.gmra.mrb[108].mxu0 %vm211_vm3, %v1417_v9  ;;  %v2166_v9 = vld [vmem:[%s12395_s0 + $0x19b] sm:$0xff] }
 0x282   :  { %1996 = vmatprep.mubr.f32.mxu0 %v12410_v0 }
 0x285   :  { %7432 = vmatmul.mubr.msk.f32.gmra.mrb[110].mxu0 %vm211_vm3, %v1418_v12  ;;  %v2168_v12 = vld [vmem:[%s12395_s0 + $0x1ab] sm:$0xff] }
 0x286   :  { %2418 = vmatprep.mubr.f32.mxu0 %v12410_v0 }
 0x289   :  { %7443 = vmatmul.mubr.msk.f32.vlgmr.msra.gmra.mrb[0].mxu0 %vm211_vm3, %v2115_v15  ;;  %v2867_v15 = vld [vmem:[%s12395_s0 + $0x4] sm:$0xff] }
 0x28a   :  { %2424 = vmatprep.mubr.f32.mxu0 %v12410_v0  ;;  %8183 = vmatpush1.bf16.msra.mxu0 %v8182_v16  ;;  %v2868_v16 = vld [vmem:[%s12395_s0 + $0xc] sm:$0xff] }
 0x28b   :  { %8186 = vmatprep.subr.msk.bf16.mxu0 %vm9472_vm2, %v8184_v42  ;;  %v2881_v42 = vld [vmem:[%s12395_s0 + $0x74] sm:$0xff] }
 0x28d   :  { %7444 = vmatmul.mubr.msk.f32.gmra.mrb[2].mxu0 %vm211_vm3, %v2116_v17  ;;  %v180_v17 = vld [vmem:[%s12395_s0 + $0x111] sm:$0xff] }
 0x28e   :  { %2430 = vmatprep.mubr.f32.mxu0 %v12410_v0  ;;  %8189 = vmatpush1.bf16.msk.msra.mxu0 %vm9472_vm2, %v8187_v45  ;;  %v194_v45 = vld [vmem:[%s12395_s0 + $0x181] sm:$0xff] }
 0x28f   :  { %7287 = vmatmul.mubr.msk.f32.vlgmr.msra.gmra.mrb[0].mxu1 %vm211_vm3, %v180_v17  ;;  %v7578_v17 = vld [vmem:[%s12398_s3 + $0x168] sm:$0xff] }
 0x290   :  { %661 = vmatprep.mubr.f32.mxu1 %v12410_v0 }
 0x291   :  { %7445 = vmatmul.mubr.msk.f32.gmra.mrb[4].mxu0 %vm211_vm3, %v2117_v18  ;;  %v2869_v18 = vld [vmem:[%s12395_s0 + $0x14] sm:$0xff] }
 0x292   :  { %2436 = vmatprep.mubr.f32.mxu0 %v12410_v0 }
 0x295   :  { %7446 = vmatmul.mubr.msk.f32.gmra.mrb[6].mxu0 %vm211_vm3, %v2118_v19  ;;  %v181_v19 = vld [vmem:[%s12395_s0 + $0x119] sm:$0xff] }
 0x296   :  { %2442 = vmatprep.mubr.f32.mxu0 %v12410_v0  ;;  %7288 = vmatmul.mubr.msk.f32.gmra.mrb[2].mxu1 %vm211_vm3, %v181_v19 }
 0x297   :  { %667 = vmatprep.mubr.f32.mxu1 %v12410_v0 }
 0x299   :  { %7447 = vmatmul.mubr.msk.f32.gmra.mrb[8].mxu0 %vm211_vm3, %v2119_v20  ;;  %v2870_v20 = vld [vmem:[%s12395_s0 + $0x1c] sm:$0xff] }
 0x29a   :  { %2448 = vmatprep.mubr.f32.mxu0 %v12410_v0 }
 0x29d   :  { %7448 = vmatmul.mubr.msk.f32.gmra.mrb[10].mxu0 %vm211_vm3, %v2120_v21  ;;  %v182_v21 = vld [vmem:[%s12395_s0 + $0x121] sm:$0xff] }
 0x29e   :  { %2454 = vmatprep.mubr.f32.mxu0 %v12410_v0  ;;  %7289 = vmatmul.mubr.msk.f32.gmra.mrb[4].mxu1 %vm211_vm3, %v182_v21  ;;  %v7579_v21 = vld [vmem:[%s12398_s3 + $0x170] sm:$0xff] }
 0x29f   :  { %673 = vmatprep.mubr.f32.mxu1 %v12410_v0 }
 0x2a1   :  { %7449 = vmatmul.mubr.msk.f32.gmra.mrb[12].mxu0 %vm211_vm3, %v2121_v22  ;;  %v2871_v22 = vld [vmem:[%s12395_s0 + $0x24] sm:$0xff] }
 0x2a2   :  { %2460 = vmatprep.mubr.f32.mxu0 %v12410_v0 }
 0x2a5   :  { %7450 = vmatmul.mubr.msk.f32.gmra.mrb[14].mxu0 %vm211_vm3, %v2122_v23  ;;  %v183_v23 = vld [vmem:[%s12395_s0 + $0x129] sm:$0xff] }
 0x2a6   :  { %2466 = vmatprep.mubr.f32.mxu0 %v12410_v0  ;;  %7290 = vmatmul.mubr.msk.f32.gmra.mrb[6].mxu1 %vm211_vm3, %v183_v23  ;;  %v2892_v23 = vld [vmem:[%s12395_s0 + $0xcc] sm:$0xff] }
 0x2a7   :  { %679 = vmatprep.mubr.f32.mxu1 %v12410_v0 }
 0x2a9   :  { %7451 = vmatmul.mubr.msk.f32.gmra.mrb[16].mxu0 %vm211_vm3, %v2123_v24  ;;  %v2872_v24 = vld [vmem:[%s12395_s0 + $0x2c] sm:$0xff] }
 0x2aa   :  { %2472 = vmatprep.mubr.f32.mxu0 %v12410_v0 }
 0x2ad   :  { %7452 = vmatmul.mubr.msk.f32.gmra.mrb[18].mxu0 %vm211_vm3, %v2124_v25  ;;  %v184_v25 = vld [vmem:[%s12395_s0 + $0x131] sm:$0xff] }
 0x2ae   :  { %2478 = vmatprep.mubr.f32.mxu0 %v12410_v0  ;;  %7291 = vmatmul.mubr.msk.f32.gmra.mrb[8].mxu1 %vm211_vm3, %v184_v25  ;;  %v7584_v25 = vld [vmem:[%s12398_s3 + $0x198] sm:$0xff] }
 0x2af   :  { %685 = vmatprep.mubr.f32.mxu1 %v12410_v0 }
 0x2b1   :  { %7453 = vmatmul.mubr.msk.f32.gmra.mrb[20].mxu0 %vm211_vm3, %v2125_v26  ;;  %v2873_v26 = vld [vmem:[%s12395_s0 + $0x34] sm:$0xff] }
 0x2b2   :  { %2484 = vmatprep.mubr.f32.mxu0 %v12410_v0 }
 0x2b5   :  { %7454 = vmatmul.mubr.msk.f32.gmra.mrb[22].mxu0 %vm211_vm3, %v2126_v27  ;;  %v185_v27 = vld [vmem:[%s12395_s0 + $0x139] sm:$0xff] }
 0x2b6   :  { %2490 = vmatprep.mubr.f32.mxu0 %v12410_v0  ;;  %7292 = vmatmul.mubr.msk.f32.gmra.mrb[10].mxu1 %vm211_vm3, %v185_v27  ;;  %v7581_v27 = vld [vmem:[%s12398_s3 + $0x180] sm:$0xff] }
 0x2b7   :  { %691 = vmatprep.mubr.f32.mxu1 %v12410_v0 }
 0x2b9   :  { %7455 = vmatmul.mubr.msk.f32.gmra.mrb[24].mxu0 %vm211_vm3, %v2127_v28  ;;  %v2874_v28 = vld [vmem:[%s12395_s0 + $0x3c] sm:$0xff] }
 0x2ba   :  { %2496 = vmatprep.mubr.f32.mxu0 %v12410_v0 }
 0x2bd   :  { %7456 = vmatmul.mubr.msk.f32.gmra.mrb[26].mxu0 %vm211_vm3, %v2128_v29  ;;  %v186_v29 = vld [vmem:[%s12395_s0 + $0x141] sm:$0xff] }
 0x2be   :  { %2502 = vmatprep.mubr.f32.mxu0 %v12410_v0  ;;  %7293 = vmatmul.mubr.msk.f32.gmra.mrb[12].mxu1 %vm211_vm3, %v186_v29 }
 0x2bf   :  { %697 = vmatprep.mubr.f32.mxu1 %v12410_v0 }
 0x2c1   :  { %7457 = vmatmul.mubr.msk.f32.gmra.mrb[28].mxu0 %vm211_vm3, %v2129_v30  ;;  %v2875_v30 = vld [vmem:[%s12395_s0 + $0x44] sm:$0xff] }
 0x2c2   :  { %2508 = vmatprep.mubr.f32.mxu0 %v12410_v0 }
 0x2c5   :  { %7458 = vmatmul.mubr.msk.f32.gmra.mrb[30].mxu0 %vm211_vm3, %v2130_v31  ;;  %v187_v31 = vld [vmem:[%s12395_s0 + $0x149] sm:$0xff] }
 0x2c6   :  { %2514 = vmatprep.mubr.f32.mxu0 %v12410_v0  ;;  %7294 = vmatmul.mubr.msk.f32.gmra.mrb[14].mxu1 %vm211_vm3, %v187_v31  ;;  %v7586_v31 = vld [vmem:[%s12398_s3 + $0x1a8] sm:$0xff] }
 0x2c7   :  { %703 = vmatprep.mubr.f32.mxu1 %v12410_v0 }
 0x2c9   :  { %7459 = vmatmul.mubr.msk.f32.gmra.mrb[32].mxu0 %vm211_vm3, %v2131_v32  ;;  %v2876_v32 = vld [vmem:[%s12395_s0 + $0x4c] sm:$0xff] }
 0x2ca   :  { %2520 = vmatprep.mubr.f32.mxu0 %v12410_v0 }
 0x2cd   :  { %7460 = vmatmul.mubr.msk.f32.gmra.mrb[34].mxu0 %vm211_vm3, %v2132_v33  ;;  %v188_v33 = vld [vmem:[%s12395_s0 + $0x151] sm:$0xff] }
 0x2ce   :  { %2526 = vmatprep.mubr.f32.mxu0 %v12410_v0  ;;  %7295 = vmatmul.mubr.msk.f32.gmra.mrb[16].mxu1 %vm211_vm3, %v188_v33 }
 0x2cf   :  { %709 = vmatprep.mubr.f32.mxu1 %v12410_v0 }
 0x2d1   :  { %7461 = vmatmul.mubr.msk.f32.gmra.mrb[36].mxu0 %vm211_vm3, %v2133_v34  ;;  %v2877_v34 = vld [vmem:[%s12395_s0 + $0x54] sm:$0xff] }
 0x2d2   :  { %2532 = vmatprep.mubr.f32.mxu0 %v12410_v0 }
 0x2d5   :  { %7462 = vmatmul.mubr.msk.f32.gmra.mrb[38].mxu0 %vm211_vm3, %v2134_v35  ;;  %v189_v35 = vld [vmem:[%s12395_s0 + $0x159] sm:$0xff] }
 0x2d6   :  { %2538 = vmatprep.mubr.f32.mxu0 %v12410_v0  ;;  %7296 = vmatmul.mubr.msk.f32.gmra.mrb[18].mxu1 %vm211_vm3, %v189_v35  ;;  %v7587_v35 = vld [vmem:[%s12398_s3 + $0x1b0] sm:$0xff] }
 0x2d7   :  { %715 = vmatprep.mubr.f32.mxu1 %v12410_v0 }
 0x2d9   :  { %7463 = vmatmul.mubr.msk.f32.gmra.mrb[40].mxu0 %vm211_vm3, %v2135_v36  ;;  %v2878_v36 = vld [vmem:[%s12395_s0 + $0x5c] sm:$0xff] }
 0x2da   :  { %2544 = vmatprep.mubr.f32.mxu0 %v12410_v0 }
 0x2dd   :  { %7464 = vmatmul.mubr.msk.f32.gmra.mrb[42].mxu0 %vm211_vm3, %v2136_v37  ;;  %v190_v37 = vld [vmem:[%s12395_s0 + $0x161] sm:$0xff] }
 0x2de   :  { %2550 = vmatprep.mubr.f32.mxu0 %v12410_v0  ;;  %7297 = vmatmul.mubr.msk.f32.gmra.mrb[20].mxu1 %vm211_vm3, %v190_v37  ;;  %v2894_v37 = vld [vmem:[%s12395_s0 + $0xdc] sm:$0xff] }
 0x2df   :  { %721 = vmatprep.mubr.f32.mxu1 %v12410_v0 }
 0x2e1   :  { %7465 = vmatmul.mubr.msk.f32.gmra.mrb[44].mxu0 %vm211_vm3, %v2137_v38  ;;  %v2879_v38 = vld [vmem:[%s12395_s0 + $0x64] sm:$0xff] }
 0x2e2   :  { %2556 = vmatprep.mubr.f32.mxu0 %v12410_v0 }
 0x2e5   :  { %7466 = vmatmul.mubr.msk.f32.gmra.mrb[46].mxu0 %vm211_vm3, %v2138_v39  ;;  %v191_v39 = vld [vmem:[%s12395_s0 + $0x169] sm:$0xff] }
 0x2e6   :  { %2562 = vmatprep.mubr.f32.mxu0 %v12410_v0  ;;  %7298 = vmatmul.mubr.msk.f32.gmra.mrb[22].mxu1 %vm211_vm3, %v191_v39  ;;  %v7592_v39 = vld [vmem:[%s12398_s3 + $0x1d8] sm:$0xff] }
 0x2e7   :  { %727 = vmatprep.mubr.f32.mxu1 %v12410_v0 }
 0x2e9   :  { %7467 = vmatmul.mubr.msk.f32.gmra.mrb[48].mxu0 %vm211_vm3, %v2139_v46  ;;  %v2883_v46 = vld [vmem:[%s12395_s0 + $0x84] sm:$0xff] }
 0x2ea   :  { %2568 = vmatprep.mubr.f32.mxu0 %v12410_v0  ;;  %7299 = vmatmul.mubr.msk.f32.gmra.mrb[24].mxu1 %vm211_vm3, %v192_v41  ;;  %v7589_v41 = vld [vmem:[%s12398_s3 + $0x1c0] sm:$0xff] }
 0x2eb   :  { %733 = vmatprep.mubr.f32.mxu1 %v12410_v0 }
 0x2ed   :  { %7468 = vmatmul.mubr.msk.f32.gmra.mrb[50].mxu0 %vm211_vm3, %v2140_v47  ;;  %v195_v47 = vld [vmem:[%s12395_s0 + $0x189] sm:$0xff] }
 0x2ee   :  { %2574 = vmatprep.mubr.f32.mxu0 %v12410_v0  ;;  %7300 = vmatmul.mubr.msk.f32.gmra.mrb[26].mxu1 %vm211_vm3, %v193_v43 }
 0x2ef   :  { %739 = vmatprep.mubr.f32.mxu1 %v12410_v0 }
 0x2f1   :  { %7469 = vmatmul.mubr.msk.f32.gmra.mrb[52].mxu0 %vm211_vm3, %v2141_v48  ;;  %v2884_v48 = vld [vmem:[%s12395_s0 + $0x8c] sm:$0xff] }
 0x2f2   :  { %2580 = vmatprep.mubr.f32.mxu0 %v12410_v0  ;;  %7301 = vmatmul.mubr.msk.f32.gmra.mrb[28].mxu1 %vm211_vm3, %v194_v45  ;;  %v7594_v45 = vld [vmem:[%s12398_s3 + $0x1e8] sm:$0xff] }
 0x2f3   :  { %745 = vmatprep.mubr.f32.mxu1 %v12410_v0 }
 0x2f5   :  { %7470 = vmatmul.mubr.msk.f32.gmra.mrb[54].mxu0 %vm211_vm3, %v2142_v10  ;;  %v196_v10 = vld [vmem:[%s12395_s0 + $0x191] sm:$0xff] }
 0x2f6   :  { %2586 = vmatprep.mubr.f32.mxu0 %v12410_v0  ;;  %7302 = vmatmul.mubr.msk.f32.gmra.mrb[30].mxu1 %vm211_vm3, %v195_v47 }
 0x2f7   :  { %751 = vmatprep.mubr.f32.mxu1 %v12410_v0 }
 0x2f9   :  { %7471 = vmatmul.mubr.msk.f32.gmra.mrb[56].mxu0 %vm211_vm3, %v2143_v49  ;;  %v2885_v49 = vld [vmem:[%s12395_s0 + $0x94] sm:$0xff] }
 0x2fa   :  { %2592 = vmatprep.mubr.f32.mxu0 %v12410_v0  ;;  %7303 = vmatmul.mubr.msk.f32.gmra.mrb[32].mxu1 %vm211_vm3, %v196_v10  ;;  %v7595_v10 = vld [vmem:[%s12398_s3 + $0x1f0] sm:$0xff] }
 0x2fb   :  { %757 = vmatprep.mubr.f32.mxu1 %v12410_v0 }
 0x2fd   :  { %7472 = vmatmul.mubr.msk.f32.gmra.mrb[58].mxu0 %vm211_vm3, %v2144_v50  ;;  %v197_v50 = vld [vmem:[%s12395_s0 + $0x199] sm:$0xff] }
 0x2fe   :  { %2598 = vmatprep.mubr.f32.mxu0 %v12410_v0  ;;  %7304 = vmatmul.mubr.msk.f32.gmra.mrb[34].mxu1 %vm211_vm3, %v197_v50  ;;  %v2896_v50 = vld [vmem:[%s12395_s0 + $0xec] sm:$0xff] }
 0x2ff   :  { %763 = vmatprep.mubr.f32.mxu1 %v12410_v0 }
 0x301   :  { %7473 = vmatmul.mubr.msk.f32.gmra.mrb[60].mxu0 %vm211_vm3, %v2145_v51  ;;  %v2886_v51 = vld [vmem:[%s12395_s0 + $0x9c] sm:$0xff] }
 0x302   :  { %2604 = vmatprep.mubr.f32.mxu0 %v12410_v0 }
 0x305   :  { %7474 = vmatmul.mubr.msk.f32.gmra.mrb[62].mxu0 %vm211_vm3, %v2146_v52  ;;  %v198_v52 = vld [vmem:[%s12395_s0 + $0x1a1] sm:$0xff] }
 0x306   :  { %2610 = vmatprep.mubr.f32.mxu0 %v12410_v0  ;;  %7305 = vmatmul.mubr.msk.f32.gmra.mrb[36].mxu1 %vm211_vm3, %v198_v52  ;;  %v2898_v52 = vld [vmem:[%s12395_s0 + $0xfc] sm:$0xff] }
 0x307   :  { %769 = vmatprep.mubr.f32.mxu1 %v12410_v0 }
 0x309   :  { %7475 = vmatmul.mubr.msk.f32.gmra.mrb[64].mxu0 %vm211_vm3, %v2147_v53  ;;  %v2887_v53 = vld [vmem:[%s12395_s0 + $0xa4] sm:$0xff] }
 0x30a   :  { %2616 = vmatprep.mubr.f32.mxu0 %v12410_v0 }
 0x30d   :  { %7476 = vmatmul.mubr.msk.f32.gmra.mrb[66].mxu0 %vm211_vm3, %v2148_v54  ;;  %v199_v54 = vld [vmem:[%s12395_s0 + $0x1a9] sm:$0xff] }
 0x30e   :  { %2622 = vmatprep.mubr.f32.mxu0 %v12410_v0  ;;  %7306 = vmatmul.mubr.msk.f32.gmra.mrb[38].mxu1 %vm211_vm3, %v199_v54  ;;  %v2900_v54 = vld [vmem:[%s12395_s0 + $0x10c] sm:$0xff] }
 0x30f   :  { %775 = vmatprep.mubr.f32.mxu1 %v12410_v0 }
 0x311   :  { %7477 = vmatmul.mubr.msk.f32.gmra.mrb[68].mxu0 %vm211_vm3, %v2149_v55  ;;  %v2888_v55 = vld [vmem:[%s12395_s0 + $0xac] sm:$0xff] }
 0x312   :  { %2628 = vmatprep.mubr.f32.mxu0 %v12410_v0 }
 0x315   :  { %7478 = vmatmul.mubr.msk.f32.gmra.mrb[70].mxu0 %vm211_vm3, %v2150_v56  ;;  %v7566_v56 = vld [vmem:[%s12398_s3 + $0x108] sm:$0xff] }
 0x316   :  { %2634 = vmatprep.mubr.f32.mxu0 %v12410_v0 }
 0x319   :  { %7479 = vmatmul.mubr.msk.f32.gmra.mrb[72].mxu0 %vm211_vm3, %v2151_v57  ;;  %v7568_v57 = vld [vmem:[%s12398_s3 + $0x118] sm:$0xff] }
 0x31a   :  { %2640 = vmatprep.mubr.f32.mxu0 %v12410_v0 }
 0x31d   :  { %7480 = vmatmul.mubr.msk.f32.gmra.mrb[74].mxu0 %vm211_vm3, %v2152_v58  ;;  %v8190_v58 = vpack.c.bf16 %v7568_v57, %v7566_v56  ;;  %v2902_v56 = vld [vmem:[%s12395_s0 + $0x11c] sm:$0xff]  ;;  %v2903_v57 = vld [vmem:[%s12395_s0 + $0x124] sm:$0xff] }
 0x31e   :  { %2646 = vmatprep.mubr.f32.mxu0 %v12410_v0 }
 0x31f   :  { %8191 = vmatprep.subr.bf16.mxu1 %v8190_v58  ;;  %v2904_v58 = vld [vmem:[%s12395_s0 + $0x12c] sm:$0xff] }
 0x321   :  { %7481 = vmatmul.mubr.msk.f32.gmra.mrb[76].mxu0 %vm211_vm3, %v2153_v59  ;;  %v7565_v59 = vld [vmem:[%s12398_s3 + $0x100] sm:$0xff] }
 0x322   :  { %2652 = vmatprep.mubr.f32.mxu0 %v12410_v0 }
 0x325   :  { %7482 = vmatmul.mubr.msk.f32.gmra.mrb[78].mxu0 %vm211_vm3, %v2154_v60  ;;  %v7567_v60 = vld [vmem:[%s12398_s3 + $0x110] sm:$0xff] }
 0x326   :  { %2658 = vmatprep.mubr.f32.mxu0 %v12410_v0 }
 0x329   :  { %7483 = vmatmul.mubr.msk.f32.gmra.mrb[80].mxu0 %vm211_vm3, %v2155_v61  ;;  %v8192_v61 = vpack.c.bf16 %v7567_v60, %v7565_v59  ;;  %v2905_v59 = vld [vmem:[%s12395_s0 + $0x134] sm:$0xff]  ;;  %v2906_v60 = vld [vmem:[%s12395_s0 + $0x13c] sm:$0xff] }
 0x32a   :  { %2664 = vmatprep.mubr.f32.mxu0 %v12410_v0 }
 0x32b   :  { %8193 = vmatpush1.bf16.msra.mxu1 %v8192_v61  ;;  %v2907_v61 = vld [vmem:[%s12395_s0 + $0x144] sm:$0xff] }
 0x32d   :  { %7484 = vmatmul.mubr.msk.f32.gmra.mrb[82].mxu0 %vm211_vm3, %v2156_v62  ;;  %v2889_v62 = vld [vmem:[%s12395_s0 + $0xb4] sm:$0xff] }
 0x32e   :  { %2670 = vmatprep.mubr.f32.mxu0 %v12410_v0 }
 0x331   :  { %7485 = vmatmul.mubr.msk.f32.gmra.mrb[84].mxu0 %vm211_vm3, %v2157_v63  ;;  %v200_v63 = vld [vmem:[%s12395_s0 + $0x1b1] sm:$0xff] }
 0x332   :  { %2676 = vmatprep.mubr.f32.mxu0 %v12410_v0  ;;  %7307 = vmatmul.mubr.msk.f32.gmra.mrb[40].mxu1 %vm211_vm3, %v200_v63  ;;  %v2909_v63 = vld [vmem:[%s12395_s0 + $0x154] sm:$0xff] }
 0x333   :  { %781 = vmatprep.mubr.f32.mxu1 %v12410_v0 }
 0x335   :  { %7486 = vmatmul.mubr.msk.f32.gmra.mrb[86].mxu0 %vm211_vm3, %v2158_v1  ;;  %v7570_v1 = vld [vmem:[%s12398_s3 + $0x128] sm:$0xff] }
 0x336   :  { %2682 = vmatprep.mubr.f32.mxu0 %v12410_v0 }
 0x339   :  { %7487 = vmatmul.mubr.msk.f32.gmra.mrb[88].mxu0 %vm211_vm3, %v2159_v2  ;;  %v7572_v2 = vld [vmem:[%s12398_s3 + $0x138] sm:$0xff] }
 0x33a   :  { %2688 = vmatprep.mubr.f32.mxu0 %v12410_v0 }
 0x33d   :  { %7488 = vmatmul.mubr.msk.f32.gmra.mrb[90].mxu0 %vm211_vm3, %v2160_v3  ;;  %v8194_v3 = vpack.c.bf16 %v7572_v2, %v7570_v1  ;;  %v2910_v1 = vld [vmem:[%s12395_s0 + $0x15c] sm:$0xff]  ;;  %v2911_v2 = vld [vmem:[%s12395_s0 + $0x164] sm:$0xff] }
 0x33e   :  { %2694 = vmatprep.mubr.f32.mxu0 %v12410_v0 }
 0x33f   :  { %8195 = vmatprep.subr.bf16.mxu1 %v8194_v3  ;;  %v2912_v3 = vld [vmem:[%s12395_s0 + $0x16c] sm:$0xff] }
 0x341   :  { %7489 = vmatmul.mubr.msk.f32.gmra.mrb[92].mxu0 %vm211_vm3, %v2161_v4  ;;  %v7569_v4 = vld [vmem:[%s12398_s3 + $0x120] sm:$0xff] }
 0x342   :  { %2700 = vmatprep.mubr.f32.mxu0 %v12410_v0 }
 0x345   :  { %7490 = vmatmul.mubr.msk.f32.gmra.mrb[94].mxu0 %vm211_vm3, %v2162_v5  ;;  %v7571_v5 = vld [vmem:[%s12398_s3 + $0x130] sm:$0xff] }
 0x346   :  { %2706 = vmatprep.mubr.f32.mxu0 %v12410_v0 }
 0x349   :  { %7491 = vmatmul.mubr.msk.f32.gmra.mrb[96].mxu0 %vm211_vm3, %v2163_v6  ;;  %v8196_v6 = vpack.c.bf16 %v7571_v5, %v7569_v4  ;;  %v2913_v4 = vld [vmem:[%s12395_s0 + $0x174] sm:$0xff]  ;;  %v2914_v5 = vld [vmem:[%s12395_s0 + $0x17c] sm:$0xff] }
 0x34a   :  { %2712 = vmatprep.mubr.f32.mxu0 %v12410_v0 }
 0x34b   :  { %8197 = vmatpush1.bf16.msra.mxu1 %v8196_v6  ;;  %v2915_v6 = vld [vmem:[%s12395_s0 + $0x184] sm:$0xff] }
 0x34d   :  { %7492 = vmatmul.mubr.msk.f32.gmra.mrb[98].mxu0 %vm211_vm3, %v2164_v7  ;;  %v2890_v7 = vld [vmem:[%s12395_s0 + $0xbc] sm:$0xff] }
 0x34e   :  { %2718 = vmatprep.mubr.f32.mxu0 %v12410_v0 }
 0x351   :  { %7493 = vmatmul.mubr.msk.f32.gmra.mrb[100].mxu0 %vm211_vm3, %v2165_v8  ;;  %v201_v8 = vld [vmem:[%s12395_s0 + $0x1b9] sm:$0xf] }
 0x352   :  { %2724 = vmatprep.mubr.f32.mxu0 %v12410_v0  ;;  %7308 = vmatmul.mubr.msk.f32.gmra.mrb[42].mxu1 %vm211_vm3, %v201_v8  ;;  %v3621_v8 = vlaneseq }
 0x353   :  { %4430 = vmatprep.mubr.f32.mxu1 %v12410_v0 }
 0x355   :  { %7494 = vmatmul.mubr.msk.f32.gmra.mrb[102].mxu0 %vm211_vm3, %v2166_v9  ;;  %v7574_v9 = vld [vmem:[%s12398_s3 + $0x148] sm:$0xff] }
 0x356   :  { %2730 = vmatprep.mubr.f32.mxu0 %v12410_v0 }
 0x359   :  { %7495 = vmatmul.mubr.msk.f32.gmra.mrb[104].mxu0 %vm211_vm3, %v2167_v11  ;;  %v7576_v11 = vld [vmem:[%s12398_s3 + $0x158] sm:$0xff] }
 0x35a   :  { %2736 = vmatprep.mubr.f32.mxu0 %v12410_v0 }
 0x35d   :  { %7496 = vmatmul.mubr.msk.f32.gmra.mrb[106].mxu0 %vm211_vm3, %v2168_v12  ;;  %v8198_v12 = vpack.c.bf16 %v7576_v11, %v7574_v9  ;;  %v2917_v9 = vld [vmem:[%s12395_s0 + $0x194] sm:$0xff]  ;;  %v11072_v11 = vshrl.u32 %v3621_v8, 7 }
 0x35e   :  { %2742 = vmatprep.mubr.f32.mxu0 %v12410_v0 }
 0x35f   :  { %8199 = vmatprep.subr.bf16.mxu1 %v8198_v12  ;;  %12416 = vst [vmem:[#allocation12_spill] sm:$0xff] %v11072_v11  ;;  %v2918_v12 = vld [vmem:[%s12395_s0 + $0x19c] sm:$0xff] }
 0x361   :  { %7497 = vmatmul.mubr.msk.f32.gmra.mrb[108].mxu0 %vm211_vm3, %v2169_v13  ;;  %v7573_v13 = vld [vmem:[%s12398_s3 + $0x140] sm:$0xff] }
 0x362   :  { %2748 = vmatprep.mubr.f32.mxu0 %v12410_v0 }
 0x365   :  { %7498 = vmatmul.mubr.msk.f32.gmra.mrb[110].mxu0 %vm211_vm3, %v2170_v14  ;;  %v7575_v14 = vld [vmem:[%s12398_s3 + $0x150] sm:$0xff] }
 0x366   :  { %3170 = vmatprep.mubr.f32.mxu0 %v12410_v0 }
 0x369   :  { %7509 = vmatmul.mubr.msk.f32.vlgmr.msra.gmra.mrb[0].mxu0 %vm211_vm3, %v2867_v15  ;;  %v8200_v15 = vpack.c.bf16 %v7575_v14, %v7573_v13  ;;  %v12409_v13 = vsub.s32 0, %v11072_v11  ;;  %v2919_v14 = vld [vmem:[%s12395_s0 + $0x1a4] sm:$0xff] }
 0x36a   :  { %3176 = vmatprep.mubr.f32.mxu0 %v12410_v0 }
 0x36b   :  { %8201 = vmatpush1.bf16.msra.mxu1 %v8200_v15  ;;  %v3619_v15 = vld [vmem:[%s12397_s2] sm:$0x3] }
 0x36d   :  { %7510 = vmatmul.mubr.msk.f32.gmra.mrb[2].mxu0 %vm211_vm3, %v2868_v16  ;;  %v2891_v16 = vld [vmem:[%s12395_s0 + $0xc4] sm:$0xff] }
 0x36e   :  { %3182 = vmatprep.mubr.f32.mxu0 %v12410_v0 }
 0x371   :  { %7511 = vmatmul.mubr.msk.f32.gmra.mrb[4].mxu0 %vm211_vm3, %v2869_v18  ;;  %v7580_v18 = vld [vmem:[%s12398_s3 + $0x178] sm:$0xff] }
 0x372   :  { %3188 = vmatprep.mubr.f32.mxu0 %v12410_v0  ;;  %v8202_v19 = vpack.c.bf16 %v7580_v18, %v7578_v17  ;;  %v11091_v17 = vrot.slane %v3619_v15, %v12409_v13 }
 0x374   :  { %8203 = vmatprep.subr.bf16.mxu1 %v8202_v19  ;;  %v2920_v19 = vld [vmem:[%s12395_s0 + $0x1ac] sm:$0xff] }
 0x375   :  { %7512 = vmatmul.mubr.msk.f32.gmra.mrb[6].mxu0 %vm211_vm3, %v2870_v20  ;;  %v7577_v20 = vld [vmem:[%s12398_s3 + $0x160] sm:$0xff] }
 0x376   :  { %3194 = vmatprep.mubr.f32.mxu0 %v12410_v0 }
 0x379   :  { %7513 = vmatmul.mubr.msk.f32.gmra.mrb[8].mxu0 %vm211_vm3, %v2871_v22  ;;  %v8204_v22 = vpack.c.bf16 %v7579_v21, %v7577_v20 }
 0x37a   :  { %3200 = vmatprep.mubr.f32.mxu0 %v12410_v0 }
 0x37b   :  { %8205 = vmatpush1.bf16.msra.mxu1 %v8204_v22 }
 0x37d   :  { %7514 = vmatmul.mubr.msk.f32.gmra.mrb[10].mxu0 %vm211_vm3, %v2872_v24  ;;  %v7582_v24 = vld [vmem:[%s12398_s3 + $0x188] sm:$0xff] }
 0x37e   :  { %3206 = vmatprep.mubr.f32.mxu0 %v12410_v0 }
 0x381   :  { %7515 = vmatmul.mubr.msk.f32.gmra.mrb[12].mxu0 %vm211_vm3, %v2873_v26  ;;  %v8206_v26 = vpack.c.bf16 %v7584_v25, %v7582_v24  ;;  %v2921_v24 = vld [vmem:[%s12395_s0 + $0x1b4] sm:$0xff] }
 0x382   :  { %3212 = vmatprep.mubr.f32.mxu0 %v12410_v0 }
 0x383   :  { %8207 = vmatprep.subr.bf16.mxu1 %v8206_v26 }
 0x385   :  { %7516 = vmatmul.mubr.msk.f32.gmra.mrb[14].mxu0 %vm211_vm3, %v2874_v28  ;;  %v7583_v28 = vld [vmem:[%s12398_s3 + $0x190] sm:$0xff] }
 0x386   :  { %3218 = vmatprep.mubr.f32.mxu0 %v12410_v0  ;;  %v8208_v29 = vpack.c.bf16 %v7583_v28, %v7581_v27 }
 0x388   :  { %8209 = vmatpush1.bf16.msra.mxu1 %v8208_v29 }
 0x389   :  { %7517 = vmatmul.mubr.msk.f32.gmra.mrb[16].mxu0 %vm211_vm3, %v2875_v30  ;;  %v2893_v30 = vld [vmem:[%s12395_s0 + $0xd4] sm:$0xff] }
 0x38a   :  { %3224 = vmatprep.mubr.f32.mxu0 %v12410_v0 }
 0x38d   :  { %7518 = vmatmul.mubr.msk.f32.gmra.mrb[18].mxu0 %vm211_vm3, %v2876_v32  ;;  %v7588_v32 = vld [vmem:[%s12398_s3 + $0x1b8] sm:$0xff] }
 0x38e   :  { %3230 = vmatprep.mubr.f32.mxu0 %v12410_v0  ;;  %v8210_v33 = vpack.c.bf16 %v7588_v32, %v7586_v31  ;;  %v2922_v32 = vld [vmem:[%s12395_s0 + $0x1bc] sm:$0xf] }
 0x390   :  { %8211 = vmatprep.subr.bf16.mxu1 %v8210_v33 }
 0x391   :  { %7519 = vmatmul.mubr.msk.f32.gmra.mrb[20].mxu0 %vm211_vm3, %v2877_v34  ;;  %v7585_v34 = vld [vmem:[%s12398_s3 + $0x1a0] sm:$0xff] }
 0x392   :  { %3236 = vmatprep.mubr.f32.mxu0 %v12410_v0 }
 0x395   :  { %7520 = vmatmul.mubr.msk.f32.gmra.mrb[22].mxu0 %vm211_vm3, %v2878_v36  ;;  %v8212_v36 = vpack.c.bf16 %v7587_v35, %v7585_v34  ;;  %v11115_v34 = vpop.f32.mrb[0].mxu1 }
 0x396   :  { %3242 = vmatprep.mubr.f32.mxu0 %v12410_v0 }
 0x397   :  { %8213 = vmatpush1.bf16.msra.mxu1 %v8212_v36 }
 0x399   :  { %7521 = vmatmul.mubr.msk.f32.gmra.mrb[24].mxu0 %vm211_vm3, %v2879_v38  ;;  %v7590_v38 = vld [vmem:[%s12398_s3 + $0x1c8] sm:$0xff] }
 0x39a   :  { %3248 = vmatprep.mubr.f32.mxu0 %v12410_v0 }
 0x39d   :  { %7522 = vmatmul.mubr.msk.f32.gmra.mrb[26].mxu0 %vm211_vm3, %v2880_v40  ;;  %v8214_v40 = vpack.c.bf16 %v7592_v39, %v7590_v38 }
 0x39e   :  { %3254 = vmatprep.mubr.f32.mxu0 %v12410_v0 }
 0x39f   :  { %8215 = vmatprep.subr.bf16.mxu1 %v8214_v40 }
 0x3a1   :  { %7523 = vmatmul.mubr.msk.f32.gmra.mrb[28].mxu0 %vm211_vm3, %v2881_v42  ;;  %v7591_v42 = vld [vmem:[%s12398_s3 + $0x1d0] sm:$0xff] }
 0x3a2   :  { %3260 = vmatprep.mubr.f32.mxu0 %v12410_v0  ;;  %v8216_v43 = vpack.c.bf16 %v7591_v42, %v7589_v41 }
 0x3a4   :  { %8217 = vmatpush1.bf16.msra.mxu1 %v8216_v43 }
 0x3a5   :  { %7524 = vmatmul.mubr.msk.f32.gmra.mrb[30].mxu0 %vm211_vm3, %v2882_v44  ;;  %v2895_v44 = vld [vmem:[%s12395_s0 + $0xe4] sm:$0xff] }
 0x3a6   :  { %3266 = vmatprep.mubr.f32.mxu0 %v12410_v0 }
 0x3a9   :  { %7525 = vmatmul.mubr.msk.f32.gmra.mrb[32].mxu0 %vm211_vm3, %v2883_v46  ;;  %v7596_v46 = vld [vmem:[%s12398_s3 + $0x1f8] sm:$0xff] }
 0x3aa   :  { %3272 = vmatprep.mubr.f32.mxu0 %v12410_v0  ;;  %v8218_v47 = vpack.c.bf16 %v7596_v46, %v7594_v45 }
 0x3ac   :  { %8219 = vmatprep.subr.bf16.mxu1 %v8218_v47 }
 0x3ad   :  { %7526 = vmatmul.mubr.msk.f32.gmra.mrb[34].mxu0 %vm211_vm3, %v2884_v48  ;;  %v7593_v48 = vld [vmem:[%s12398_s3 + $0x1e0] sm:$0xff] }
 0x3ae   :  { %3278 = vmatprep.mubr.f32.mxu0 %v12410_v0 }
 0x3b1   :  { %7527 = vmatmul.mubr.msk.f32.gmra.mrb[36].mxu0 %vm211_vm3, %v2885_v49  ;;  %v8220_v49 = vpack.c.bf16 %v7595_v10, %v7593_v48 }
 0x3b2   :  { %3284 = vmatprep.mubr.f32.mxu0 %v12410_v0 }
 0x3b3   :  { %8221 = vmatpush1.bf16.msra.mxu1 %v8220_v49 }
 0x3b5   :  { %7528 = vmatmul.mubr.msk.f32.gmra.mrb[38].mxu0 %vm211_vm3, %v2886_v51  ;;  %v2897_v51 = vld [vmem:[%s12395_s0 + $0xf4] sm:$0xff] }
 0x3b6   :  { %3290 = vmatprep.mubr.f32.mxu0 %v12410_v0 }
 0x3b9   :  { %7529 = vmatmul.mubr.msk.f32.gmra.mrb[40].mxu0 %vm211_vm3, %v2887_v53  ;;  %v2899_v53 = vld [vmem:[%s12395_s0 + $0x104] sm:$0xff] }
 0x3ba   :  { %3296 = vmatprep.mubr.f32.mxu0 %v12410_v0 }
 0x3bd   :  { %7530 = vmatmul.mubr.msk.f32.gmra.mrb[42].mxu0 %vm211_vm3, %v2888_v55  ;;  %v2901_v55 = vld [vmem:[%s12395_s0 + $0x114] sm:$0xff] }
 0x3be   :  { %3302 = vmatprep.mubr.f32.mxu0 %v12410_v0 }
 0x3c1   :  { %7531 = vmatmul.mubr.msk.f32.gmra.mrb[44].mxu0 %vm211_vm3, %v2889_v62  ;;  %v2908_v62 = vld [vmem:[%s12395_s0 + $0x14c] sm:$0xff] }
 0x3c2   :  { %3308 = vmatprep.mubr.f32.mxu0 %v12410_v0 }
 0x3c5   :  { %7532 = vmatmul.mubr.msk.f32.gmra.mrb[46].mxu0 %vm211_vm3, %v2890_v7  ;;  %v2916_v7 = vld [vmem:[%s12395_s0 + $0x18c] sm:$0xff] }
 0x3c6   :  { %3314 = vmatprep.mubr.f32.mxu0 %v12410_v0 }
 0x3c9   :  { %7533 = vmatmul.mubr.msk.f32.gmra.mrb[48].mxu0 %vm211_vm3, %v2891_v16  ;;  %v12408_v16 = vsub.s32 1, %v11072_v11 }
 0x3ca   :  { %3320 = vmatprep.mubr.f32.mxu0 %v12410_v0 }
 0x3cb   :  { %v11096_v18 = vrot.slane %v3619_v15, %v12408_v16 }
 0x3cd   :  { %7534 = vmatmul.mubr.msk.f32.gmra.mrb[50].mxu0 %vm211_vm3, %v2892_v23 }
 0x3ce   :  { %3326 = vmatprep.mubr.f32.mxu0 %v12410_v0 }
 0x3d1   :  { %7535 = vmatmul.mubr.msk.f32.gmra.mrb[52].mxu0 %vm211_vm3, %v2893_v30 }
 0x3d2   :  { %3332 = vmatprep.mubr.f32.mxu0 %v12410_v0 }
 0x3d5   :  { %7536 = vmatmul.mubr.msk.f32.gmra.mrb[54].mxu0 %vm211_vm3, %v2894_v37  ;;  %v11117_v37 = vpop.f32.mrb[1].mxu1 }
 0x3d6   :  { %3338 = vmatprep.mubr.f32.mxu0 %v12410_v0  ;;  %v11122_v43 = vpop.f32.mrb[2].mxu1 }
 0x3d7   :  { %v11124_v46 = vpop.f32.mrb[3].mxu1 }
 0x3d9   :  { %7537 = vmatmul.mubr.msk.f32.gmra.mrb[56].mxu0 %vm211_vm3, %v2895_v44 }
 0x3da   :  { %3344 = vmatprep.mubr.f32.mxu0 %v12410_v0 }
 0x3dd   :  { %7538 = vmatmul.mubr.msk.f32.gmra.mrb[58].mxu0 %vm211_vm3, %v2896_v50 }
 0x3de   :  { %3350 = vmatprep.mubr.f32.mxu0 %v12410_v0 }
 0x3e1   :  { %7539 = vmatmul.mubr.msk.f32.gmra.mrb[60].mxu0 %vm211_vm3, %v2897_v51  ;;  %v11128_v51 = vpop.f32.mrb[4].mxu1 }
 0x3e2   :  { %3356 = vmatprep.mubr.f32.mxu0 %v12410_v0 }
 0x3e5   :  { %7540 = vmatmul.mubr.msk.f32.gmra.mrb[62].mxu0 %vm211_vm3, %v2898_v52 }
 0x3e6   :  { %3362 = vmatprep.mubr.f32.mxu0 %v12410_v0 }
 0x3e9   :  { %7541 = vmatmul.mubr.msk.f32.gmra.mrb[64].mxu0 %vm211_vm3, %v2899_v53 }
 0x3ea   :  { %3368 = vmatprep.mubr.f32.mxu0 %v12410_v0 }
 0x3ed   :  { %7542 = vmatmul.mubr.msk.f32.gmra.mrb[66].mxu0 %vm211_vm3, %v2900_v54  ;;  %v11130_v54 = vpop.f32.mrb[5].mxu1 }
 0x3ee   :  { %3374 = vmatprep.mubr.f32.mxu0 %v12410_v0 }
 0x3f1   :  { %7543 = vmatmul.mubr.msk.f32.gmra.mrb[68].mxu0 %vm211_vm3, %v2901_v55 }
 0x3f2   :  { %3380 = vmatprep.mubr.f32.mxu0 %v12410_v0 }
 0x3f5   :  { %7544 = vmatmul.mubr.msk.f32.gmra.mrb[70].mxu0 %vm211_vm3, %v2902_v56 }
 0x3f6   :  { %3386 = vmatprep.mubr.f32.mxu0 %v12410_v0 }
 0x3f9   :  { %7545 = vmatmul.mubr.msk.f32.gmra.mrb[72].mxu0 %vm211_vm3, %v2903_v57 }
 0x3fa   :  { %3392 = vmatprep.mubr.f32.mxu0 %v12410_v0 }
 0x3fd   :  { %7546 = vmatmul.mubr.msk.f32.gmra.mrb[74].mxu0 %vm211_vm3, %v2904_v58 }
 0x3fe   :  { %3398 = vmatprep.mubr.f32.mxu0 %v12410_v0 }
 0x401   :  { %7547 = vmatmul.mubr.msk.f32.gmra.mrb[76].mxu0 %vm211_vm3, %v2905_v59 }
 0x402   :  { %3404 = vmatprep.mubr.f32.mxu0 %v12410_v0 }
 0x405   :  { %7548 = vmatmul.mubr.msk.f32.gmra.mrb[78].mxu0 %vm211_vm3, %v2906_v60 }
 0x406   :  { %3410 = vmatprep.mubr.f32.mxu0 %v12410_v0 }
 0x409   :  { %7549 = vmatmul.mubr.msk.f32.gmra.mrb[80].mxu0 %vm211_vm3, %v2907_v61  ;;  %v11134_v61 = vpop.f32.mrb[6].mxu1 }
 0x40a   :  { %3416 = vmatprep.mubr.f32.mxu0 %v12410_v0 }
 0x40d   :  { %7550 = vmatmul.mubr.msk.f32.gmra.mrb[82].mxu0 %vm211_vm3, %v2908_v62 }
 0x40e   :  { %3422 = vmatprep.mubr.f32.mxu0 %v12410_v0 }
 0x411   :  { %7551 = vmatmul.mubr.msk.f32.gmra.mrb[84].mxu0 %vm211_vm3, %v2909_v63 }
 0x412   :  { %3428 = vmatprep.mubr.f32.mxu0 %v12410_v0 }
 0x415   :  { %7552 = vmatmul.mubr.msk.f32.gmra.mrb[86].mxu0 %vm211_vm3, %v2910_v1 }
 0x416   :  { %3434 = vmatprep.mubr.f32.mxu0 %v12410_v0 }
 0x419   :  { %7553 = vmatmul.mubr.msk.f32.gmra.mrb[88].mxu0 %vm211_vm3, %v2911_v2  ;;  %v11136_v2 = vpop.f32.mrb[7].mxu1 }
 0x41a   :  { %3440 = vmatprep.mubr.f32.mxu0 %v12410_v0 }
 0x41d   :  { %7554 = vmatmul.mubr.msk.f32.gmra.mrb[90].mxu0 %vm211_vm3, %v2912_v3 }
 0x41e   :  { %3446 = vmatprep.mubr.f32.mxu0 %v12410_v0 }
 0x421   :  { %7555 = vmatmul.mubr.msk.f32.gmra.mrb[92].mxu0 %vm211_vm3, %v2913_v4 }
 0x422   :  { %3452 = vmatprep.mubr.f32.mxu0 %v12410_v0 }
 0x425   :  { %7556 = vmatmul.mubr.msk.f32.gmra.mrb[94].mxu0 %vm211_vm3, %v2914_v5 }
 0x426   :  { %3458 = vmatprep.mubr.f32.mxu0 %v12410_v0 }
 0x429   :  { %7557 = vmatmul.mubr.msk.f32.gmra.mrb[96].mxu0 %vm211_vm3, %v2915_v6 }
 0x42a   :  { %3464 = vmatprep.mubr.f32.mxu0 %v12410_v0 }
 0x42d   :  { %7558 = vmatmul.mubr.msk.f32.gmra.mrb[98].mxu0 %vm211_vm3, %v2916_v7 }
 0x42e   :  { %3470 = vmatprep.mubr.f32.mxu0 %v12410_v0 }
 0x431   :  { %7559 = vmatmul.mubr.msk.f32.gmra.mrb[100].mxu0 %vm211_vm3, %v2917_v9  ;;  %v11142_v9 = vpop.f32.mrb[8].mxu1 }
 0x432   :  { %3476 = vmatprep.mubr.f32.mxu0 %v12410_v0 }
 0x435   :  { %7560 = vmatmul.mubr.msk.f32.gmra.mrb[102].mxu0 %vm211_vm3, %v2918_v12 }
 0x436   :  { %3482 = vmatprep.mubr.f32.mxu0 %v12410_v0 }
 0x439   :  { %7561 = vmatmul.mubr.msk.f32.gmra.mrb[104].mxu0 %vm211_vm3, %v2919_v14 }
 0x43a   :  { %3488 = vmatprep.mubr.f32.mxu0 %v12410_v0 }
 0x43c   :  { %v3172_v20 = vpop.f32.mrb[0].mxu0 }
 0x43d   :  { %v3631_v21 = vadd.f32 %v11091_v17, %v3172_v20  ;;  %v3174_v22 = vpop.f32.mrb[1].mxu0  ;;  %7562 = vmatmul.mubr.msk.f32.gmra.mrb[106].mxu0 %vm211_vm3, %v2920_v19  ;;  %v11145_v19 = vpop.f32.mrb[9].mxu1 }
 0x43e   :  { %v3632_v23 = vadd.f32 %v11096_v18, %v3174_v22  ;;  %3494 = vmatprep.mubr.f32.mxu0 %v12410_v0 }
 0x43f   :  { %v3743_v25 = vmax.f32 %v3631_v21, 0.0 }
 0x440   :  { %v3744_v26 = vmax.f32 %v3632_v23, 0.0  ;;  %v3178_v27 = vpop.f32.mrb[2].mxu0 }
 0x441   :  { %v3633_v28 = vadd.f32 %v11091_v17, %v3178_v27  ;;  %v3180_v29 = vpop.f32.mrb[3].mxu0  ;;  %7563 = vmatmul.mubr.msk.f32.gmra.mrb[108].mxu0 %vm211_vm3, %v2921_v24 }
 0x442   :  { %v3855_v30 = vmax.f32 %v3743_v25, %v3744_v26  ;;  %v3634_v31 = vadd.f32 %v11096_v18, %v3180_v29  ;;  %3500 = vmatprep.mubr.f32.mxu0 %v12410_v0  ;;  %v11151_v26 = vpop.f32.mrb[10].mxu1 }
 0x443   :  { %v3745_v33 = vmax.f32 %v3633_v28, 0.0 }
 0x444   :  { %3911 = vst [vmem:[#allocation2] sm:$0xff] %v3855_v30  ;;  %v3746_v35 = vmax.f32 %v3634_v31, 0.0  ;;  %v3184_v36 = vpop.f32.mrb[4].mxu0 }
 0x445   :  { %v3635_v38 = vadd.f32 %v11091_v17, %v3184_v36  ;;  %v3186_v39 = vpop.f32.mrb[5].mxu0  ;;  %7564 = vmatmul.mubr.msk.f32.gmra.mrb[110].mxu0 %vm211_vm3, %v2922_v32  ;;  %v4247_v36 = vld [vmem:[%s12398_s3 + $0x8] sm:$0xff] }
 0x446   :  { %v3856_v40 = vmax.f32 %v3745_v33, %v3746_v35  ;;  %v3636_v41 = vadd.f32 %v11096_v18, %v3186_v39 }
 0x447   :  { %v3747_v42 = vmax.f32 %v3635_v38, 0.0  ;;  %v4249_v38 = vld [vmem:[%s12398_s3 + $0x18] sm:$0xff] }
 0x448   :  { %3912 = vst [vmem:[#allocation2 + $0x8] sm:$0xff] %v3856_v40  ;;  %v3748_v44 = vmax.f32 %v3636_v41, 0.0  ;;  %v3190_v45 = vpop.f32.mrb[6].mxu0  ;;  %v8222_v41 = vpack.c.bf16 %v4249_v38, %v4247_v36 }
 0x449   :  { %v3637_v47 = vadd.f32 %v11091_v17, %v3190_v45  ;;  %v3192_v48 = vpop.f32.mrb[7].mxu0 }
 0x44a   :  { %v3857_v10 = vmax.f32 %v3747_v42, %v3748_v44  ;;  %v3638_v49 = vadd.f32 %v11096_v18, %v3192_v48  ;;  %8223 = vmatprep.subr.bf16.mxu1 %v8222_v41 }
 0x44b   :  { %v3749_v50 = vmax.f32 %v3637_v47, 0.0 }
 0x44c   :  { %3913 = vst [vmem:[#allocation2 + $0x10] sm:$0xff] %v3857_v10  ;;  %v3750_v52 = vmax.f32 %v3638_v49, 0.0  ;;  %v3196_v53 = vpop.f32.mrb[8].mxu0 }
 0x44d   :  { %v3639_v55 = vadd.f32 %v11091_v17, %v3196_v53  ;;  %v3198_v56 = vpop.f32.mrb[9].mxu0 }
 0x44e   :  { %v3858_v57 = vmax.f32 %v3749_v50, %v3750_v52  ;;  %v3640_v58 = vadd.f32 %v11096_v18, %v3198_v56  ;;  %v4248_v56 = vld [vmem:[%s12398_s3 + $0x10] sm:$0xff] }
 0x44f   :  { %v4023_v59 = vld [vmem:[#allocation2 + $0x1] sm:$0xff]  ;;  %v3751_v60 = vmax.f32 %v3639_v55, 0.0 }
 0x450   :  { %v4079_v62 = vmax.f32 %v3855_v30, %v4023_v59  ;;  %3914 = vst [vmem:[#allocation2 + $0x18] sm:$0xff] %v3858_v57  ;;  %v3752_v63 = vmax.f32 %v3640_v58, 0.0  ;;  %v3202_v1 = vpop.f32.mrb[10].mxu0  ;;  %v11154_v30 = vpop.f32.mrb[11].mxu1  ;;  %v4246_v55 = vld [vmem:[%s12398_s3] sm:$0xff] }
 0x451   :  { %v3641_v3 = vadd.f32 %v11091_v17, %v3202_v1  ;;  %v3204_v4 = vpop.f32.mrb[11].mxu0  ;;  %v11166_v42 = vpop.f32.mrb[12].mxu1  ;;  %v8224_v59 = vpack.c.bf16 %v4248_v56, %v4246_v55 }
 0x452   :  { %4135 = vst [vmem:[#allocation3] sm:$0xff] %v4079_v62  ;;  %v11139_v5 = vmax.f32 %v3751_v60, %v3752_v63  ;;  %v3642_v6 = vadd.f32 %v11096_v18, %v3204_v4  ;;  %v11169_v48 = vpop.f32.mrb[13].mxu1 }
 0x453   :  { %v4024_v7 = vld [vmem:[#allocation2 + $0x9] sm:$0xff]  ;;  %v3753_v8 = vmax.f32 %v3641_v3, 0.0  ;;  %v11182_v60 = vpop.f32.mrb[14].mxu1 }
 0x454   :  { %v4080_v12 = vmax.f32 %v3856_v40, %v4024_v7  ;;  %3915 = vst [vmem:[#allocation2 + $0x20] sm:$0xff] %v11139_v5  ;;  %v3754_v14 = vmax.f32 %v3642_v6, 0.0  ;;  %v3208_v15 = vpop.f32.mrb[12].mxu0  ;;  %v11186_v3 = vpop.f32.mrb[15].mxu1 }
 0x455   :  { %v3643_v20 = vadd.f32 %v11091_v17, %v3208_v15  ;;  %v3210_v21 = vpop.f32.mrb[13].mxu0 }
 0x456   :  { %4136 = vst [vmem:[#allocation3 + $0x8] sm:$0xff] %v4080_v12  ;;  %v11148_v22 = vmax.f32 %v3753_v8, %v3754_v14  ;;  %v3644_v23 = vadd.f32 %v11096_v18, %v3210_v21 }
 0x457   :  { %v3755_v24 = vmax.f32 %v3643_v20, 0.0  ;;  %v4025_v25 = vld [vmem:[#allocation2 + $0x11] sm:$0xff]  ;;  %v11193_v20 = vpop.f32.mrb[16].mxu1 }
 0x458   :  { %3916 = vst [vmem:[#allocation2 + $0x28] sm:$0xff] %v11148_v22  ;;  %v3756_v27 = vmax.f32 %v3644_v23, 0.0  ;;  %v3214_v28 = vpop.f32.mrb[14].mxu0  ;;  %v4081_v29 = vmax.f32 %v3857_v10, %v4025_v25 }
 0x459   :  { %v3645_v31 = vadd.f32 %v11091_v17, %v3214_v28  ;;  %v3216_v32 = vpop.f32.mrb[15].mxu0 }
 0x45a   :  { %v11157_v33 = vmax.f32 %v3755_v24, %v3756_v27  ;;  %v3646_v35 = vadd.f32 %v11096_v18, %v3216_v32  ;;  %4137 = vst [vmem:[#allocation3 + $0x10] sm:$0xff] %v4081_v29  ;;  %v11197_v24 = vpop.f32.mrb[17].mxu1 }
 0x45b   :  { %v3757_v39 = vmax.f32 %v3645_v31, 0.0  ;;  %v4026_v40 = vld [vmem:[#allocation2 + $0x19] sm:$0xff]  ;;  %v11204_v36 = vpop.f32.mrb[18].mxu1 }
 0x45c   :  { %3917 = vst [vmem:[#allocation2 + $0x30] sm:$0xff] %v11157_v33  ;;  %v3758_v44 = vmax.f32 %v3646_v35, 0.0  ;;  %v3220_v45 = vpop.f32.mrb[16].mxu0  ;;  %v4082_v47 = vmax.f32 %v3858_v57, %v4026_v40  ;;  %v11208_v40 = vpop.f32.mrb[19].mxu1 }
 0x45d   :  { %v3647_v10 = vadd.f32 %v11091_v17, %v3220_v45  ;;  %v3222_v49 = vpop.f32.mrb[17].mxu0  ;;  %v4278_v50 = vld [vmem:[#allocation3 + $0x2] sm:$0xff] }
 0x45e   :  { %v11172_v52 = vmax.f32 %v3757_v39, %v3758_v44  ;;  %v3648_v53 = vadd.f32 %v11096_v18, %v3222_v49  ;;  %4431 = vmatmul.mubr.f32.vlgmr.msra.gmra.mrb[44].mxu1 %v4278_v50  ;;  %4138 = vst [vmem:[#allocation3 + $0x18] sm:$0xff] %v4082_v47 }
 0x45f   :  { %v3759_v57 = vmax.f32 %v3647_v10, 0.0  ;;  %4436 = vmatprep.mubr.f32.mxu1 %v12410_v0  ;;  %v4027_v58 = vld [vmem:[#allocation2 + $0x21] sm:$0xff]  ;;  %8225 = vmatpush1.bf16.msra.mxu1 %v8224_v59 }
 0x460   :  { %3918 = vst [vmem:[#allocation2 + $0x38] sm:$0xff] %v11172_v52  ;;  %v3760_v62 = vmax.f32 %v3648_v53, 0.0  ;;  %v3226_v63 = vpop.f32.mrb[18].mxu0  ;;  %v4083_v1 = vmax.f32 %v11139_v5, %v4027_v58  ;;  %v11215_v53 = vpop.f32.mrb[20].mxu1 }
 0x461   :  { %v3649_v4 = vadd.f32 %v11091_v17, %v3226_v63  ;;  %v3228_v6 = vpop.f32.mrb[19].mxu0  ;;  %v4279_v7 = vld [vmem:[#allocation3 + $0xa] sm:$0xff] }
 0x462   :  { %v11189_v8 = vmax.f32 %v3759_v57, %v3760_v62  ;;  %v3650_v12 = vadd.f32 %v11096_v18, %v3228_v6  ;;  %4437 = vmatmul.mubr.f32.gmra.mrb[46].mxu1 %v4279_v7  ;;  %4139 = vst [vmem:[#allocation3 + $0x20] sm:$0xff] %v4083_v1  ;;  %v11219_v57 = vpop.f32.mrb[21].mxu1 }
 0x463   :  { %v3761_v14 = vmax.f32 %v3649_v4, 0.0  ;;  %4442 = vmatprep.mubr.f32.mxu1 %v12410_v0  ;;  %v4028_v15 = vld [vmem:[#allocation2 + $0x29] sm:$0xff]  ;;  %v11226_v7 = vpop.f32.mrb[22].mxu1 }
 0x464   :  { %3919 = vst [vmem:[#allocation2 + $0x40] sm:$0xff] %v11189_v8  ;;  %v3762_v5 = vmax.f32 %v3650_v12, 0.0  ;;  %v3232_v21 = vpop.f32.mrb[20].mxu0  ;;  %v4084_v23 = vmax.f32 %v11148_v22, %v4028_v15  ;;  %v11230_v15 = vpop.f32.mrb[23].mxu1 }
 0x465   :  { %v3651_v25 = vadd.f32 %v11091_v17, %v3232_v21  ;;  %v3234_v27 = vpop.f32.mrb[21].mxu0  ;;  %v4280_v28 = vld [vmem:[#allocation3 + $0x12] sm:$0xff] }
 0x466   :  { %v11200_v29 = vmax.f32 %v3761_v14, %v3762_v5  ;;  %v3652_v31 = vadd.f32 %v11096_v18, %v3234_v27  ;;  %4443 = vmatmul.mubr.f32.gmra.mrb[48].mxu1 %v4280_v28  ;;  %4140 = vst [vmem:[#allocation3 + $0x28] sm:$0xff] %v4084_v23 }
 0x467   :  { %v3763_v32 = vmax.f32 %v3651_v25, 0.0  ;;  %4448 = vmatprep.mubr.f32.mxu1 %v12410_v0  ;;  %v4029_v35 = vld [vmem:[#allocation2 + $0x31] sm:$0xff] }
 0x468   :  { %3920 = vst [vmem:[#allocation2 + $0x48] sm:$0xff] %v11200_v29  ;;  %v3764_v22 = vmax.f32 %v3652_v31, 0.0  ;;  %v3238_v38 = vpop.f32.mrb[22].mxu0  ;;  %v4085_v39 = vmax.f32 %v11157_v33, %v4029_v35 }
 0x469   :  { %v3653_v41 = vadd.f32 %v11091_v17, %v3238_v38  ;;  %v3240_v44 = vpop.f32.mrb[23].mxu0  ;;  %v4281_v45 = vld [vmem:[#allocation3 + $0x1a] sm:$0xff] }
 0x46a   :  { %v11211_v47 = vmax.f32 %v3763_v32, %v3764_v22  ;;  %v3654_v10 = vadd.f32 %v11096_v18, %v3240_v44  ;;  %4449 = vmatmul.mubr.f32.gmra.mrb[50].mxu1 %v4281_v45  ;;  %4141 = vst [vmem:[#allocation3 + $0x30] sm:$0xff] %v4085_v39  ;;  %v11237_v32 = vpop.f32.mrb[24].mxu1 }
 0x46b   :  { %v3765_v49 = vmax.f32 %v3653_v41, 0.0  ;;  %4454 = vmatprep.mubr.f32.mxu1 %v12410_v0  ;;  %v4030_v50 = vld [vmem:[#allocation2 + $0x39] sm:$0xff]  ;;  %v11241_v38 = vpop.f32.mrb[25].mxu1 }
 0x46c   :  { %3921 = vst [vmem:[#allocation2 + $0x50] sm:$0xff] %v11211_v47  ;;  %v3766_v33 = vmax.f32 %v3654_v10, 0.0  ;;  %v3244_v55 = vpop.f32.mrb[24].mxu0  ;;  %v4086_v56 = vmax.f32 %v11172_v52, %v4030_v50 }
 0x46d   :  { %v3655_v58 = vadd.f32 %v11091_v17, %v3244_v55  ;;  %v3246_v59 = vpop.f32.mrb[25].mxu0  ;;  %v4282_v62 = vld [vmem:[#allocation3 + $0x22] sm:$0xff] }
 0x46e   :  { %v11222_v63 = vmax.f32 %v3765_v49, %v3766_v33  ;;  %v3656_v1 = vadd.f32 %v11096_v18, %v3246_v59  ;;  %4455 = vmatmul.mubr.f32.gmra.mrb[52].mxu1 %v4282_v62  ;;  %4142 = vst [vmem:[#allocation3 + $0x38] sm:$0xff] %v4086_v56  ;;  %v4251_v49 = vld [vmem:[%s12398_s3 + $0x28] sm:$0xff]  ;;  %v11254_v56 = vpop.f32.mrb[26].mxu1 }
 0x46f   :  { %v3767_v4 = vmax.f32 %v3655_v58, 0.0  ;;  %4460 = vmatprep.mubr.f32.mxu1 %v12410_v0  ;;  %v4031_v6 = vld [vmem:[#allocation2 + $0x41] sm:$0xff] }
 0x470   :  { %3922 = vst [vmem:[#allocation2 + $0x58] sm:$0xff] %v11222_v63  ;;  %v3768_v52 = vmax.f32 %v3656_v1, 0.0  ;;  %v3250_v12 = vpop.f32.mrb[26].mxu0  ;;  %v4087_v14 = vmax.f32 %v11189_v8, %v4031_v6  ;;  %v11258_v1 = vpop.f32.mrb[27].mxu1 }
 0x471   :  { %v3657_v5 = vadd.f32 %v11091_v17, %v3250_v12  ;;  %v3252_v21 = vpop.f32.mrb[27].mxu0  ;;  %v4283_v23 = vld [vmem:[#allocation3 + $0x2a] sm:$0xff] }
 0x472   :  { %v11233_v25 = vmax.f32 %v3767_v4, %v3768_v52  ;;  %v3658_v27 = vadd.f32 %v11096_v18, %v3252_v21  ;;  %4461 = vmatmul.mubr.f32.gmra.mrb[54].mxu1 %v4283_v23  ;;  %4143 = vst [vmem:[#allocation3 + $0x40] sm:$0xff] %v4087_v14 }
 0x473   :  { %v3769_v28 = vmax.f32 %v3657_v5, 0.0  ;;  %4466 = vmatprep.mubr.f32.mxu1 %v12410_v0  ;;  %v4032_v31 = vld [vmem:[#allocation2 + $0x49] sm:$0xff]  ;;  %v4250_v5 = vld [vmem:[%s12398_s3 + $0x20] sm:$0xff] }
 0x474   :  { %3923 = vst [vmem:[#allocation2 + $0x60] sm:$0xff] %v11233_v25  ;;  %v3770_v8 = vmax.f32 %v3658_v27, 0.0  ;;  %v3256_v35 = vpop.f32.mrb[28].mxu0  ;;  %v4088_v22 = vmax.f32 %v11200_v29, %v4032_v31  ;;  %v4253_v29 = vld [vmem:[%s12398_s3 + $0x38] sm:$0xff] }
 0x475   :  { %v3659_v39 = vadd.f32 %v11091_v17, %v3256_v35  ;;  %v3258_v41 = vpop.f32.mrb[29].mxu0  ;;  %v4284_v44 = vld [vmem:[#allocation3 + $0x32] sm:$0xff]  ;;  %v8226_v55 = vpack.c.bf16 %v4253_v29, %v4251_v49 }
 0x476   :  { %v11244_v45 = vmax.f32 %v3769_v28, %v3770_v8  ;;  %v3660_v10 = vadd.f32 %v11096_v18, %v3258_v41  ;;  %4467 = vmatmul.mubr.f32.gmra.mrb[56].mxu1 %v4284_v44  ;;  %4144 = vst [vmem:[#allocation3 + $0x48] sm:$0xff] %v4088_v22  ;;  %v11271_v28 = vpop.f32.mrb[28].mxu1 }
 0x477   :  { %v3771_v50 = vmax.f32 %v3659_v39, 0.0  ;;  %4472 = vmatprep.mubr.f32.mxu1 %v12410_v0  ;;  %v4033_v33 = vld [vmem:[#allocation2 + $0x51] sm:$0xff]  ;;  %8227 = vmatprep.subr.bf16.mxu1 %v8226_v55  ;;  %v11275_v22 = vpop.f32.mrb[29].mxu1 }
 0x478   :  { %3924 = vst [vmem:[#allocation2 + $0x68] sm:$0xff] %v11244_v45  ;;  %v3772_v58 = vmax.f32 %v3660_v10, 0.0  ;;  %v3262_v59 = vpop.f32.mrb[30].mxu0  ;;  %v4089_v62 = vmax.f32 %v11211_v47, %v4033_v33  ;;  %v4252_v47 = vld [vmem:[%s12398_s3 + $0x30] sm:$0xff]  ;;  %v11282_v33 = vpop.f32.mrb[30].mxu1 }
 0x479   :  { %v3661_v4 = vadd.f32 %v11091_v17, %v3262_v59  ;;  %v3264_v6 = vpop.f32.mrb[31].mxu0  ;;  %v4285_v52 = vld [vmem:[#allocation3 + $0x3a] sm:$0xff]  ;;  %v8228_v27 = vpack.c.bf16 %v4252_v47, %v4250_v5  ;;  %v11286_v59 = vpop.f32.mrb[31].mxu1 }
 0x47a   :  { %v11261_v12 = vmax.f32 %v3771_v50, %v3772_v58  ;;  %v3662_v14 = vadd.f32 %v11096_v18, %v3264_v6  ;;  %4473 = vmatmul.mubr.f32.gmra.mrb[58].mxu1 %v4285_v52  ;;  %4145 = vst [vmem:[#allocation3 + $0x50] sm:$0xff] %v4089_v62 }
 0x47b   :  { %v3773_v21 = vmax.f32 %v3661_v4, 0.0  ;;  %4478 = vmatprep.mubr.f32.mxu1 %v12410_v0  ;;  %v4034_v23 = vld [vmem:[#allocation2 + $0x59] sm:$0xff]  ;;  %8229 = vmatpush1.bf16.msra.mxu1 %v8228_v27 }
 0x47c   :  { %3925 = vst [vmem:[#allocation2 + $0x70] sm:$0xff] %v11261_v12  ;;  %v3774_v31 = vmax.f32 %v3662_v14, 0.0  ;;  %v3268_v8 = vpop.f32.mrb[32].mxu0  ;;  %v4090_v35 = vmax.f32 %v11222_v63, %v4034_v23 }
 0x47d   :  { %v3663_v39 = vadd.f32 %v11091_v17, %v3268_v8  ;;  %v3270_v41 = vpop.f32.mrb[33].mxu0  ;;  %v4286_v44 = vld [vmem:[#allocation3 + $0x42] sm:$0xff] }
 0x47e   :  { %v11278_v10 = vmax.f32 %v3773_v21, %v3774_v31  ;;  %v3664_v49 = vadd.f32 %v11096_v18, %v3270_v41  ;;  %4479 = vmatmul.mubr.f32.gmra.mrb[60].mxu1 %v4286_v44  ;;  %4146 = vst [vmem:[#allocation3 + $0x58] sm:$0xff] %v4090_v35  ;;  %v11293_v21 = vpop.f32.mrb[32].mxu1 }
 0x47f   :  { %v3775_v29 = vmax.f32 %v3663_v39, 0.0  ;;  %4484 = vmatprep.mubr.f32.mxu1 %v12410_v0  ;;  %v4035_v50 = vld [vmem:[#allocation2 + $0x61] sm:$0xff]  ;;  %v11297_v31 = vpop.f32.mrb[33].mxu1 }
 0x480   :  { %3926 = vst [vmem:[#allocation2 + $0x78] sm:$0xff] %v11278_v10  ;;  %v3776_v63 = vmax.f32 %v3664_v49, 0.0  ;;  %v3274_v55 = vpop.f32.mrb[34].mxu0  ;;  %v4091_v58 = vmax.f32 %v11233_v25, %v4035_v50  ;;  %v11304_v50 = vpop.f32.mrb[34].mxu1 }
 0x481   :  { %v3665_v62 = vadd.f32 %v11091_v17, %v3274_v55  ;;  %v3276_v4 = vpop.f32.mrb[35].mxu0  ;;  %v4287_v6 = vld [vmem:[#allocation3 + $0x4a] sm:$0xff] }
 0x482   :  { %v11289_v52 = vmax.f32 %v3775_v29, %v3776_v63  ;;  %v3666_v14 = vadd.f32 %v11096_v18, %v3276_v4  ;;  %4485 = vmatmul.mubr.f32.gmra.mrb[62].mxu1 %v4287_v6  ;;  %4147 = vst [vmem:[#allocation3 + $0x60] sm:$0xff] %v4091_v58  ;;  %v11308_v58 = vpop.f32.mrb[35].mxu1 }
 0x483   :  { %v3777_v5 = vmax.f32 %v3665_v62, 0.0  ;;  %4490 = vmatprep.mubr.f32.mxu1 %v12410_v0  ;;  %v4036_v47 = vld [vmem:[#allocation2 + $0x69] sm:$0xff] }
 0x484   :  { %3927 = vst [vmem:[#allocation2 + $0x80] sm:$0xff] %v11289_v52  ;;  %v3778_v25 = vmax.f32 %v3666_v14, 0.0  ;;  %v3280_v23 = vpop.f32.mrb[36].mxu0  ;;  %v4092_v27 = vmax.f32 %v11244_v45, %v4036_v47 }
 0x485   :  { %v3667_v8 = vadd.f32 %v11091_v17, %v3280_v23  ;;  %v3282_v35 = vpop.f32.mrb[37].mxu0  ;;  %v4288_v39 = vld [vmem:[#allocation3 + $0x52] sm:$0xff]  ;;  %v11315_v23 = vpop.f32.mrb[36].mxu1 }
 0x486   :  { %v11300_v41 = vmax.f32 %v3777_v5, %v3778_v25  ;;  %v3668_v44 = vadd.f32 %v11096_v18, %v3282_v35  ;;  %4491 = vmatmul.mubr.f32.gmra.mrb[64].mxu1 %v4288_v39  ;;  %4148 = vst [vmem:[#allocation3 + $0x68] sm:$0xff] %v4092_v27  ;;  %v11319_v35 = vpop.f32.mrb[37].mxu1 }
 0x487   :  { %v3779_v49 = vmax.f32 %v3667_v8, 0.0  ;;  %4496 = vmatprep.mubr.f32.mxu1 %v12410_v0  ;;  %v4037_v29 = vld [vmem:[#allocation2 + $0x71] sm:$0xff] }
 0x488   :  { %3928 = vst [vmem:[#allocation2 + $0x88] sm:$0xff] %v11300_v41  ;;  %v3780_v45 = vmax.f32 %v3668_v44, 0.0  ;;  %v3286_v63 = vpop.f32.mrb[38].mxu0  ;;  %v4093_v55 = vmax.f32 %v11261_v12, %v4037_v29 }
 0x489   :  { %v3669_v62 = vadd.f32 %v11091_v17, %v3286_v63  ;;  %v3288_v4 = vpop.f32.mrb[39].mxu0  ;;  %v4289_v6 = vld [vmem:[#allocation3 + $0x5a] sm:$0xff] }
 0x48a   :  { %v11311_v14 = vmax.f32 %v3779_v49, %v3780_v45  ;;  %v3670_v5 = vadd.f32 %v11096_v18, %v3288_v4  ;;  %4497 = vmatmul.mubr.f32.gmra.mrb[66].mxu1 %v4289_v6  ;;  %4149 = vst [vmem:[#allocation3 + $0x70] sm:$0xff] %v4093_v55 }
 0x48b   :  { %v3781_v47 = vmax.f32 %v3669_v62, 0.0  ;;  %4502 = vmatprep.mubr.f32.mxu1 %v12410_v0  ;;  %v4038_v25 = vld [vmem:[#allocation2 + $0x79] sm:$0xff]  ;;  %v11326_v62 = vpop.f32.mrb[38].mxu1 }
 0x48c   :  { %3929 = vst [vmem:[#allocation2 + $0x90] sm:$0xff] %v11311_v14  ;;  %v3782_v12 = vmax.f32 %v3670_v5, 0.0  ;;  %v3292_v27 = vpop.f32.mrb[40].mxu0  ;;  %v4094_v8 = vmax.f32 %v11278_v10, %v4038_v25  ;;  %v11330_v5 = vpop.f32.mrb[39].mxu1 }
 0x48d   :  { %v3671_v39 = vadd.f32 %v11091_v17, %v3292_v27  ;;  %v3294_v44 = vpop.f32.mrb[41].mxu0  ;;  %v4290_v49 = vld [vmem:[#allocation3 + $0x62] sm:$0xff] }
 0x48e   :  { %v11322_v29 = vmax.f32 %v3781_v47, %v3782_v12  ;;  %v3672_v45 = vadd.f32 %v11096_v18, %v3294_v44  ;;  %4503 = vmatmul.mubr.f32.gmra.mrb[68].mxu1 %v4290_v49  ;;  %4150 = vst [vmem:[#allocation3 + $0x78] sm:$0xff] %v4094_v8  ;;  %v4254_v44 = vld [vmem:[%s12398_s3 + $0x40] sm:$0xff] }
 0x48f   :  { %v3783_v63 = vmax.f32 %v3671_v39, 0.0  ;;  %4508 = vmatprep.mubr.f32.mxu1 %v12410_v0  ;;  %v4039_v55 = vld [vmem:[#allocation2 + $0x81] sm:$0xff] }
 0x490   :  { %3930 = vst [vmem:[#allocation2 + $0x98] sm:$0xff] %v11322_v29  ;;  %v3784_v10 = vmax.f32 %v3672_v45, 0.0  ;;  %v3298_v4 = vpop.f32.mrb[42].mxu0  ;;  %v4095_v6 = vmax.f32 %v11289_v52, %v4039_v55  ;;  %v4255_v39 = vld [vmem:[%s12398_s3 + $0x48] sm:$0xff]  ;;  %v4257_v52 = vld [vmem:[%s12398_s3 + $0x58] sm:$0xff]  ;;  %v4256_v55 = vld [vmem:[%s12398_s3 + $0x50] sm:$0xff] }
 0x491   :  { %v3673_v47 = vadd.f32 %v11091_v17, %v3298_v4  ;;  %v3300_v25 = vpop.f32.mrb[43].mxu0  ;;  %v4291_v12 = vld [vmem:[#allocation3 + $0x6a] sm:$0xff] }
 0x492   :  { %v11333_v27 = vmax.f32 %v3783_v63, %v3784_v10  ;;  %v3674_v8 = vadd.f32 %v11096_v18, %v3300_v25  ;;  %4509 = vmatmul.mubr.f32.gmra.mrb[70].mxu1 %v4291_v12  ;;  %4151 = vst [vmem:[#allocation3 + $0x80] sm:$0xff] %v4095_v6  ;;  %v8230_v63 = vpack.c.bf16 %v4257_v52, %v4255_v39  ;;  %v11349_v10 = vpop.f32.mrb[40].mxu1 }
 0x493   :  { %v3785_v49 = vmax.f32 %v3673_v47, 0.0  ;;  %4514 = vmatprep.mubr.f32.mxu1 %v12410_v0  ;;  %v4040_v45 = vld [vmem:[#allocation2 + $0x89] sm:$0xff]  ;;  %12417 = vst [vmem:[#allocation13_spill] sm:$0xff] %v11349_v10  ;;  %v8232_v12 = vpack.c.bf16 %v4256_v55, %v4254_v44  ;;  %v11353_v16 = vpop.f32.mrb[41].mxu1  ;;  %v12419_v10 = vmov 0.0  }
 0x494   :  { %3931 = vst [vmem:[#allocation2 + $0xa0] sm:$0xff] %v11333_v27  ;;  %v3786_v4 = vmax.f32 %v3674_v8, 0.0  ;;  %v3304_v6 = vpop.f32.mrb[44].mxu0  ;;  %v4096_v25 = vmax.f32 %v11300_v41, %v4040_v45  ;;  %12418 = vst [vmem:[#allocation14_spill] sm:$0xff] %v11353_v16  ;;  %8231 = vmatprep.subr.bf16.mxu1 %v8230_v63  ;;  %v11360_v41 = vpop.f32.mrb[42].mxu1 }
 0x495   :  { %v3675_v47 = vadd.f32 %v11091_v17, %v3304_v6  ;;  %v3306_v13 = vpop.f32.mrb[45].mxu0  ;;  %v4292_v0 = vld [vmem:[#allocation3 + $0x72] sm:$0xff]  ;;  %8233 = vmatpush1.bf16.msra.mxu1 %v8232_v12  ;;  %12420 = vst [vmem:[#allocation15_spill] sm:$0xff] %v11360_v41  ;;  %v11364_v63 = vpop.f32.mrb[43].mxu1 }
 0x496   :  { %v11356_v39 = vmax.f32 %v3785_v49, %v3786_v4  ;;  %v3676_v52 = vadd.f32 %v11096_v18, %v3306_v13  ;;  %4515 = vmatmul.mubr.f32.gmra.mrb[72].mxu1 %v4292_v0  ;;  %4152 = vst [vmem:[#allocation3 + $0x88] sm:$0xff] %v4096_v25  ;;  %12421 = vst [vmem:[#allocation16_spill] sm:$0xff] %v11364_v63 }
 0x497   :  { %v3787_v11 = vmax.f32 %v3675_v47, 0.0  ;;  %4520 = vmatprep.mubr.f32.mxu1 %v12419_v10  ;;  %v4041_v8 = vld [vmem:[#allocation2 + $0x91] sm:$0xff] }
 0x498   :  { %3932 = vst [vmem:[#allocation2 + $0xa8] sm:$0xff] %v11356_v39  ;;  %v3788_v44 = vmax.f32 %v3676_v52, 0.0  ;;  %v3310_v45 = vpop.f32.mrb[46].mxu0  ;;  %v4097_v55 = vmax.f32 %v11311_v14, %v4041_v8 }
 0x499   :  { %v3677_v49 = vadd.f32 %v11091_v17, %v3310_v45  ;;  %v3312_v13 = vpop.f32.mrb[47].mxu0  ;;  %v4293_v0 = vld [vmem:[#allocation3 + $0x7a] sm:$0xff] }
 0x49a   :  { %v11367_v4 = vmax.f32 %v3787_v11, %v3788_v44  ;;  %v3678_v6 = vadd.f32 %v11096_v18, %v3312_v13  ;;  %4521 = vmatmul.mubr.f32.gmra.mrb[74].mxu1 %v4293_v0  ;;  %4153 = vst [vmem:[#allocation3 + $0x90] sm:$0xff] %v4097_v55 }
 0x49b   :  { %v3789_v25 = vmax.f32 %v3677_v49, 0.0  ;;  %4526 = vmatprep.mubr.f32.mxu1 %v12419_v10  ;;  %v4042_v12 = vld [vmem:[#allocation2 + $0x99] sm:$0xff] }
 0x49c   :  { %3933 = vst [vmem:[#allocation2 + $0xb0] sm:$0xff] %v11367_v4  ;;  %v3790_v47 = vmax.f32 %v3678_v6, 0.0  ;;  %v3316_v14 = vpop.f32.mrb[48].mxu0  ;;  %v4098_v52 = vmax.f32 %v11322_v29, %v4042_v12 }
 0x49d   :  { %v3679_v8 = vadd.f32 %v11091_v17, %v3316_v14  ;;  %v3318_v45 = vpop.f32.mrb[49].mxu0  ;;  %v4294_v63 = vld [vmem:[#allocation3 + $0x82] sm:$0xff] }
 0x49e   :  { %v11374_v11 = vmax.f32 %v3789_v25, %v3790_v47  ;;  %v3680_v44 = vadd.f32 %v11096_v18, %v3318_v45  ;;  %4527 = vmatmul.mubr.f32.gmra.mrb[76].mxu1 %v4294_v63  ;;  %4154 = vst [vmem:[#allocation3 + $0x98] sm:$0xff] %v4098_v52 }
 0x49f   :  { %v3791_v55 = vmax.f32 %v3679_v8, 0.0  ;;  %4532 = vmatprep.mubr.f32.mxu1 %v12419_v10  ;;  %v4043_v49 = vld [vmem:[#allocation2 + $0xa1] sm:$0xff] }
 0x4a0   :  { %3934 = vst [vmem:[#allocation2 + $0xb8] sm:$0xff] %v11374_v11  ;;  %v3792_v13 = vmax.f32 %v3680_v44, 0.0  ;;  %v3322_v0 = vpop.f32.mrb[50].mxu0  ;;  %v4099_v29 = vmax.f32 %v11333_v27, %v4043_v49 }
 0x4a1   :  { %v3681_v6 = vadd.f32 %v11091_v17, %v3322_v0  ;;  %v3324_v12 = vpop.f32.mrb[51].mxu0  ;;  %v4295_v14 = vld [vmem:[#allocation3 + $0x8a] sm:$0xff] }
 0x4a2   :  { %v11381_v25 = vmax.f32 %v3791_v55, %v3792_v13  ;;  %v3682_v47 = vadd.f32 %v11096_v18, %v3324_v12  ;;  %4533 = vmatmul.mubr.f32.gmra.mrb[78].mxu1 %v4295_v14  ;;  %4155 = vst [vmem:[#allocation3 + $0xa0] sm:$0xff] %v4099_v29  ;;  %v4259_v55 = vld [vmem:[%s12398_s3 + $0x68] sm:$0xff]  ;;  %v4261_v13 = vld [vmem:[%s12398_s3 + $0x78] sm:$0xff]  ;;  %v4260_v14 = vld [vmem:[%s12398_s3 + $0x70] sm:$0xff] }
 0x4a3   :  { %v3793_v63 = vmax.f32 %v3681_v6, 0.0  ;;  %4538 = vmatprep.mubr.f32.mxu1 %v12419_v10  ;;  %v4044_v52 = vld [vmem:[#allocation2 + $0xa9] sm:$0xff]  ;;  %v8234_v12 = vpack.c.bf16 %v4261_v13, %v4259_v55  ;;  %v4265_v13 = vld [vmem:[%s12398_s3 + $0x98] sm:$0xff] }
 0x4a4   :  { %3935 = vst [vmem:[#allocation2 + $0xc0] sm:$0xff] %v11381_v25  ;;  %v3794_v8 = vmax.f32 %v3682_v47, 0.0  ;;  %v3328_v45 = vpop.f32.mrb[52].mxu0  ;;  %v4100_v27 = vmax.f32 %v11356_v39, %v4044_v52  ;;  %v4258_v39 = vld [vmem:[%s12398_s3 + $0x60] sm:$0xff] }
 0x4a5   :  { %v3683_v44 = vadd.f32 %v11091_v17, %v3328_v45  ;;  %v3330_v49 = vpop.f32.mrb[53].mxu0  ;;  %v4296_v0 = vld [vmem:[#allocation3 + $0x92] sm:$0xff]  ;;  %v8236_v45 = vpack.c.bf16 %v4260_v14, %v4258_v39  ;;  %8235 = vmatprep.subr.bf16.mxu1 %v8234_v12  ;;  %v4262_v12 = vld [vmem:[%s12398_s3 + $0x80] sm:$0xff] }
 0x4a6   :  { %v11394_v29 = vmax.f32 %v3793_v63, %v3794_v8  ;;  %v3684_v6 = vadd.f32 %v11096_v18, %v3330_v49  ;;  %4539 = vmatmul.mubr.f32.gmra.mrb[80].mxu1 %v4296_v0  ;;  %4156 = vst [vmem:[#allocation3 + $0xa8] sm:$0xff] %v4100_v27  ;;  %v4264_v14 = vld [vmem:[%s12398_s3 + $0x90] sm:$0xff] }
 0x4a7   :  { %v3795_v47 = vmax.f32 %v3683_v44, 0.0  ;;  %4544 = vmatprep.mubr.f32.mxu1 %v12419_v10  ;;  %v4045_v52 = vld [vmem:[#allocation2 + $0xb1] sm:$0xff]  ;;  %8237 = vmatpush1.bf16.msra.mxu1 %v8236_v45  ;;  %v4263_v44 = vld [vmem:[%s12398_s3 + $0x88] sm:$0xff] }
 0x4a8   :  { %3936 = vst [vmem:[#allocation2 + $0xc8] sm:$0xff] %v11394_v29  ;;  %v3796_v63 = vmax.f32 %v3684_v6, 0.0  ;;  %v3334_v8 = vpop.f32.mrb[54].mxu0  ;;  %v4101_v27 = vmax.f32 %v11367_v4, %v4045_v52  ;;  %v8238_v4 = vpack.c.bf16 %v4265_v13, %v4263_v44  ;;  %v4269_v13 = vld [vmem:[%s12398_s3 + $0xb8] sm:$0xff] }
 0x4a9   :  { %v3685_v49 = vadd.f32 %v11091_v17, %v3334_v8  ;;  %v3336_v0 = vpop.f32.mrb[55].mxu0  ;;  %v4297_v55 = vld [vmem:[#allocation3 + $0x9a] sm:$0xff]  ;;  %v8240_v8 = vpack.c.bf16 %v4264_v14, %v4262_v12  ;;  %v4268_v14 = vld [vmem:[%s12398_s3 + $0xb0] sm:$0xff] }
 0x4aa   :  { %v11413_v39 = vmax.f32 %v3795_v47, %v3796_v63  ;;  %v3686_v6 = vadd.f32 %v11096_v18, %v3336_v0  ;;  %4545 = vmatmul.mubr.f32.gmra.mrb[82].mxu1 %v4297_v55  ;;  %4157 = vst [vmem:[#allocation3 + $0xb0] sm:$0xff] %v4101_v27  ;;  %8239 = vmatprep.subr.bf16.mxu1 %v8238_v4  ;;  %v4266_v4 = vld [vmem:[%s12398_s3 + $0xa0] sm:$0xff] }
 0x4ab   :  { %v3797_v52 = vmax.f32 %v3685_v49, 0.0  ;;  %4550 = vmatprep.mubr.f32.mxu1 %v12419_v10  ;;  %v4046_v45 = vld [vmem:[#allocation2 + $0xb9] sm:$0xff]  ;;  %8241 = vmatpush1.bf16.msra.mxu1 %v8240_v8  ;;  %v4267_v49 = vld [vmem:[%s12398_s3 + $0xa8] sm:$0xff] }
 0x4ac   :  { %3937 = vst [vmem:[#allocation2 + $0xd0] sm:$0xff] %v11413_v39  ;;  %v3798_v47 = vmax.f32 %v3686_v6, 0.0  ;;  %v3340_v63 = vpop.f32.mrb[56].mxu0  ;;  %v4102_v27 = vmax.f32 %v11374_v11, %v4046_v45  ;;  %v8242_v11 = vpack.c.bf16 %v4269_v13, %v4267_v49  ;;  %v4273_v13 = vld [vmem:[%s12398_s3 + $0xd8] sm:$0xff] }
 0x4ad   :  { %v3687_v0 = vadd.f32 %v11091_v17, %v3340_v63  ;;  %v3342_v55 = vpop.f32.mrb[57].mxu0  ;;  %v4298_v44 = vld [vmem:[#allocation3 + $0xa2] sm:$0xff]  ;;  %v8244_v63 = vpack.c.bf16 %v4268_v14, %v4266_v4  ;;  %v4272_v14 = vld [vmem:[%s12398_s3 + $0xd0] sm:$0xff] }
 0x4ae   :  { %v11432_v12 = vmax.f32 %v3797_v52, %v3798_v47  ;;  %v3688_v6 = vadd.f32 %v11096_v18, %v3342_v55  ;;  %4551 = vmatmul.mubr.f32.gmra.mrb[84].mxu1 %v4298_v44  ;;  %4158 = vst [vmem:[#allocation3 + $0xb8] sm:$0xff] %v4102_v27  ;;  %8243 = vmatprep.subr.bf16.mxu1 %v8242_v11  ;;  %v4270_v11 = vld [vmem:[%s12398_s3 + $0xc0] sm:$0xff] }
 0x4af   :  { %v3799_v45 = vmax.f32 %v3687_v0, 0.0  ;;  %4556 = vmatprep.mubr.f32.mxu1 %v12419_v10  ;;  %v4047_v8 = vld [vmem:[#allocation2 + $0xc1] sm:$0xff]  ;;  %8245 = vmatpush1.bf16.msra.mxu1 %v8244_v63 }
 0x4b0   :  { %3938 = vst [vmem:[#allocation2 + $0xd8] sm:$0xff] %v11432_v12  ;;  %v3800_v52 = vmax.f32 %v3688_v6, 0.0  ;;  %v3346_v47 = vpop.f32.mrb[58].mxu0  ;;  %v4103_v27 = vmax.f32 %v11381_v25, %v4047_v8  ;;  %v4271_v0 = vld [vmem:[%s12398_s3 + $0xc8] sm:$0xff] }
 0x4b1   :  { %v3689_v55 = vadd.f32 %v11091_v17, %v3346_v47  ;;  %v3348_v44 = vpop.f32.mrb[59].mxu0  ;;  %v4299_v49 = vld [vmem:[#allocation3 + $0xaa] sm:$0xff]  ;;  %v8246_v25 = vpack.c.bf16 %v4273_v13, %v4271_v0  ;;  %v8248_v47 = vpack.c.bf16 %v4272_v14, %v4270_v11  ;;  %v4277_v13 = vld [vmem:[%s12398_s3 + $0xf8] sm:$0xff] }
 0x4b2   :  { %v11451_v4 = vmax.f32 %v3799_v45, %v3800_v52  ;;  %v3690_v6 = vadd.f32 %v11096_v18, %v3348_v44  ;;  %4557 = vmatmul.mubr.f32.gmra.mrb[86].mxu1 %v4299_v49  ;;  %4159 = vst [vmem:[#allocation3 + $0xc0] sm:$0xff] %v4103_v27  ;;  %v4276_v14 = vld [vmem:[%s12398_s3 + $0xf0] sm:$0xff] }
 0x4b3   :  { %v3801_v8 = vmax.f32 %v3689_v55, 0.0  ;;  %4562 = vmatprep.mubr.f32.mxu1 %v12419_v10  ;;  %v4048_v63 = vld [vmem:[#allocation2 + $0xc9] sm:$0xff]  ;;  %8247 = vmatprep.subr.bf16.mxu1 %v8246_v25  ;;  %v4274_v25 = vld [vmem:[%s12398_s3 + $0xe0] sm:$0xff] }
 0x4b4   :  { %3939 = vst [vmem:[#allocation2 + $0xe0] sm:$0xff] %v11451_v4  ;;  %v3802_v45 = vmax.f32 %v3690_v6, 0.0  ;;  %v3352_v52 = vpop.f32.mrb[60].mxu0  ;;  %v4104_v27 = vmax.f32 %v11394_v29, %v4048_v63  ;;  %8249 = vmatpush1.bf16.msra.mxu1 %v8248_v47  ;;  %v4275_v55 = vld [vmem:[%s12398_s3 + $0xe8] sm:$0xff] }
 0x4b5   :  { %v3691_v44 = vadd.f32 %v11091_v17, %v3352_v52  ;;  %v3354_v49 = vpop.f32.mrb[61].mxu0  ;;  %v4300_v0 = vld [vmem:[#allocation3 + $0xb2] sm:$0xff]  ;;  %v8250_v29 = vpack.c.bf16 %v4277_v13, %v4275_v55  ;;  %v8252_v52 = vpack.c.bf16 %v4276_v14, %v4274_v25 }
 0x4b6   :  { %v11470_v11 = vmax.f32 %v3801_v8, %v3802_v45  ;;  %v3692_v6 = vadd.f32 %v11096_v18, %v3354_v49  ;;  %4563 = vmatmul.mubr.f32.gmra.mrb[88].mxu1 %v4300_v0  ;;  %4160 = vst [vmem:[#allocation3 + $0xc8] sm:$0xff] %v4104_v27 }
 0x4b7   :  { %v3803_v63 = vmax.f32 %v3691_v44, 0.0  ;;  %4568 = vmatprep.mubr.f32.mxu1 %v12419_v10  ;;  %v4049_v47 = vld [vmem:[#allocation2 + $0xd1] sm:$0xff]  ;;  %8251 = vmatprep.subr.bf16.mxu1 %v8250_v29 }
 0x4b8   :  { %3940 = vst [vmem:[#allocation2 + $0xe8] sm:$0xff] %v11470_v11  ;;  %v3804_v8 = vmax.f32 %v3692_v6, 0.0  ;;  %v3358_v45 = vpop.f32.mrb[62].mxu0  ;;  %v4105_v27 = vmax.f32 %v11413_v39, %v4049_v47  ;;  %8253 = vmatpush1.bf16.msra.mxu1 %v8252_v52 }
 0x4b9   :  { %v3693_v49 = vadd.f32 %v11091_v17, %v3358_v45  ;;  %v3360_v0 = vpop.f32.mrb[63].mxu0  ;;  %v4301_v55 = vld [vmem:[#allocation3 + $0xba] sm:$0xff] }
 0x4ba   :  { %v3885_v13 = vmax.f32 %v3803_v63, %v3804_v8  ;;  %v3694_v41 = vadd.f32 %v11096_v18, %v3360_v0  ;;  %4569 = vmatmul.mubr.f32.gmra.mrb[90].mxu1 %v4301_v55  ;;  %4161 = vst [vmem:[#allocation3 + $0xd0] sm:$0xff] %v4105_v27 }
 0x4bb   :  { %v3805_v44 = vmax.f32 %v3693_v49, 0.0  ;;  %4574 = vmatprep.mubr.f32.mxu1 %v12419_v10  ;;  %v4050_v25 = vld [vmem:[#allocation2 + $0xd9] sm:$0xff] }
 0x4bc   :  { %3941 = vst [vmem:[#allocation2 + $0xf0] sm:$0xff] %v3885_v13  ;;  %v3806_v6 = vmax.f32 %v3694_v41, 0.0  ;;  %v3364_v14 = vpop.f32.mrb[64].mxu0  ;;  %v4106_v39 = vmax.f32 %v11432_v12, %v4050_v25 }
 0x4bd   :  { %v3695_v29 = vadd.f32 %v11091_v17, %v3364_v14  ;;  %v3366_v47 = vpop.f32.mrb[65].mxu0  ;;  %v4302_v45 = vld [vmem:[#allocation3 + $0xc2] sm:$0xff] }
 0x4be   :  { %v3886_v16 = vmax.f32 %v3805_v44, %v3806_v6  ;;  %v3696_v63 = vadd.f32 %v11096_v18, %v3366_v47  ;;  %4575 = vmatmul.mubr.f32.gmra.mrb[92].mxu1 %v4302_v45  ;;  %4162 = vst [vmem:[#allocation3 + $0xd8] sm:$0xff] %v4106_v39 }
 0x4bf   :  { %v3807_v52 = vmax.f32 %v3695_v29, 0.0  ;;  %4580 = vmatprep.mubr.f32.mxu1 %v12419_v10  ;;  %v4051_v8 = vld [vmem:[#allocation2 + $0xe1] sm:$0xff] }
 0x4c0   :  { %3942 = vst [vmem:[#allocation2 + $0xf8] sm:$0xff] %v3886_v16  ;;  %v3808_v27 = vmax.f32 %v3696_v63, 0.0  ;;  %v3370_v49 = vpop.f32.mrb[66].mxu0  ;;  %v4107_v41 = vmax.f32 %v11451_v4, %v4051_v8 }
 0x4c1   :  { %v3697_v12 = vadd.f32 %v11091_v17, %v3370_v49  ;;  %v3372_v0 = vpop.f32.mrb[67].mxu0  ;;  %v4303_v55 = vld [vmem:[#allocation3 + $0xca] sm:$0xff] }
 0x4c2   :  { %v11491_v25 = vmax.f32 %v3807_v52, %v3808_v27  ;;  %v3698_v44 = vadd.f32 %v11096_v18, %v3372_v0  ;;  %4581 = vmatmul.mubr.f32.gmra.mrb[94].mxu1 %v4303_v55  ;;  %4163 = vst [vmem:[#allocation3 + $0xe0] sm:$0xff] %v4107_v41 }
 0x4c3   :  { %v3809_v6 = vmax.f32 %v3697_v12, 0.0  ;;  %4586 = vmatprep.mubr.f32.mxu1 %v12419_v10  ;;  %v4052_v14 = vld [vmem:[#allocation2 + $0xe9] sm:$0xff] }
 0x4c4   :  { %3943 = vst [vmem:[#allocation2 + $0x100] sm:$0xff] %v11491_v25  ;;  %v3810_v39 = vmax.f32 %v3698_v44, 0.0  ;;  %v3376_v29 = vpop.f32.mrb[68].mxu0  ;;  %v4108_v4 = vmax.f32 %v11470_v11, %v4052_v14 }
 0x4c5   :  { %v8579_v47 = vadd.f32 %v3376_v29, %v11115_v34  ;;  %v3378_v45 = vpop.f32.mrb[69].mxu0  ;;  %v4304_v63 = vld [vmem:[#allocation3 + $0xd2] sm:$0xff] }
 0x4c6   :  { %v11498_v52 = vmax.f32 %v3809_v6, %v3810_v39  ;;  %v8580_v8 = vadd.f32 %v3378_v45, %v11117_v37  ;;  %4587 = vmatmul.mubr.f32.gmra.mrb[96].mxu1 %v4304_v63  ;;  %4164 = vst [vmem:[#allocation3 + $0xe8] sm:$0xff] %v4108_v4 }
 0x4c7   :  { %v3699_v27 = vadd.f32 %v8579_v47, %v11091_v17  ;;  %4592 = vmatprep.mubr.f32.mxu1 %v12419_v10  ;;  %v4053_v49 = vld [vmem:[#allocation2 + $0xf1] sm:$0xff] }
 0x4c8   :  { %3944 = vst [vmem:[#allocation2 + $0x108] sm:$0xff] %v11498_v52  ;;  %v3700_v41 = vadd.f32 %v8580_v8, %v11096_v18  ;;  %v3382_v11 = vpop.f32.mrb[70].mxu0  ;;  %v4109_v12 = vmax.f32 %v3885_v13, %v4053_v49 }
 0x4c9   :  { %v3811_v34 = vmax.f32 %v3699_v27, 0.0  ;;  %v8581_v0 = vadd.f32 %v3382_v11, %v11122_v43  ;;  %v3384_v55 = vpop.f32.mrb[71].mxu0  ;;  %v4305_v44 = vld [vmem:[#allocation3 + $0xda] sm:$0xff] }
 0x4ca   :  { %v3812_v6 = vmax.f32 %v3700_v41, 0.0  ;;  %v8582_v37 = vadd.f32 %v3384_v55, %v11124_v46  ;;  %4593 = vmatmul.mubr.f32.gmra.mrb[98].mxu1 %v4305_v44  ;;  %4165 = vst [vmem:[#allocation3 + $0xf0] sm:$0xff] %v4109_v12 }
 0x4cb   :  { %v3701_v14 = vadd.f32 %v8581_v0, %v11091_v17  ;;  %4598 = vmatprep.mubr.f32.mxu1 %v12419_v10  ;;  %v4054_v39 = vld [vmem:[#allocation2 + $0xf9] sm:$0xff] }
 0x4cc   :  { %v3889_v29 = vmax.f32 %v3811_v34, %v3812_v6  ;;  %v3702_v4 = vadd.f32 %v8582_v37, %v11096_v18  ;;  %v3388_v47 = vpop.f32.mrb[72].mxu0  ;;  %v4110_v13 = vmax.f32 %v3886_v16, %v4054_v39 }
 0x4cd   :  { %v3813_v45 = vmax.f32 %v3701_v14, 0.0  ;;  %v8583_v43 = vadd.f32 %v3388_v47, %v11128_v51  ;;  %v3390_v63 = vpop.f32.mrb[73].mxu0  ;;  %v4306_v8 = vld [vmem:[#allocation3 + $0xe2] sm:$0xff] }
 0x4ce   :  { %3945 = vst [vmem:[#allocation2 + $0x110] sm:$0xff] %v3889_v29  ;;  %v3814_v27 = vmax.f32 %v3702_v4, 0.0  ;;  %v8584_v46 = vadd.f32 %v3390_v63, %v11130_v54  ;;  %4599 = vmatmul.mubr.f32.gmra.mrb[100].mxu1 %v4306_v8  ;;  %4166 = vst [vmem:[#allocation3 + $0xf8] sm:$0xff] %v4110_v13 }
 0x4cf   :  { %v3703_v49 = vadd.f32 %v8583_v43, %v11091_v17  ;;  %4604 = vmatprep.mubr.f32.mxu1 %v12419_v10  ;;  %v4055_v41 = vld [vmem:[#allocation2 + $0x101] sm:$0xff] }
 0x4d0   :  { %v3890_v11 = vmax.f32 %v3813_v45, %v3814_v27  ;;  %v3704_v12 = vadd.f32 %v8584_v46, %v11096_v18  ;;  %v3394_v16 = vpop.f32.mrb[74].mxu0  ;;  %v4111_v34 = vmax.f32 %v11491_v25, %v4055_v41 }
 0x4d1   :  { %v3815_v51 = vmax.f32 %v3703_v49, 0.0  ;;  %v8585_v0 = vadd.f32 %v3394_v16, %v11134_v61  ;;  %v3396_v55 = vpop.f32.mrb[75].mxu0  ;;  %v4307_v44 = vld [vmem:[#allocation3 + $0xea] sm:$0xff] }
 0x4d2   :  { %3946 = vst [vmem:[#allocation2 + $0x118] sm:$0xff] %v3890_v11  ;;  %v3816_v54 = vmax.f32 %v3704_v12, 0.0  ;;  %v8586_v6 = vadd.f32 %v3396_v55, %v11136_v2  ;;  %4605 = vmatmul.mubr.f32.gmra.mrb[102].mxu1 %v4307_v44  ;;  %4167 = vst [vmem:[#allocation3 + $0x100] sm:$0xff] %v4111_v34 }
 0x4d3   :  { %v3705_v37 = vadd.f32 %v8585_v0, %v11091_v17  ;;  %4610 = vmatprep.mubr.f32.mxu1 %v12419_v10 }
 0x4d4   :  { %v3891_v14 = vmax.f32 %v3815_v51, %v3816_v54  ;;  %v3706_v39 = vadd.f32 %v8586_v6, %v11096_v18  ;;  %v3400_v4 = vpop.f32.mrb[76].mxu0 }
 0x4d5   :  { %v3817_v25 = vmax.f32 %v3705_v37, 0.0  ;;  %v8587_v47 = vadd.f32 %v3400_v4, %v11142_v9  ;;  %v3402_v61 = vpop.f32.mrb[77].mxu0  ;;  %v4308_v13 = vld [vmem:[#allocation3 + $0xf2] sm:$0xff]  ;;  %v4056_v45 = vld [vmem:[#allocation2 + $0x109] sm:$0xff] }
 0x4d6   :  { %3947 = vst [vmem:[#allocation2 + $0x120] sm:$0xff] %v3891_v14  ;;  %v3818_v43 = vmax.f32 %v3706_v39, 0.0  ;;  %v8588_v2 = vadd.f32 %v3402_v61, %v11145_v19  ;;  %4611 = vmatmul.mubr.f32.gmra.mrb[104].mxu1 %v4308_v13  ;;  %v11524_v63 = vmax.f32 %v11498_v52, %v4056_v45 }
 0x4d7   :  { %v3707_v8 = vadd.f32 %v8587_v47, %v11091_v17  ;;  %4616 = vmatprep.mubr.f32.mxu1 %v12419_v10 }
 0x4d8   :  { %v3892_v27 = vmax.f32 %v3817_v25, %v3818_v43  ;;  %v3708_v46 = vadd.f32 %v8588_v2, %v11096_v18  ;;  %v3406_v49 = vpop.f32.mrb[78].mxu0  ;;  %4168 = vst [vmem:[#allocation3 + $0x108] sm:$0xff] %v11524_v63 }
 0x4d9   :  { %v3819_v9 = vmax.f32 %v3707_v8, 0.0  ;;  %v8589_v41 = vadd.f32 %v3406_v49, %v11151_v26  ;;  %v3408_v12 = vpop.f32.mrb[79].mxu0  ;;  %v4309_v16 = vld [vmem:[#allocation3 + $0xfa] sm:$0xff]  ;;  %v4057_v19 = vld [vmem:[#allocation2 + $0x111] sm:$0xff] }
 0x4da   :  { %3948 = vst [vmem:[#allocation2 + $0x128] sm:$0xff] %v3892_v27  ;;  %v3820_v34 = vmax.f32 %v3708_v46, 0.0  ;;  %v8590_v52 = vadd.f32 %v3408_v12, %v11154_v30  ;;  %4617 = vmatmul.mubr.f32.gmra.mrb[106].mxu1 %v4309_v16  ;;  %v11532_v51 = vmax.f32 %v3889_v29, %v4057_v19 }
 0x4db   :  { %v3709_v0 = vadd.f32 %v8589_v41, %v11091_v17  ;;  %4622 = vmatprep.mubr.f32.mxu1 %v12419_v10 }
 0x4dc   :  { %v3893_v55 = vmax.f32 %v3819_v9, %v3820_v34  ;;  %v3710_v44 = vadd.f32 %v8590_v52, %v11096_v18  ;;  %v3412_v54 = vpop.f32.mrb[80].mxu0  ;;  %4169 = vst [vmem:[#allocation3 + $0x110] sm:$0xff] %v11532_v51 }
 0x4dd   :  { %v3821_v26 = vmax.f32 %v3709_v0, 0.0  ;;  %v8591_v6 = vadd.f32 %v3412_v54, %v11166_v42  ;;  %v3414_v37 = vpop.f32.mrb[81].mxu0  ;;  %v4058_v39 = vld [vmem:[#allocation2 + $0x119] sm:$0xff] }
 0x4de   :  { %3949 = vst [vmem:[#allocation2 + $0x130] sm:$0xff] %v3893_v55  ;;  %v3822_v30 = vmax.f32 %v3710_v44, 0.0  ;;  %v8592_v29 = vadd.f32 %v3414_v37, %v11169_v48  ;;  %v11540_v4 = vmax.f32 %v3890_v11, %v4058_v39 }
 0x4df   :  { %v3711_v25 = vadd.f32 %v8591_v6, %v11091_v17  ;;  %v4310_v47 = vld [vmem:[#allocation3 + $0x102] sm:$0xff] }
 0x4e0   :  { %v3894_v61 = vmax.f32 %v3821_v26, %v3822_v30  ;;  %v3712_v13 = vadd.f32 %v8592_v29, %v11096_v18  ;;  %v3418_v45 = vpop.f32.mrb[82].mxu0  ;;  %4623 = vmatmul.mubr.f32.gmra.mrb[108].mxu1 %v4310_v47  ;;  %4170 = vst [vmem:[#allocation3 + $0x118] sm:$0xff] %v11540_v4 }
 0x4e1   :  { %v3823_v43 = vmax.f32 %v3711_v25, 0.0  ;;  %v8593_v42 = vadd.f32 %v3418_v45, %v11182_v60  ;;  %v3420_v2 = vpop.f32.mrb[83].mxu0  ;;  %4628 = vmatprep.mubr.f32.mxu1 %v12419_v10  ;;  %v4059_v8 = vld [vmem:[#allocation2 + $0x121] sm:$0xff] }
 0x4e2   :  { %3950 = vst [vmem:[#allocation2 + $0x138] sm:$0xff] %v3894_v61  ;;  %v3824_v48 = vmax.f32 %v3712_v13, 0.0  ;;  %v8594_v11 = vadd.f32 %v3420_v2, %v11186_v3  ;;  %v11548_v46 = vmax.f32 %v3891_v14, %v4059_v8 }
 0x4e3   :  { %v3713_v49 = vadd.f32 %v8593_v42, %v11091_v17  ;;  %v4311_v9 = vld [vmem:[#allocation3 + $0x10a] sm:$0xff] }
 0x4e4   :  { %v3895_v41 = vmax.f32 %v3823_v43, %v3824_v48  ;;  %v3714_v12 = vadd.f32 %v8594_v11, %v11096_v18  ;;  %v3424_v16 = vpop.f32.mrb[84].mxu0  ;;  %4629 = vmatmul.mubr.f32.gmra.mrb[110].mxu1 %v4311_v9  ;;  %4171 = vst [vmem:[#allocation3 + $0x120] sm:$0xff] %v11548_v46 }
 0x4e5   :  { %v3825_v60 = vmax.f32 %v3713_v49, 0.0  ;;  %v8595_v19 = vadd.f32 %v3424_v16, %v11193_v20  ;;  %v3426_v34 = vpop.f32.mrb[85].mxu0  ;;  %4634 = vmatprep.mubr.f32.mxu1 %v12419_v10  ;;  %v4060_v52 = vld [vmem:[#allocation2 + $0x129] sm:$0xff] }
 0x4e6   :  { %3951 = vst [vmem:[#allocation2 + $0x140] sm:$0xff] %v3895_v41  ;;  %v3826_v3 = vmax.f32 %v3714_v12, 0.0  ;;  %v8596_v14 = vadd.f32 %v3426_v34, %v11197_v24  ;;  %v11556_v0 = vmax.f32 %v3892_v27, %v4060_v52 }
 0x4e7   :  { %v3715_v44 = vadd.f32 %v8595_v19, %v11091_v17  ;;  %v4312_v54 = vld [vmem:[#allocation3 + $0x112] sm:$0xff] }
 0x4e8   :  { %v3896_v26 = vmax.f32 %v3825_v60, %v3826_v3  ;;  %v3716_v6 = vadd.f32 %v8596_v14, %v11096_v18  ;;  %v3430_v37 = vpop.f32.mrb[86].mxu0  ;;  %4635 = vmatmul.mubr.f32.gmra.mrb[112].mxu1 %v4312_v54  ;;  %4172 = vst [vmem:[#allocation3 + $0x128] sm:$0xff] %v11556_v0 }
 0x4e9   :  { %v3827_v20 = vmax.f32 %v3715_v44, 0.0  ;;  %v8597_v39 = vadd.f32 %v3430_v37, %v11204_v36  ;;  %v3432_v30 = vpop.f32.mrb[87].mxu0  ;;  %4640 = vmatprep.mubr.f32.mxu1 %v12419_v10  ;;  %v4061_v29 = vld [vmem:[#allocation2 + $0x131] sm:$0xff] }
 0x4ea   :  { %3952 = vst [vmem:[#allocation2 + $0x148] sm:$0xff] %v3896_v26  ;;  %v3828_v24 = vmax.f32 %v3716_v6, 0.0  ;;  %v8598_v27 = vadd.f32 %v3432_v30, %v11208_v40  ;;  %v11564_v25 = vmax.f32 %v3893_v55, %v4061_v29 }
 0x4eb   :  { %v3717_v47 = vadd.f32 %v8597_v39, %v11091_v17  ;;  %v4313_v13 = vld [vmem:[#allocation3 + $0x11a] sm:$0xff] }
 0x4ec   :  { %v3897_v45 = vmax.f32 %v3827_v20, %v3828_v24  ;;  %v3718_v43 = vadd.f32 %v8598_v27, %v11096_v18  ;;  %v3436_v42 = vpop.f32.mrb[88].mxu0  ;;  %4641 = vmatmul.mubr.f32.gmra.mrb[114].mxu1 %v4313_v13  ;;  %4173 = vst [vmem:[#allocation3 + $0x130] sm:$0xff] %v11564_v25 }
 0x4ed   :  { %v3829_v36 = vmax.f32 %v3717_v47, 0.0  ;;  %v8599_v2 = vadd.f32 %v3436_v42, %v11215_v53  ;;  %v3438_v8 = vpop.f32.mrb[89].mxu0  ;;  %4646 = vmatprep.mubr.f32.mxu1 %v12419_v10  ;;  %v4062_v48 = vld [vmem:[#allocation2 + $0x139] sm:$0xff] }
 0x4ee   :  { %3953 = vst [vmem:[#allocation2 + $0x150] sm:$0xff] %v3897_v45  ;;  %v3830_v40 = vmax.f32 %v3718_v43, 0.0  ;;  %v8600_v55 = vadd.f32 %v3438_v8, %v11219_v57  ;;  %v11572_v11 = vmax.f32 %v3894_v61, %v4062_v48 }
 0x4ef   :  { %v3719_v49 = vadd.f32 %v8599_v2, %v11091_v17  ;;  %v4314_v9 = vld [vmem:[#allocation3 + $0x122] sm:$0xff] }
 0x4f0   :  { %v3898_v12 = vmax.f32 %v3829_v36, %v3830_v40  ;;  %v3720_v16 = vadd.f32 %v8600_v55, %v11096_v18  ;;  %v3442_v60 = vpop.f32.mrb[90].mxu0  ;;  %4647 = vmatmul.mubr.f32.gmra.mrb[116].mxu1 %v4314_v9  ;;  %4174 = vst [vmem:[#allocation3 + $0x138] sm:$0xff] %v11572_v11 }
 0x4f1   :  { %v3831_v53 = vmax.f32 %v3719_v49, 0.0  ;;  %v8601_v19 = vadd.f32 %v3442_v60, %v11226_v7  ;;  %v3444_v34 = vpop.f32.mrb[91].mxu0  ;;  %4652 = vmatprep.mubr.f32.mxu1 %v12419_v10  ;;  %v4063_v52 = vld [vmem:[#allocation2 + $0x141] sm:$0xff] }
 0x4f2   :  { %3954 = vst [vmem:[#allocation2 + $0x158] sm:$0xff] %v3898_v12  ;;  %v3832_v57 = vmax.f32 %v3720_v16, 0.0  ;;  %v8602_v61 = vadd.f32 %v3444_v34, %v11230_v15  ;;  %v11580_v3 = vmax.f32 %v3895_v41, %v4063_v52 }
 0x4f3   :  { %v3721_v14 = vadd.f32 %v8601_v19, %v11091_v17  ;;  %v4315_v44 = vld [vmem:[#allocation3 + $0x12a] sm:$0xff] }
 0x4f4   :  { %v3899_v54 = vmax.f32 %v3831_v53, %v3832_v57  ;;  %v3722_v6 = vadd.f32 %v8602_v61, %v11096_v18  ;;  %v3448_v37 = vpop.f32.mrb[92].mxu0  ;;  %4653 = vmatmul.mubr.f32.gmra.mrb[118].mxu1 %v4315_v44  ;;  %4175 = vst [vmem:[#allocation3 + $0x140] sm:$0xff] %v11580_v3 }
 0x4f5   :  { %v3833_v7 = vmax.f32 %v3721_v14, 0.0  ;;  %v8603_v20 = vadd.f32 %v3448_v37, %v11237_v32  ;;  %v3450_v39 = vpop.f32.mrb[93].mxu0  ;;  %4658 = vmatprep.mubr.f32.mxu1 %v12419_v10  ;;  %v4064_v30 = vld [vmem:[#allocation2 + $0x149] sm:$0xff] }
 0x4f6   :  { %3955 = vst [vmem:[#allocation2 + $0x160] sm:$0xff] %v3899_v54  ;;  %v3834_v15 = vmax.f32 %v3722_v6, 0.0  ;;  %v8604_v41 = vadd.f32 %v3450_v39, %v11241_v38  ;;  %v11588_v29 = vmax.f32 %v3896_v26, %v4064_v30 }
 0x4f7   :  { %v3723_v24 = vadd.f32 %v8603_v20, %v11091_v17  ;;  %v4316_v27 = vld [vmem:[#allocation3 + $0x132] sm:$0xff] }
 0x4f8   :  { %v3900_v47 = vmax.f32 %v3833_v7, %v3834_v15  ;;  %v3724_v13 = vadd.f32 %v8604_v41, %v11096_v18  ;;  %v3454_v43 = vpop.f32.mrb[94].mxu0  ;;  %4659 = vmatmul.mubr.f32.gmra.mrb[120].mxu1 %v4316_v27  ;;  %4176 = vst [vmem:[#allocation3 + $0x148] sm:$0xff] %v11588_v29 }
 0x4f9   :  { %v3835_v32 = vmax.f32 %v3723_v24, 0.0  ;;  %v8605_v42 = vadd.f32 %v3454_v43, %v11254_v56  ;;  %v3456_v36 = vpop.f32.mrb[95].mxu0  ;;  %4664 = vmatprep.mubr.f32.mxu1 %v12419_v10  ;;  %v4065_v2 = vld [vmem:[#allocation2 + $0x151] sm:$0xff] }
 0x4fa   :  { %3956 = vst [vmem:[#allocation2 + $0x168] sm:$0xff] %v3900_v47  ;;  %v3836_v38 = vmax.f32 %v3724_v13, 0.0  ;;  %v8606_v26 = vadd.f32 %v3456_v36, %v11258_v1  ;;  %v11596_v8 = vmax.f32 %v3897_v45, %v4065_v2 }
 0x4fb   :  { %v3725_v48 = vadd.f32 %v8605_v42, %v11091_v17  ;;  %v4317_v40 = vld [vmem:[#allocation3 + $0x13a] sm:$0xff] }
 0x4fc   :  { %v3901_v55 = vmax.f32 %v3835_v32, %v3836_v38  ;;  %v3726_v49 = vadd.f32 %v8606_v26, %v11096_v18  ;;  %v3460_v9 = vpop.f32.mrb[96].mxu0  ;;  %4665 = vmatmul.mubr.f32.gmra.mrb[122].mxu1 %v4317_v40  ;;  %4177 = vst [vmem:[#allocation3 + $0x150] sm:$0xff] %v11596_v8 }
 0x4fd   :  { %v3837_v56 = vmax.f32 %v3725_v48, 0.0  ;;  %v8607_v16 = vadd.f32 %v3460_v9, %v11271_v28  ;;  %v3462_v60 = vpop.f32.mrb[97].mxu0  ;;  %4670 = vmatprep.mubr.f32.mxu1 %v12419_v10  ;;  %v4066_v53 = vld [vmem:[#allocation2 + $0x159] sm:$0xff] }
 0x4fe   :  { %3957 = vst [vmem:[#allocation2 + $0x170] sm:$0xff] %v3901_v55  ;;  %v3838_v1 = vmax.f32 %v3726_v49, 0.0  ;;  %v8608_v45 = vadd.f32 %v3462_v60, %v11275_v22  ;;  %v11604_v19 = vmax.f32 %v3898_v12, %v4066_v53 }
 0x4ff   :  { %v3727_v34 = vadd.f32 %v8607_v16, %v11091_v17  ;;  %v4318_v52 = vld [vmem:[#allocation3 + $0x142] sm:$0xff] }
 0x500   :  { %v3902_v57 = vmax.f32 %v3837_v56, %v3838_v1  ;;  %v3728_v61 = vadd.f32 %v8608_v45, %v11096_v18  ;;  %v3466_v14 = vpop.f32.mrb[98].mxu0  ;;  %4671 = vmatmul.mubr.f32.gmra.mrb[124].mxu1 %v4318_v52  ;;  %4178 = vst [vmem:[#allocation3 + $0x158] sm:$0xff] %v11604_v19 }
 0x501   :  { %v3839_v28 = vmax.f32 %v3727_v34, 0.0  ;;  %v8609_v44 = vadd.f32 %v3466_v14, %v11282_v33  ;;  %v3468_v6 = vpop.f32.mrb[99].mxu0  ;;  %4676 = vmatprep.mubr.f32.mxu1 %v12419_v10  ;;  %v4067_v37 = vld [vmem:[#allocation2 + $0x161] sm:$0xff] }
 0x502   :  { %3958 = vst [vmem:[#allocation2 + $0x178] sm:$0xff] %v3902_v57  ;;  %v3840_v22 = vmax.f32 %v3728_v61, 0.0  ;;  %v8610_v12 = vadd.f32 %v3468_v6, %v11286_v59  ;;  %v11612_v7 = vmax.f32 %v3899_v54, %v4067_v37 }
 0x503   :  { %v3729_v20 = vadd.f32 %v8609_v44, %v11091_v17  ;;  %v4319_v39 = vld [vmem:[#allocation3 + $0x14a] sm:$0xff] }
 0x504   :  { %v3903_v30 = vmax.f32 %v3839_v28, %v3840_v22  ;;  %v3730_v15 = vadd.f32 %v8610_v12, %v11096_v18  ;;  %v3472_v41 = vpop.f32.mrb[100].mxu0  ;;  %4677 = vmatmul.mubr.f32.gmra.mrb[126].mxu1 %v4319_v39  ;;  %4179 = vst [vmem:[#allocation3 + $0x160] sm:$0xff] %v11612_v7 }
 0x505   :  { %v3841_v33 = vmax.f32 %v3729_v20, 0.0  ;;  %v8611_v24 = vadd.f32 %v3472_v41, %v11293_v21  ;;  %v3474_v27 = vpop.f32.mrb[101].mxu0  ;;  %4682 = vmatprep.mubr.f32.mxu1 %v12419_v10  ;;  %v4068_v13 = vld [vmem:[#allocation2 + $0x169] sm:$0xff] }
 0x506   :  { %3959 = vst [vmem:[#allocation2 + $0x180] sm:$0xff] %v3903_v30  ;;  %v3842_v59 = vmax.f32 %v3730_v15, 0.0  ;;  %v8612_v54 = vadd.f32 %v3474_v27, %v11297_v31  ;;  %v11620_v43 = vmax.f32 %v3900_v47, %v4068_v13  ;;  %v12422_v27 = vld [vmem:[#allocation13_spill] sm:$0xff] }
 0x507   :  { %v3731_v32 = vadd.f32 %v8611_v24, %v11091_v17  ;;  %v4320_v42 = vld [vmem:[#allocation3 + $0x152] sm:$0xff] }
 0x508   :  { %v3904_v36 = vmax.f32 %v3841_v33, %v3842_v59  ;;  %v3732_v2 = vadd.f32 %v8612_v54, %v11096_v18  ;;  %v3478_v38 = vpop.f32.mrb[102].mxu0  ;;  %4683 = vmatmul.mubr.f32.gmra.mrb[128].mxu1 %v4320_v42  ;;  %4180 = vst [vmem:[#allocation3 + $0x168] sm:$0xff] %v11620_v43 }
 0x509   :  { %v3843_v21 = vmax.f32 %v3731_v32, 0.0  ;;  %v8613_v26 = vadd.f32 %v3478_v38, %v11304_v50  ;;  %v3480_v48 = vpop.f32.mrb[103].mxu0  ;;  %4688 = vmatprep.mubr.f32.mxu1 %v12419_v10  ;;  %v4069_v40 = vld [vmem:[#allocation2 + $0x171] sm:$0xff] }
 0x50a   :  { %3960 = vst [vmem:[#allocation2 + $0x188] sm:$0xff] %v3904_v36  ;;  %v3844_v31 = vmax.f32 %v3732_v2, 0.0  ;;  %v8614_v47 = vadd.f32 %v3480_v48, %v11308_v58  ;;  %v11628_v49 = vmax.f32 %v3901_v55, %v4069_v40 }
 0x50b   :  { %v3733_v9 = vadd.f32 %v8613_v26, %v11091_v17  ;;  %v4321_v56 = vld [vmem:[#allocation3 + $0x15a] sm:$0xff] }
 0x50c   :  { %v3905_v16 = vmax.f32 %v3843_v21, %v3844_v31  ;;  %v3734_v60 = vadd.f32 %v8614_v47, %v11096_v18  ;;  %v3484_v53 = vpop.f32.mrb[104].mxu0  ;;  %4689 = vmatmul.mubr.f32.gmra.mrb[130].mxu1 %v4321_v56  ;;  %4181 = vst [vmem:[#allocation3 + $0x170] sm:$0xff] %v11628_v49  ;;  %v12424_v31 = vld [vmem:[#allocation15_spill] sm:$0xff] }
 0x50d   :  { %v3845_v50 = vmax.f32 %v3733_v9, 0.0  ;;  %v8615_v1 = vadd.f32 %v3484_v53, %v11315_v23  ;;  %v3486_v45 = vpop.f32.mrb[105].mxu0  ;;  %4694 = vmatprep.mubr.f32.mxu1 %v12419_v10  ;;  %v4070_v34 = vld [vmem:[#allocation2 + $0x179] sm:$0xff] }
 0x50e   :  { %3961 = vst [vmem:[#allocation2 + $0x190] sm:$0xff] %v3905_v16  ;;  %v3846_v58 = vmax.f32 %v3734_v60, 0.0  ;;  %v8616_v55 = vadd.f32 %v3486_v45, %v11319_v35  ;;  %v11636_v52 = vmax.f32 %v3902_v57, %v4070_v34  ;;  %v12425_v60 = vld [vmem:[#allocation16_spill] sm:$0xff] }
 0x50f   :  { %v3735_v61 = vadd.f32 %v8615_v1, %v11091_v17  ;;  %v4322_v14 = vld [vmem:[#allocation3 + $0x162] sm:$0xff] }
 0x510   :  { %v3906_v28 = vmax.f32 %v3845_v50, %v3846_v58  ;;  %v3736_v44 = vadd.f32 %v8616_v55, %v11096_v18  ;;  %v3490_v6 = vpop.f32.mrb[106].mxu0  ;;  %4695 = vmatmul.mubr.f32.gmra.mrb[132].mxu1 %v4322_v14  ;;  %4182 = vst [vmem:[#allocation3 + $0x178] sm:$0xff] %v11636_v52 }
 0x511   :  { %v3847_v23 = vmax.f32 %v3735_v61, 0.0  ;;  %v8617_v37 = vadd.f32 %v3490_v6, %v11326_v62  ;;  %v3492_v22 = vpop.f32.mrb[107].mxu0  ;;  %4700 = vmatprep.mubr.f32.mxu1 %v12419_v10  ;;  %v4071_v12 = vld [vmem:[#allocation2 + $0x181] sm:$0xff] }
 0x512   :  { %3962 = vst [vmem:[#allocation2 + $0x198] sm:$0xff] %v3906_v28  ;;  %v3848_v35 = vmax.f32 %v3736_v44, 0.0  ;;  %v8618_v57 = vadd.f32 %v3492_v22, %v11330_v5  ;;  %v11644_v20 = vmax.f32 %v3903_v30, %v4071_v12  ;;  %v12423_v30 = vld [vmem:[#allocation14_spill] sm:$0xff] }
 0x513   :  { %v3737_v39 = vadd.f32 %v8617_v37, %v11091_v17  ;;  %v4323_v15 = vld [vmem:[#allocation3 + $0x16a] sm:$0xff] }
 0x514   :  { %v3907_v41 = vmax.f32 %v3847_v23, %v3848_v35  ;;  %v3738_v33 = vadd.f32 %v8618_v57, %v11096_v18  ;;  %v3496_v24 = vpop.f32.mrb[108].mxu0  ;;  %4701 = vmatmul.mubr.f32.gmra.mrb[134].mxu1 %v4323_v15  ;;  %4183 = vst [vmem:[#allocation3 + $0x180] sm:$0xff] %v11644_v20 }
 0x515   :  { %v3849_v62 = vmax.f32 %v3737_v39, 0.0  ;;  %v8619_v13 = vadd.f32 %v3496_v24, %v12422_v27  ;;  %v3498_v59 = vpop.f32.mrb[109].mxu0  ;;  %4706 = vmatprep.mubr.f32.mxu1 %v12419_v10  ;;  %v4072_v54 = vld [vmem:[#allocation2 + $0x189] sm:$0xff] }
 0x516   :  { %3963 = vst [vmem:[#allocation2 + $0x1a0] sm:$0xff] %v3907_v41  ;;  %v3850_v5 = vmax.f32 %v3738_v33, 0.0  ;;  %v8620_v32 = vadd.f32 %v3498_v59, %v12423_v30  ;;  %v11652_v42 = vmax.f32 %v3904_v36, %v4072_v54  ;;  %v7598_v24 = vld [vmem:[%s12398_s3 + $0x208] sm:$0xff]  ;;  %v7597_v59 = vld [vmem:[%s12398_s3 + $0x200] sm:$0xff]  ;;  %v7599_v54 = vld [vmem:[%s12398_s3 + $0x210] sm:$0xff] }
 0x517   :  { %v3739_v2 = vadd.f32 %v8619_v13, %v11091_v17  ;;  %v4324_v38 = vld [vmem:[#allocation3 + $0x172] sm:$0xff]  ;;  %v8256_v30 = vpack.c.bf16 %v7599_v54, %v7597_v59 }
 0x518   :  { %v3908_v21 = vmax.f32 %v3849_v62, %v3850_v5  ;;  %v3740_v26 = vadd.f32 %v8620_v32, %v11096_v18  ;;  %v3502_v48 = vpop.f32.mrb[110].mxu0  ;;  %4707 = vmatmul.mubr.f32.gmra.mrb[136].mxu1 %v4324_v38  ;;  %4184 = vst [vmem:[#allocation3 + $0x188] sm:$0xff] %v11652_v42  ;;  %v7600_v62 = vld [vmem:[%s12398_s3 + $0x218] sm:$0xff]  ;;  %v4191_v32 = vld [vmem:[#allocation3] sm:$0xff]  ;;  %v4193_v38 = vld [vmem:[#allocation3 + $0x10] sm:$0xff] }
 0x519   :  { %v3851_v40 = vmax.f32 %v3739_v2, 0.0  ;;  %v8621_v47 = vadd.f32 %v3502_v48, %v12424_v31  ;;  %v3504_v9 = vpop.f32.mrb[111].mxu0  ;;  %4712 = vmatprep.mubr.f32.mxu1 %v12419_v10  ;;  %v4073_v56 = vld [vmem:[#allocation2 + $0x191] sm:$0xff]  ;;  %v8254_v27 = vpack.c.bf16 %v7600_v62, %v7598_v24  ;;  %v4192_v2 = vld [vmem:[#allocation3 + $0x8] sm:$0xff]  ;;  %v7601_v31 = vld [vmem:[%s12398_s3 + $0x220] sm:$0xff] }
 0x51a   :  { %3964 = vst [vmem:[#allocation2 + $0x1a8] sm:$0xff] %v3908_v21  ;;  %v3852_v36 = vmax.f32 %v3740_v26, 0.0  ;;  %v8622_v53 = vadd.f32 %v3504_v9, %v12425_v60  ;;  %v11660_v50 = vmax.f32 %v3905_v16, %v4073_v56  ;;  %v4195_v26 = vld [vmem:[#allocation3 + $0x20] sm:$0xff]  ;;  %v7602_v48 = vld [vmem:[%s12398_s3 + $0x228] sm:$0xff]  ;;  %v7603_v9 = vld [vmem:[%s12398_s3 + $0x230] sm:$0xff] }
 0x51b   :  { %v3741_v1 = vadd.f32 %v8621_v47, %v11091_v17  ;;  %v4325_v45 = vld [vmem:[#allocation3 + $0x17a] sm:$0xff]  ;;  %8255 = vmatprep.subr.bf16.mxu1 %v8254_v27  ;;  %v8260_v56 = vpack.c.bf16 %v7603_v9, %v7601_v31  ;;  %v4197_v60 = vld [vmem:[#allocation3 + $0x30] sm:$0xff]  ;;  %v7622_v9 = vld [vmem:[%s12398_s3 + $0x2c8] sm:$0xff] }
 0x51c   :  { %v3909_v34 = vmax.f32 %v3851_v40, %v3852_v36  ;;  %v3742_v58 = vadd.f32 %v8622_v53, %v11096_v18  ;;  %4713 = vmatmul.mubr.f32.gmra.mrb[138].mxu1 %v4325_v45  ;;  %4185 = vst [vmem:[#allocation3 + $0x190] sm:$0xff] %v11660_v50  ;;  %v7604_v40 = vld [vmem:[%s12398_s3 + $0x238] sm:$0xff]  ;;  %v4196_v36 = vld [vmem:[#allocation3 + $0x28] sm:$0xff]  ;;  %v7609_v24 = vld [vmem:[%s12398_s3 + $0x260] sm:$0xff] }
 0x51d   :  { %v3853_v55 = vmax.f32 %v3741_v1, 0.0  ;;  %4718 = vmatprep.mubr.f32.mxu1 %v12419_v10  ;;  %v4074_v61 = vld [vmem:[#allocation2 + $0x199] sm:$0xff]  ;;  %v8258_v47 = vpack.c.bf16 %v7604_v40, %v7602_v48  ;;  %v4200_v45 = vld [vmem:[#allocation3 + $0x48] sm:$0xff]  ;;  %v7611_v62 = vld [vmem:[%s12398_s3 + $0x270] sm:$0xff] }
 0x51e   :  { %3965 = vst [vmem:[#allocation2 + $0x1b0] sm:$0xff] %v3909_v34  ;;  %v3854_v14 = vmax.f32 %v3742_v58, 0.0  ;;  %v11666_v44 = vmax.f32 %v3906_v28, %v4074_v61  ;;  %v4198_v53 = vld [vmem:[#allocation3 + $0x38] sm:$0xff]  ;;  %v4199_v1 = vld [vmem:[#allocation3 + $0x40] sm:$0xff]  ;;  %v7606_v58 = vld [vmem:[%s12398_s3 + $0x248] sm:$0xff]  ;;  %v8268_v27 = vpack.c.bf16 %v7611_v62, %v7609_v24 }
 0x51f   :  { %v4326_v6 = vld [vmem:[#allocation3 + $0x182] sm:$0xff]  ;;  %v7616_v59 = vld [vmem:[%s12398_s3 + $0x298] sm:$0xff]  ;;  %v7619_v31 = vld [vmem:[%s12398_s3 + $0x2b0] sm:$0xff] }
 0x520   :  { %v3910_v16 = vmax.f32 %v3853_v55, %v3854_v14  ;;  %4719 = vmatmul.mubr.f32.gmra.mrb[140].mxu1 %v4326_v6  ;;  %4186 = vst [vmem:[#allocation3 + $0x198] sm:$0xff] %v11666_v44  ;;  %v7608_v55 = vld [vmem:[%s12398_s3 + $0x258] sm:$0xff]  ;;  %v7605_v6 = vld [vmem:[%s12398_s3 + $0x240] sm:$0xff]  ;;  %v5177_v24 = vld [vmem:[#allocation3 + $0xac] sm:$0xff] }
 0x521   :  { %4724 = vmatprep.mubr.f32.mxu1 %v12419_v10  ;;  %v4075_v17 = vld [vmem:[#allocation2 + $0x1a1] sm:$0xff]  ;;  %v8262_v61 = vpack.c.bf16 %v7608_v55, %v7606_v58  ;;  %v4202_v14 = vld [vmem:[#allocation3 + $0x58] sm:$0xff]  ;;  %v4213_v55 = vld [vmem:[#allocation3 + $0xb0] sm:$0xff] }
 0x522   :  { %3966 = vst [vmem:[#allocation2 + $0x1b8] sm:$0xf] %v3910_v16  ;;  %v11670_v18 = vmax.f32 %v3907_v41, %v4075_v17  ;;  %v7607_v16 = vld [vmem:[%s12398_s3 + $0x250] sm:$0xff]  ;;  %v4210_v54 = vld [vmem:[#allocation3 + $0x98] sm:$0xff]  ;;  %v7617_v40 = vld [vmem:[%s12398_s3 + $0x2a0] sm:$0xff] }
 0x523   :  { %v4327_v23 = vld [vmem:[#allocation3 + $0x18a] sm:$0xff]  ;;  %v8264_v17 = vpack.c.bf16 %v7607_v16, %v7605_v6  ;;  %v7628_v58 = vld [vmem:[%s12398_s3 + $0x2f8] sm:$0xff] }
 0x524   :  { %4725 = vmatmul.mubr.f32.gmra.mrb[142].mxu1 %v4327_v23  ;;  %4187 = vst [vmem:[#allocation3 + $0x1a0] sm:$0xff] %v11670_v18  ;;  %v4203_v23 = vld [vmem:[#allocation3 + $0x60] sm:$0xff]  ;;  %v7627_v6 = vld [vmem:[%s12398_s3 + $0x2f0] sm:$0xff] }
 0x525   :  { %4730 = vmatprep.mubr.f32.mxu1 %v12419_v10  ;;  %v4076_v37 = vld [vmem:[#allocation2 + $0x1a9] sm:$0xff]  ;;  %v5178_v62 = vld [vmem:[#allocation3 + $0xb4] sm:$0xff] }
 0x526   :  { %v11674_v28 = vmax.f32 %v3908_v21, %v4076_v37  ;;  %v4194_v21 = vld [vmem:[#allocation3 + $0x18] sm:$0xff]  ;;  %v4204_v37 = vld [vmem:[#allocation3 + $0x68] sm:$0xff] }
 0x527   :  { %v4328_v22 = vld [vmem:[#allocation3 + $0x192] sm:$0xff] }
 0x528   :  { %4731 = vmatmul.mubr.f32.gmra.mrb[144].mxu1 %v4328_v22  ;;  %4188 = vst [vmem:[#allocation3 + $0x1a8] sm:$0xff] %v11674_v28  ;;  %v4205_v22 = vld [vmem:[#allocation3 + $0x70] sm:$0xff] }
 0x529   :  { %4736 = vmatprep.mubr.f32.mxu1 %v12419_v10  ;;  %v4077_v12 = vld [vmem:[#allocation2 + $0x1b1] sm:$0xff]  ;;  %v4078_v57 = vld [vmem:[#allocation2 + $0x1b9] sm:$0x7] }
 0x52a   :  { %v4022_v35 = vld [vmem:[#allocation2 + $0x1b8] sm:$0x7]  ;;  %v4133_v39 = vmax.f32 %v3909_v34, %v4077_v12  ;;  %v4201_v34 = vld [vmem:[#allocation3 + $0x50] sm:$0xff] }
 0x52b   :  { %v4134_v15 = vmax.f32 %v4022_v35, %v4078_v57  ;;  %v4329_v41 = vld [vmem:[#allocation3 + $0x19a] sm:$0xff]  ;;  %v4208_v57 = vld [vmem:[#allocation3 + $0x88] sm:$0xff] }
 0x52c   :  { %4737 = vmatmul.mubr.f32.gmra.mrb[146].mxu1 %v4329_v41  ;;  %4189 = vst [vmem:[#allocation3 + $0x1b0] sm:$0xff] %v4133_v39  ;;  %v4206_v12 = vld [vmem:[#allocation3 + $0x78] sm:$0xff]  ;;  %v4207_v35 = vld [vmem:[#allocation3 + $0x80] sm:$0xff]  ;;  %v7610_v39 = vld [vmem:[%s12398_s3 + $0x268] sm:$0xff] }
 0x52d   :  { %4190 = vst [vmem:[#allocation3 + $0x1b8] sm:$0x7] %v4134_v15  ;;  %4742 = vmatprep.mubr.f32.mxu1 %v12419_v10  ;;  %v7612_v15 = vld [vmem:[%s12398_s3 + $0x278] sm:$0xff] }
 0x52e   :  { %v8266_v41 = vpack.c.bf16 %v7612_v15, %v7610_v39  ;;  %v4221_v39 = vld [vmem:[#allocation3 + $0xf0] sm:$0xff]  ;;  %v4222_v15 = vld [vmem:[#allocation3 + $0xf8] sm:$0xff] }
 0x52f   :  { %v4330_v33 = vld [vmem:[#allocation3 + $0x1a2] sm:$0xff] }
 0x530   :  { %4743 = vmatmul.mubr.f32.gmra.mrb[148].mxu1 %v4330_v33  ;;  %v4209_v33 = vld [vmem:[#allocation3 + $0x90] sm:$0xff] }
 0x531   :  { %4748 = vmatprep.mubr.f32.mxu1 %v12419_v10 }
 0x533   :  { %v4331_v13 = vld [vmem:[#allocation3 + $0x1aa] sm:$0xff] }
 0x534   :  { %4749 = vmatmul.mubr.f32.gmra.mrb[150].mxu1 %v4331_v13  ;;  %v4332_v5 = vld [vmem:[#allocation3 + $0x1b2] sm:$0x7f]  ;;  %v7614_v13 = vld [vmem:[%s12398_s3 + $0x288] sm:$0xff] }
 0x535   :  { %4754 = vmatprep.mubr.f32.mxu1 %v12419_v10 }
 0x538   :  { %4755 = vmatmul.mubr.f32.gmra.mrb[152].mxu1 %v4332_v5  ;;  %v8270_v5 = vpack.c.bf16 %v7616_v59, %v7614_v13  ;;  %v5180_v13 = vld [vmem:[#allocation3 + $0xc4] sm:$0xff]  ;;  %v5181_v59 = vld [vmem:[#allocation3 + $0xcc] sm:$0xff] }
 0x539   :  { %4825 = vmatprep.mubr.f32.mxu1 %v12419_v10 }
 0x53c   :  { %4826 = vmatmul.mubr.f32.vlgmr.msra.gmra.mrb[44].mxu1 %v4191_v32  ;;  %v7615_v32 = vld [vmem:[%s12398_s3 + $0x290] sm:$0xff] }
 0x53d   :  { %4831 = vmatprep.mubr.f32.mxu1 %v12419_v10  ;;  %8257 = vmatpush1.bf16.msra.mxu1 %v8256_v30  ;;  %v7613_v30 = vld [vmem:[%s12398_s3 + $0x280] sm:$0xff] }
 0x53e   :  { %8259 = vmatprep.subr.bf16.mxu1 %v8258_v47  ;;  %v8276_v47 = vpack.c.bf16 %v7619_v31, %v7617_v40  ;;  %v5191_v40 = vld [vmem:[#allocation3 + $0x11c] sm:$0xff]  ;;  %v5192_v31 = vld [vmem:[#allocation3 + $0x124] sm:$0xff] }
 0x540   :  { %4832 = vmatmul.mubr.f32.gmra.mrb[46].mxu1 %v4192_v2  ;;  %v8272_v2 = vpack.c.bf16 %v7615_v32, %v7613_v30  ;;  %v5184_v30 = vld [vmem:[#allocation3 + $0xe4] sm:$0xff]  ;;  %v5185_v32 = vld [vmem:[#allocation3 + $0xec] sm:$0xff] }
 0x541   :  { %4837 = vmatprep.mubr.f32.mxu1 %v12419_v10  ;;  %8261 = vmatpush1.bf16.msra.mxu1 %v8260_v56  ;;  %v7624_v56 = vld [vmem:[%s12398_s3 + $0x2d8] sm:$0xff] }
 0x542   :  { %8263 = vmatprep.subr.bf16.mxu1 %v8262_v61 }
 0x544   :  { %4838 = vmatmul.mubr.f32.gmra.mrb[48].mxu1 %v4193_v38  ;;  %v7618_v38 = vld [vmem:[%s12398_s3 + $0x2a8] sm:$0xff] }
 0x545   :  { %4843 = vmatprep.mubr.f32.mxu1 %v12419_v10  ;;  %8265 = vmatpush1.bf16.msra.mxu1 %v8264_v17  ;;  %v4214_v17 = vld [vmem:[#allocation3 + $0xb8] sm:$0xff] }
 0x546   :  { %8267 = vmatprep.subr.bf16.mxu1 %v8266_v41  ;;  %v4223_v41 = vld [vmem:[#allocation3 + $0x100] sm:$0xff] }
 0x548   :  { %4844 = vmatmul.mubr.f32.gmra.mrb[50].mxu1 %v4194_v21  ;;  %v7620_v21 = vld [vmem:[%s12398_s3 + $0x2b8] sm:$0xff] }
 0x549   :  { %4849 = vmatprep.mubr.f32.mxu1 %v12419_v10  ;;  %8269 = vmatpush1.bf16.msra.mxu1 %v8268_v27  ;;  %v8274_v48 = vpack.c.bf16 %v7620_v21, %v7618_v38  ;;  %v5179_v27 = vld [vmem:[#allocation3 + $0xbc] sm:$0xff]  ;;  %v5188_v21 = vld [vmem:[#allocation3 + $0x104] sm:$0xff] }
 0x54a   :  { %8271 = vmatprep.subr.bf16.mxu1 %v8270_v5  ;;  %v5183_v5 = vld [vmem:[#allocation3 + $0xdc] sm:$0xff] }
 0x54b   :  { %v5187_v38 = vld [vmem:[#allocation3 + $0xfc] sm:$0xff] }
 0x54c   :  { %4850 = vmatmul.mubr.f32.gmra.mrb[52].mxu1 %v4195_v26  ;;  %v4211_v26 = vld [vmem:[#allocation3 + $0xa0] sm:$0xff] }
 0x54d   :  { %4855 = vmatprep.mubr.f32.mxu1 %v12419_v10  ;;  %8273 = vmatpush1.bf16.msra.mxu1 %v8272_v2  ;;  %v5186_v2 = vld [vmem:[#allocation3 + $0xf4] sm:$0xff] }
 0x54e   :  { %8275 = vmatprep.subr.bf16.mxu1 %v8274_v48  ;;  %v5190_v48 = vld [vmem:[#allocation3 + $0x114] sm:$0xff] }
 0x550   :  { %4856 = vmatmul.mubr.f32.gmra.mrb[54].mxu1 %v4196_v36  ;;  %v4212_v36 = vld [vmem:[#allocation3 + $0xa8] sm:$0xff] }
 0x551   :  { %4861 = vmatprep.mubr.f32.mxu1 %v12419_v10  ;;  %8277 = vmatpush1.bf16.msra.mxu1 %v8276_v47  ;;  %v5193_v47 = vld [vmem:[#allocation3 + $0x12c] sm:$0xff] }
 0x554   :  { %4862 = vmatmul.mubr.f32.gmra.mrb[56].mxu1 %v4197_v60  ;;  %v8278_v60 = vpack.c.bf16 %v7624_v56, %v7622_v9  ;;  %v5194_v9 = vld [vmem:[#allocation3 + $0x134] sm:$0xff]  ;;  %v5195_v56 = vld [vmem:[#allocation3 + $0x13c] sm:$0xff] }
 0x555   :  { %4867 = vmatprep.mubr.f32.mxu1 %v12419_v10 }
 0x556   :  { %8279 = vmatprep.subr.bf16.mxu1 %v8278_v60  ;;  %v5197_v60 = vld [vmem:[#allocation3 + $0x14c] sm:$0xff] }
 0x558   :  { %4868 = vmatmul.mubr.f32.gmra.mrb[58].mxu1 %v4198_v53  ;;  %v7621_v53 = vld [vmem:[%s12398_s3 + $0x2c0] sm:$0xff] }
 0x559   :  { %4873 = vmatprep.mubr.f32.mxu1 %v12419_v10 }
 0x55c   :  { %4874 = vmatmul.mubr.f32.gmra.mrb[60].mxu1 %v4199_v1  ;;  %v7623_v1 = vld [vmem:[%s12398_s3 + $0x2d0] sm:$0xff] }
 0x55d   :  { %4879 = vmatprep.mubr.f32.mxu1 %v12419_v10 }
 0x560   :  { %4880 = vmatmul.mubr.f32.gmra.mrb[62].mxu1 %v4200_v45  ;;  %v8280_v45 = vpack.c.bf16 %v7623_v1, %v7621_v53  ;;  %v5198_v53 = vld [vmem:[#allocation3 + $0x154] sm:$0xff]  ;;  %v5199_v1 = vld [vmem:[#allocation3 + $0x15c] sm:$0xff] }
 0x561   :  { %4885 = vmatprep.mubr.f32.mxu1 %v12419_v10 }
 0x562   :  { %8281 = vmatpush1.bf16.msra.mxu1 %v8280_v45  ;;  %v5200_v45 = vld [vmem:[#allocation3 + $0x164] sm:$0xff] }
 0x564   :  { %4886 = vmatmul.mubr.f32.gmra.mrb[64].mxu1 %v4201_v34  ;;  %v7626_v34 = vld [vmem:[%s12398_s3 + $0x2e8] sm:$0xff] }
 0x565   :  { %4891 = vmatprep.mubr.f32.mxu1 %v12419_v10  ;;  %v8282_v61 = vpack.c.bf16 %v7628_v58, %v7626_v34  ;;  %v5201_v34 = vld [vmem:[#allocation3 + $0x16c] sm:$0xff]  ;;  %v5202_v58 = vld [vmem:[#allocation3 + $0x174] sm:$0xff] }
 0x567   :  { %8283 = vmatprep.subr.bf16.mxu1 %v8282_v61  ;;  %v5204_v61 = vld [vmem:[#allocation3 + $0x184] sm:$0xff] }
 0x568   :  { %4892 = vmatmul.mubr.f32.gmra.mrb[66].mxu1 %v4202_v14  ;;  %v7625_v14 = vld [vmem:[%s12398_s3 + $0x2e0] sm:$0xff] }
 0x569   :  { %4897 = vmatprep.mubr.f32.mxu1 %v12419_v10  ;;  %v8284_v16 = vpack.c.bf16 %v7627_v6, %v7625_v14  ;;  %v5205_v14 = vld [vmem:[#allocation3 + $0x18c] sm:$0xff]  ;;  %v5206_v6 = vld [vmem:[#allocation3 + $0x194] sm:$0xff] }
 0x56b   :  { %8285 = vmatpush1.bf16.msra.mxu1 %v8284_v16  ;;  %v5207_v16 = vld [vmem:[#allocation3 + $0x19c] sm:$0xff] }
 0x56c   :  { %4898 = vmatmul.mubr.f32.gmra.mrb[68].mxu1 %v4203_v23  ;;  %v4215_v23 = vld [vmem:[#allocation3 + $0xc0] sm:$0xff] }
 0x56d   :  { %4903 = vmatprep.mubr.f32.mxu1 %v12419_v10 }
 0x570   :  { %4904 = vmatmul.mubr.f32.gmra.mrb[70].mxu1 %v4204_v37  ;;  %v4216_v37 = vld [vmem:[#allocation3 + $0xc8] sm:$0xff] }
 0x571   :  { %4909 = vmatprep.mubr.f32.mxu1 %v12419_v10 }
 0x574   :  { %4910 = vmatmul.mubr.f32.gmra.mrb[72].mxu1 %v4205_v22  ;;  %v4217_v22 = vld [vmem:[#allocation3 + $0xd0] sm:$0xff] }
 0x575   :  { %4915 = vmatprep.mubr.f32.mxu1 %v12419_v10 }
 0x578   :  { %4916 = vmatmul.mubr.f32.gmra.mrb[74].mxu1 %v4206_v12  ;;  %v4218_v12 = vld [vmem:[#allocation3 + $0xd8] sm:$0xff] }
 0x579   :  { %4921 = vmatprep.mubr.f32.mxu1 %v12419_v10 }
 0x57c   :  { %4922 = vmatmul.mubr.f32.gmra.mrb[76].mxu1 %v4207_v35  ;;  %v4219_v35 = vld [vmem:[#allocation3 + $0xe0] sm:$0xff] }
 0x57d   :  { %4927 = vmatprep.mubr.f32.mxu1 %v12419_v10 }
 0x580   :  { %4928 = vmatmul.mubr.f32.gmra.mrb[78].mxu1 %v4208_v57  ;;  %v4220_v57 = vld [vmem:[#allocation3 + $0xe8] sm:$0xff] }
 0x581   :  { %4933 = vmatprep.mubr.f32.mxu1 %v12419_v10 }
 0x584   :  { %4934 = vmatmul.mubr.f32.gmra.mrb[80].mxu1 %v4209_v33  ;;  %v5176_v33 = vld [vmem:[#allocation3 + $0xa4] sm:$0xff] }
 0x585   :  { %4939 = vmatprep.mubr.f32.mxu1 %v12419_v10 }
 0x588   :  { %4940 = vmatmul.mubr.f32.gmra.mrb[82].mxu1 %v4210_v54  ;;  %v5182_v54 = vld [vmem:[#allocation3 + $0xd4] sm:$0xff] }
 0x589   :  { %4945 = vmatprep.mubr.f32.mxu1 %v12419_v10 }
 0x58c   :  { %4946 = vmatmul.mubr.f32.gmra.mrb[84].mxu1 %v4211_v26  ;;  %v5189_v26 = vld [vmem:[#allocation3 + $0x10c] sm:$0xff] }
 0x58d   :  { %4951 = vmatprep.mubr.f32.mxu1 %v12419_v10 }
 0x590   :  { %4952 = vmatmul.mubr.f32.gmra.mrb[86].mxu1 %v4212_v36  ;;  %v5196_v36 = vld [vmem:[#allocation3 + $0x144] sm:$0xff] }
 0x591   :  { %4957 = vmatprep.mubr.f32.mxu1 %v12419_v10 }
 0x594   :  { %4958 = vmatmul.mubr.f32.gmra.mrb[88].mxu1 %v4213_v55  ;;  %v5203_v55 = vld [vmem:[#allocation3 + $0x17c] sm:$0xff] }
 0x595   :  { %4963 = vmatprep.mubr.f32.mxu1 %v12419_v10 }
 0x598   :  { %4964 = vmatmul.mubr.f32.gmra.mrb[90].mxu1 %v4214_v17  ;;  %v5749_v17 = vld [vmem:[%s12399_s4] sm:$0x3] }
 0x599   :  { %4969 = vmatprep.mubr.f32.mxu1 %v12419_v10 }
 0x59c   :  { %4970 = vmatmul.mubr.f32.gmra.mrb[92].mxu1 %v4215_v23  ;;  %v5208_v23 = vld [vmem:[#allocation3 + $0x1a4] sm:$0xff] }
 0x59d   :  { %4975 = vmatprep.mubr.f32.mxu1 %v12419_v10 }
 0x5a0   :  { %4976 = vmatmul.mubr.f32.gmra.mrb[94].mxu1 %v4216_v37  ;;  %v12426_v37 = vld [vmem:[#allocation12_spill] sm:$0xff] }
 0x5a1   :  { %4981 = vmatprep.mubr.f32.mxu1 %v12419_v10 }
 0x5a4   :  { %4982 = vmatmul.mubr.f32.gmra.mrb[96].mxu1 %v4217_v22  ;;  %v12427_v22 = vsub.s32 0, %v12426_v37 }
 0x5a5   :  { %4987 = vmatprep.mubr.f32.mxu1 %v12419_v10 }
 0x5a8   :  { %4988 = vmatmul.mubr.f32.gmra.mrb[98].mxu1 %v4218_v12  ;;  %v11911_v12 = vrot.slane %v5749_v17, %v12427_v22 }
 0x5a9   :  { %4993 = vmatprep.mubr.f32.mxu1 %v12419_v10 }
 0x5ac   :  { %4994 = vmatmul.mubr.f32.gmra.mrb[100].mxu1 %v4219_v35  ;;  %v12428_v35 = vsub.s32 1, %v12426_v37 }
 0x5ad   :  { %4999 = vmatprep.mubr.f32.mxu1 %v12419_v10 }
 0x5b0   :  { %5000 = vmatmul.mubr.f32.gmra.mrb[102].mxu1 %v4220_v57  ;;  %v11916_v57 = vrot.slane %v5749_v17, %v12428_v35  ;;  %v6257_v17 = vld [vmem:[#allocation5 + $0x8] sm:$0xff] }
 0x5b1   :  { %5005 = vmatprep.mubr.f32.mxu1 %v12419_v10 }
 0x5b4   :  { %5006 = vmatmul.mubr.f32.gmra.mrb[104].mxu1 %v4221_v39 }
 0x5b5   :  { %5011 = vmatprep.mubr.f32.mxu1 %v12419_v10 }
 0x5b8   :  { %5012 = vmatmul.mubr.f32.gmra.mrb[106].mxu1 %v4222_v15  ;;  %v5209_v15 = vld [vmem:[#allocation3 + $0x1ac] sm:$0xff] }
 0x5b9   :  { %5017 = vmatprep.mubr.f32.mxu1 %v12419_v10 }
 0x5bc   :  { %5018 = vmatmul.mubr.f32.gmra.mrb[108].mxu1 %v4223_v41 }
 0x5bd   :  { %5023 = vmatprep.mubr.f32.mxu1 %v12419_v10 }
 0x5c0   :  { %5024 = vmatmul.mubr.f32.gmra.mrb[110].mxu1 %v11524_v63  ;;  %v4245_v63 = vld [vmem:[#allocation3 + $0x1b0] sm:$0x7f] }
 0x5c1   :  { %5029 = vmatprep.mubr.f32.mxu1 %v12419_v10 }
 0x5c4   :  { %5030 = vmatmul.mubr.f32.gmra.mrb[112].mxu1 %v11532_v51  ;;  %v5156_v51 = vld [vmem:[#allocation3 + $0x4] sm:$0xff] }
 0x5c5   :  { %5035 = vmatprep.mubr.f32.mxu1 %v12419_v10 }
 0x5c8   :  { %5036 = vmatmul.mubr.f32.gmra.mrb[114].mxu1 %v11540_v4  ;;  %v5157_v4 = vld [vmem:[#allocation3 + $0xc] sm:$0xff] }
 0x5c9   :  { %5041 = vmatprep.mubr.f32.mxu1 %v12419_v10 }
 0x5cc   :  { %5042 = vmatmul.mubr.f32.gmra.mrb[116].mxu1 %v11548_v46  ;;  %v5158_v46 = vld [vmem:[#allocation3 + $0x14] sm:$0xff] }
 0x5cd   :  { %5047 = vmatprep.mubr.f32.mxu1 %v12419_v10 }
 0x5d0   :  { %5048 = vmatmul.mubr.f32.gmra.mrb[118].mxu1 %v11556_v0  ;;  %v5159_v0 = vld [vmem:[#allocation3 + $0x1c] sm:$0xff] }
 0x5d1   :  { %5053 = vmatprep.mubr.f32.mxu1 %v12419_v10 }
 0x5d4   :  { %5054 = vmatmul.mubr.f32.gmra.mrb[120].mxu1 %v11564_v25  ;;  %v5160_v25 = vld [vmem:[#allocation3 + $0x24] sm:$0xff] }
 0x5d5   :  { %5059 = vmatprep.mubr.f32.mxu1 %v12419_v10 }
 0x5d8   :  { %5060 = vmatmul.mubr.f32.gmra.mrb[122].mxu1 %v11572_v11  ;;  %v5161_v11 = vld [vmem:[#allocation3 + $0x2c] sm:$0xff] }
 0x5d9   :  { %5065 = vmatprep.mubr.f32.mxu1 %v12419_v10 }
 0x5dc   :  { %5066 = vmatmul.mubr.f32.gmra.mrb[124].mxu1 %v11580_v3  ;;  %v5162_v3 = vld [vmem:[#allocation3 + $0x34] sm:$0xff] }
 0x5dd   :  { %5071 = vmatprep.mubr.f32.mxu1 %v12419_v10 }
 0x5e0   :  { %5072 = vmatmul.mubr.f32.gmra.mrb[126].mxu1 %v11588_v29  ;;  %v5163_v29 = vld [vmem:[#allocation3 + $0x3c] sm:$0xff] }
 0x5e1   :  { %5077 = vmatprep.mubr.f32.mxu1 %v12419_v10 }
 0x5e4   :  { %5078 = vmatmul.mubr.f32.gmra.mrb[128].mxu1 %v11596_v8  ;;  %v5164_v8 = vld [vmem:[#allocation3 + $0x44] sm:$0xff] }
 0x5e5   :  { %5083 = vmatprep.mubr.f32.mxu1 %v12419_v10 }
 0x5e8   :  { %5084 = vmatmul.mubr.f32.gmra.mrb[130].mxu1 %v11604_v19  ;;  %v5165_v19 = vld [vmem:[#allocation3 + $0x4c] sm:$0xff] }
 0x5e9   :  { %5089 = vmatprep.mubr.f32.mxu1 %v12419_v10 }
 0x5ec   :  { %5090 = vmatmul.mubr.f32.gmra.mrb[132].mxu1 %v11612_v7  ;;  %v5166_v7 = vld [vmem:[#allocation3 + $0x54] sm:$0xff] }
 0x5ed   :  { %5095 = vmatprep.mubr.f32.mxu1 %v12419_v10 }
 0x5f0   :  { %5096 = vmatmul.mubr.f32.gmra.mrb[134].mxu1 %v11620_v43  ;;  %v5167_v43 = vld [vmem:[#allocation3 + $0x5c] sm:$0xff] }
 0x5f1   :  { %5101 = vmatprep.mubr.f32.mxu1 %v12419_v10 }
 0x5f4   :  { %5102 = vmatmul.mubr.f32.gmra.mrb[136].mxu1 %v11628_v49  ;;  %v5168_v49 = vld [vmem:[#allocation3 + $0x64] sm:$0xff] }
 0x5f5   :  { %5107 = vmatprep.mubr.f32.mxu1 %v12419_v10 }
 0x5f8   :  { %5108 = vmatmul.mubr.f32.gmra.mrb[138].mxu1 %v11636_v52  ;;  %v5169_v52 = vld [vmem:[#allocation3 + $0x6c] sm:$0xff] }
 0x5f9   :  { %5113 = vmatprep.mubr.f32.mxu1 %v12419_v10 }
 0x5fc   :  { %5114 = vmatmul.mubr.f32.gmra.mrb[140].mxu1 %v11644_v20  ;;  %v5170_v20 = vld [vmem:[#allocation3 + $0x74] sm:$0xff] }
 0x5fd   :  { %5119 = vmatprep.mubr.f32.mxu1 %v12419_v10 }
 0x600   :  { %5120 = vmatmul.mubr.f32.gmra.mrb[142].mxu1 %v11652_v42  ;;  %v5171_v42 = vld [vmem:[#allocation3 + $0x7c] sm:$0xff] }
 0x601   :  { %5125 = vmatprep.mubr.f32.mxu1 %v12419_v10 }
 0x604   :  { %5126 = vmatmul.mubr.f32.gmra.mrb[144].mxu1 %v11660_v50  ;;  %v5172_v50 = vld [vmem:[#allocation3 + $0x84] sm:$0xff] }
 0x605   :  { %5131 = vmatprep.mubr.f32.mxu1 %v12419_v10 }
 0x608   :  { %5132 = vmatmul.mubr.f32.gmra.mrb[146].mxu1 %v11666_v44  ;;  %v5173_v44 = vld [vmem:[#allocation3 + $0x8c] sm:$0xff] }
 0x609   :  { %5137 = vmatprep.mubr.f32.mxu1 %v12419_v10 }
 0x60c   :  { %5138 = vmatmul.mubr.f32.gmra.mrb[148].mxu1 %v11670_v18  ;;  %v5174_v18 = vld [vmem:[#allocation3 + $0x94] sm:$0xff] }
 0x60d   :  { %5143 = vmatprep.mubr.f32.mxu1 %v12419_v10 }
 0x610   :  { %5144 = vmatmul.mubr.f32.gmra.mrb[150].mxu1 %v11674_v28  ;;  %v5175_v28 = vld [vmem:[#allocation3 + $0x9c] sm:$0xff] }
 0x611   :  { %5149 = vmatprep.mubr.f32.mxu1 %v12419_v10 }
 0x614   :  { %5150 = vmatmul.mubr.f32.gmra.mrb[152].mxu1 %v4245_v63 }
 0x615   :  { %5308 = vmatprep.mubr.f32.mxu1 %v12419_v10 }
 0x618   :  { %5309 = vmatmul.mubr.f32.vlgmr.msra.gmra.mrb[44].mxu1 %v5156_v51 }
 0x619   :  { %5314 = vmatprep.mubr.f32.mxu1 %v12419_v10 }
 0x61c   :  { %5315 = vmatmul.mubr.f32.gmra.mrb[46].mxu1 %v5157_v4 }
 0x61d   :  { %5320 = vmatprep.mubr.f32.mxu1 %v12419_v10 }
 0x620   :  { %5321 = vmatmul.mubr.f32.gmra.mrb[48].mxu1 %v5158_v46 }
 0x621   :  { %5326 = vmatprep.mubr.f32.mxu1 %v12419_v10 }
 0x624   :  { %5327 = vmatmul.mubr.f32.gmra.mrb[50].mxu1 %v5159_v0 }
 0x625   :  { %5332 = vmatprep.mubr.f32.mxu1 %v12419_v10 }
 0x628   :  { %5333 = vmatmul.mubr.f32.gmra.mrb[52].mxu1 %v5160_v25  ;;  %v5210_v25 = vld [vmem:[#allocation3 + $0x1b4] sm:$0x7f] }
 0x629   :  { %5338 = vmatprep.mubr.f32.mxu1 %v12419_v10 }
 0x62c   :  { %5339 = vmatmul.mubr.f32.gmra.mrb[54].mxu1 %v5161_v11 }
 0x62d   :  { %5344 = vmatprep.mubr.f32.mxu1 %v12419_v10 }
 0x630   :  { %5345 = vmatmul.mubr.f32.gmra.mrb[56].mxu1 %v5162_v3 }
 0x631   :  { %5350 = vmatprep.mubr.f32.mxu1 %v12419_v10 }
 0x634   :  { %5351 = vmatmul.mubr.f32.gmra.mrb[58].mxu1 %v5163_v29 }
 0x635   :  { %5356 = vmatprep.mubr.f32.mxu1 %v12419_v10 }
 0x638   :  { %5357 = vmatmul.mubr.f32.gmra.mrb[60].mxu1 %v5164_v8 }
 0x639   :  { %5362 = vmatprep.mubr.f32.mxu1 %v12419_v10 }
 0x63c   :  { %5363 = vmatmul.mubr.f32.gmra.mrb[62].mxu1 %v5165_v19 }
 0x63d   :  { %5368 = vmatprep.mubr.f32.mxu1 %v12419_v10 }
 0x640   :  { %5369 = vmatmul.mubr.f32.gmra.mrb[64].mxu1 %v5166_v7 }
 0x641   :  { %5374 = vmatprep.mubr.f32.mxu1 %v12419_v10 }
 0x644   :  { %5375 = vmatmul.mubr.f32.gmra.mrb[66].mxu1 %v5167_v43 }
 0x645   :  { %5380 = vmatprep.mubr.f32.mxu1 %v12419_v10 }
 0x648   :  { %5381 = vmatmul.mubr.f32.gmra.mrb[68].mxu1 %v5168_v49 }
 0x649   :  { %5386 = vmatprep.mubr.f32.mxu1 %v12419_v10 }
 0x64c   :  { %5387 = vmatmul.mubr.f32.gmra.mrb[70].mxu1 %v5169_v52 }
 0x64d   :  { %5392 = vmatprep.mubr.f32.mxu1 %v12419_v10 }
 0x650   :  { %5393 = vmatmul.mubr.f32.gmra.mrb[72].mxu1 %v5170_v20 }
 0x651   :  { %5398 = vmatprep.mubr.f32.mxu1 %v12419_v10 }
 0x654   :  { %5399 = vmatmul.mubr.f32.gmra.mrb[74].mxu1 %v5171_v42 }
 0x655   :  { %5404 = vmatprep.mubr.f32.mxu1 %v12419_v10 }
 0x658   :  { %5405 = vmatmul.mubr.f32.gmra.mrb[76].mxu1 %v5172_v50 }
 0x659   :  { %5410 = vmatprep.mubr.f32.mxu1 %v12419_v10 }
 0x65c   :  { %5411 = vmatmul.mubr.f32.gmra.mrb[78].mxu1 %v5173_v44 }
 0x65d   :  { %5416 = vmatprep.mubr.f32.mxu1 %v12419_v10 }
 0x660   :  { %5417 = vmatmul.mubr.f32.gmra.mrb[80].mxu1 %v5174_v18 }
 0x661   :  { %5422 = vmatprep.mubr.f32.mxu1 %v12419_v10 }
 0x664   :  { %5423 = vmatmul.mubr.f32.gmra.mrb[82].mxu1 %v5175_v28 }
 0x665   :  { %5428 = vmatprep.mubr.f32.mxu1 %v12419_v10 }
 0x668   :  { %5429 = vmatmul.mubr.f32.gmra.mrb[84].mxu1 %v5176_v33 }
 0x669   :  { %5434 = vmatprep.mubr.f32.mxu1 %v12419_v10 }
 0x66c   :  { %5435 = vmatmul.mubr.f32.gmra.mrb[86].mxu1 %v5177_v24 }
 0x66d   :  { %5440 = vmatprep.mubr.f32.mxu1 %v12419_v10 }
 0x670   :  { %5441 = vmatmul.mubr.f32.gmra.mrb[88].mxu1 %v5178_v62 }
 0x671   :  { %5446 = vmatprep.mubr.f32.mxu1 %v12419_v10 }
 0x674   :  { %5447 = vmatmul.mubr.f32.gmra.mrb[90].mxu1 %v5179_v27 }
 0x675   :  { %5452 = vmatprep.mubr.f32.mxu1 %v12419_v10 }
 0x678   :  { %5453 = vmatmul.mubr.f32.gmra.mrb[92].mxu1 %v5180_v13 }
 0x679   :  { %5458 = vmatprep.mubr.f32.mxu1 %v12419_v10 }
 0x67c   :  { %5459 = vmatmul.mubr.f32.gmra.mrb[94].mxu1 %v5181_v59 }
 0x67d   :  { %5464 = vmatprep.mubr.f32.mxu1 %v12419_v10 }
 0x680   :  { %5465 = vmatmul.mubr.f32.gmra.mrb[96].mxu1 %v5182_v54 }
 0x681   :  { %5470 = vmatprep.mubr.f32.mxu1 %v12419_v10 }
 0x684   :  { %5471 = vmatmul.mubr.f32.gmra.mrb[98].mxu1 %v5183_v5 }
 0x685   :  { %5476 = vmatprep.mubr.f32.mxu1 %v12419_v10 }
 0x688   :  { %5477 = vmatmul.mubr.f32.gmra.mrb[100].mxu1 %v5184_v30 }
 0x689   :  { %5482 = vmatprep.mubr.f32.mxu1 %v12419_v10 }
 0x68c   :  { %5483 = vmatmul.mubr.f32.gmra.mrb[102].mxu1 %v5185_v32 }
 0x68d   :  { %5488 = vmatprep.mubr.f32.mxu1 %v12419_v10 }
 0x690   :  { %5489 = vmatmul.mubr.f32.gmra.mrb[104].mxu1 %v5186_v2 }
 0x691   :  { %5494 = vmatprep.mubr.f32.mxu1 %v12419_v10 }
 0x694   :  { %5495 = vmatmul.mubr.f32.gmra.mrb[106].mxu1 %v5187_v38 }
 0x695   :  { %5500 = vmatprep.mubr.f32.mxu1 %v12419_v10 }
 0x698   :  { %5501 = vmatmul.mubr.f32.gmra.mrb[108].mxu1 %v5188_v21 }
 0x699   :  { %5506 = vmatprep.mubr.f32.mxu1 %v12419_v10 }
 0x69c   :  { %5507 = vmatmul.mubr.f32.gmra.mrb[110].mxu1 %v5189_v26 }
 0x69d   :  { %5512 = vmatprep.mubr.f32.mxu1 %v12419_v10 }
 0x6a0   :  { %5513 = vmatmul.mubr.f32.gmra.mrb[112].mxu1 %v5190_v48 }
 0x6a1   :  { %5518 = vmatprep.mubr.f32.mxu1 %v12419_v10 }
 0x6a4   :  { %5519 = vmatmul.mubr.f32.gmra.mrb[114].mxu1 %v5191_v40 }
 0x6a5   :  { %5524 = vmatprep.mubr.f32.mxu1 %v12419_v10 }
 0x6a8   :  { %5525 = vmatmul.mubr.f32.gmra.mrb[116].mxu1 %v5192_v31 }
 0x6a9   :  { %5530 = vmatprep.mubr.f32.mxu1 %v12419_v10 }
 0x6ac   :  { %5531 = vmatmul.mubr.f32.gmra.mrb[118].mxu1 %v5193_v47 }
 0x6ad   :  { %5536 = vmatprep.mubr.f32.mxu1 %v12419_v10 }
 0x6b0   :  { %5537 = vmatmul.mubr.f32.gmra.mrb[120].mxu1 %v5194_v9 }
 0x6b1   :  { %5542 = vmatprep.mubr.f32.mxu1 %v12419_v10 }
 0x6b4   :  { %5543 = vmatmul.mubr.f32.gmra.mrb[122].mxu1 %v5195_v56 }
 0x6b5   :  { %5548 = vmatprep.mubr.f32.mxu1 %v12419_v10 }
 0x6b8   :  { %5549 = vmatmul.mubr.f32.gmra.mrb[124].mxu1 %v5196_v36 }
 0x6b9   :  { %5554 = vmatprep.mubr.f32.mxu1 %v12419_v10 }
 0x6bc   :  { %5555 = vmatmul.mubr.f32.gmra.mrb[126].mxu1 %v5197_v60 }
 0x6bd   :  { %5560 = vmatprep.mubr.f32.mxu1 %v12419_v10 }
 0x6c0   :  { %5561 = vmatmul.mubr.f32.gmra.mrb[128].mxu1 %v5198_v53 }
 0x6c1   :  { %5566 = vmatprep.mubr.f32.mxu1 %v12419_v10 }
 0x6c4   :  { %5567 = vmatmul.mubr.f32.gmra.mrb[130].mxu1 %v5199_v1 }
 0x6c5   :  { %5572 = vmatprep.mubr.f32.mxu1 %v12419_v10 }
 0x6c8   :  { %5573 = vmatmul.mubr.f32.gmra.mrb[132].mxu1 %v5200_v45 }
 0x6c9   :  { %5578 = vmatprep.mubr.f32.mxu1 %v12419_v10 }
 0x6cc   :  { %5579 = vmatmul.mubr.f32.gmra.mrb[134].mxu1 %v5201_v34 }
 0x6cd   :  { %5584 = vmatprep.mubr.f32.mxu1 %v12419_v10 }
 0x6d0   :  { %5585 = vmatmul.mubr.f32.gmra.mrb[136].mxu1 %v5202_v58 }
 0x6d1   :  { %5590 = vmatprep.mubr.f32.mxu1 %v12419_v10 }
 0x6d4   :  { %5591 = vmatmul.mubr.f32.gmra.mrb[138].mxu1 %v5203_v55 }
 0x6d5   :  { %5596 = vmatprep.mubr.f32.mxu1 %v12419_v10 }
 0x6d8   :  { %5597 = vmatmul.mubr.f32.gmra.mrb[140].mxu1 %v5204_v61 }
 0x6d9   :  { %5602 = vmatprep.mubr.f32.mxu1 %v12419_v10 }
 0x6dc   :  { %5603 = vmatmul.mubr.f32.gmra.mrb[142].mxu1 %v5205_v14 }
 0x6dd   :  { %5608 = vmatprep.mubr.f32.mxu1 %v12419_v10 }
 0x6e0   :  { %5609 = vmatmul.mubr.f32.gmra.mrb[144].mxu1 %v5206_v6 }
 0x6e1   :  { %5614 = vmatprep.mubr.f32.mxu1 %v12419_v10 }
 0x6e4   :  { %5615 = vmatmul.mubr.f32.gmra.mrb[146].mxu1 %v5207_v16 }
 0x6e5   :  { %5620 = vmatprep.mubr.f32.mxu1 %v12419_v10 }
 0x6e8   :  { %5621 = vmatmul.mubr.f32.gmra.mrb[148].mxu1 %v5208_v23 }
 0x6e9   :  { %5626 = vmatprep.mubr.f32.mxu1 %v12419_v10 }
 0x6eb   :  { %v5310_v39 = vpop.f32.mrb[44].mxu1 }
 0x6ec   :  { %v5761_v41 = vadd.f32 %v11911_v12, %v5310_v39  ;;  %v5312_v63 = vpop.f32.mrb[45].mxu1  ;;  %5627 = vmatmul.mubr.f32.gmra.mrb[150].mxu1 %v5209_v15 }
 0x6ed   :  { %v5762_v51 = vadd.f32 %v11916_v57, %v5312_v63  ;;  %5632 = vmatprep.mubr.f32.mxu1 %v12419_v10 }
 0x6ee   :  { %v5871_v4 = vmax.f32 %v5761_v41, 0.0 }
 0x6ef   :  { %v5872_v46 = vmax.f32 %v5762_v51, 0.0  ;;  %v5316_v0 = vpop.f32.mrb[46].mxu1 }
 0x6f0   :  { %v5763_v11 = vadd.f32 %v11911_v12, %v5316_v0  ;;  %v5318_v3 = vpop.f32.mrb[47].mxu1  ;;  %5633 = vmatmul.mubr.f32.gmra.mrb[152].mxu1 %v5210_v25 }
 0x6f1   :  { %v5981_v29 = vmax.f32 %v5871_v4, %v5872_v46  ;;  %v5764_v8 = vadd.f32 %v11916_v57, %v5318_v3  ;;  %6395 = vmatprep.mubr.f32.mxu1 %v6257_v17 }
 0x6f2   :  { %v5873_v19 = vmax.f32 %v5763_v11, 0.0 }
 0x6f3   :  { %6036 = vst [vmem:[#allocation4] sm:$0xff] %v5981_v29  ;;  %v5874_v7 = vmax.f32 %v5764_v8, 0.0  ;;  %v5322_v43 = vpop.f32.mrb[48].mxu1 }
 0x6f4   :  { %v5765_v49 = vadd.f32 %v11911_v12, %v5322_v43  ;;  %v5324_v52 = vpop.f32.mrb[49].mxu1 }
 0x6f5   :  { %v5982_v20 = vmax.f32 %v5873_v19, %v5874_v7  ;;  %v5766_v42 = vadd.f32 %v11916_v57, %v5324_v52 }
 0x6f6   :  { %v5875_v50 = vmax.f32 %v5765_v49, 0.0 }
 0x6f7   :  { %6037 = vst [vmem:[#allocation4 + $0x8] sm:$0xff] %v5982_v20  ;;  %v5876_v44 = vmax.f32 %v5766_v42, 0.0  ;;  %v5328_v18 = vpop.f32.mrb[50].mxu1 }
 0x6f8   :  { %v5767_v28 = vadd.f32 %v11911_v12, %v5328_v18  ;;  %v5330_v33 = vpop.f32.mrb[51].mxu1 }
 0x6f9   :  { %v5983_v24 = vmax.f32 %v5875_v50, %v5876_v44  ;;  %v5768_v62 = vadd.f32 %v11916_v57, %v5330_v33 }
 0x6fa   :  { %v5877_v27 = vmax.f32 %v5767_v28, 0.0 }
 0x6fb   :  { %6038 = vst [vmem:[#allocation4 + $0x10] sm:$0xff] %v5983_v24  ;;  %v5878_v13 = vmax.f32 %v5768_v62, 0.0  ;;  %v5334_v59 = vpop.f32.mrb[52].mxu1 }
 0x6fc   :  { %v5769_v54 = vadd.f32 %v11911_v12, %v5334_v59  ;;  %v5336_v5 = vpop.f32.mrb[53].mxu1 }
 0x6fd   :  { %v5984_v30 = vmax.f32 %v5877_v27, %v5878_v13  ;;  %v5770_v32 = vadd.f32 %v11916_v57, %v5336_v5 }
 0x6fe   :  { %v5879_v2 = vmax.f32 %v5769_v54, 0.0  ;;  %v6146_v40 = vld [vmem:[#allocation4 + $0x2] sm:$0xff] }
 0x6ff   :  { %6039 = vst [vmem:[#allocation4 + $0x18] sm:$0xff] %v5984_v30  ;;  %v5880_v38 = vmax.f32 %v5770_v32, 0.0  ;;  %v5340_v21 = vpop.f32.mrb[54].mxu1  ;;  %v6201_v53 = vmax.f32 %v5981_v29, %v6146_v40 }
 0x700   :  { %v5771_v26 = vadd.f32 %v11911_v12, %v5340_v21  ;;  %v5342_v48 = vpop.f32.mrb[55].mxu1 }
 0x701   :  { %v5985_v31 = vmax.f32 %v5879_v2, %v5880_v38  ;;  %v5772_v47 = vadd.f32 %v11916_v57, %v5342_v48 }
 0x702   :  { %v5881_v9 = vmax.f32 %v5771_v26, 0.0  ;;  %v6147_v56 = vld [vmem:[#allocation4 + $0xa] sm:$0xff] }
 0x703   :  { %6040 = vst [vmem:[#allocation4 + $0x20] sm:$0xff] %v5985_v31  ;;  %v5882_v36 = vmax.f32 %v5772_v47, 0.0  ;;  %v5346_v60 = vpop.f32.mrb[56].mxu1  ;;  %v6202_v1 = vmax.f32 %v5982_v20, %v6147_v56 }
 0x704   :  { %v5773_v45 = vadd.f32 %v11911_v12, %v5346_v60  ;;  %v5348_v34 = vpop.f32.mrb[57].mxu1 }
 0x705   :  { %v5986_v58 = vmax.f32 %v5881_v9, %v5882_v36  ;;  %v5774_v55 = vadd.f32 %v11916_v57, %v5348_v34  ;;  %v11933_v61 = vpack.c.bf16 %v6202_v1, %v6201_v53 }
 0x706   :  { %v5883_v14 = vmax.f32 %v5773_v45, 0.0  ;;  %v6148_v22 = vld [vmem:[#allocation4 + $0x12] sm:$0xff] }
 0x707   :  { %6041 = vst [vmem:[#allocation4 + $0x28] sm:$0xff] %v5986_v58  ;;  %v5884_v6 = vmax.f32 %v5774_v55, 0.0  ;;  %v5352_v16 = vpop.f32.mrb[58].mxu1  ;;  %v6203_v4 = vmax.f32 %v5983_v24, %v6148_v22 }
 0x708   :  { %v5775_v23 = vadd.f32 %v11911_v12, %v5352_v16  ;;  %v5354_v37 = vpop.f32.mrb[59].mxu1 }
 0x709   :  { %v5987_v35 = vmax.f32 %v5883_v14, %v5884_v6  ;;  %v5776_v39 = vadd.f32 %v11916_v57, %v5354_v37 }
 0x70a   :  { %v5885_v15 = vmax.f32 %v5775_v23, 0.0  ;;  %v6149_v41 = vld [vmem:[#allocation4 + $0x1a] sm:$0xff] }
 0x70b   :  { %6042 = vst [vmem:[#allocation4 + $0x30] sm:$0xff] %v5987_v35  ;;  %v5886_v63 = vmax.f32 %v5776_v39, 0.0  ;;  %v5358_v51 = vpop.f32.mrb[60].mxu1  ;;  %v6204_v46 = vmax.f32 %v5984_v30, %v6149_v41 }
 0x70c   :  { %v5777_v0 = vadd.f32 %v11911_v12, %v5358_v51  ;;  %v5360_v25 = vpop.f32.mrb[61].mxu1 }
 0x70d   :  { %v5988_v11 = vmax.f32 %v5885_v15, %v5886_v63  ;;  %v5778_v3 = vadd.f32 %v11916_v57, %v5360_v25  ;;  %v11939_v29 = vpack.c.bf16 %v6204_v46, %v6203_v4 }
 0x70e   :  { %v5887_v8 = vmax.f32 %v5777_v0, 0.0  ;;  %v6150_v52 = vld [vmem:[#allocation4 + $0x22] sm:$0xff] }
 0x70f   :  { %6043 = vst [vmem:[#allocation4 + $0x38] sm:$0xff] %v5988_v11  ;;  %v5888_v19 = vmax.f32 %v5778_v3, 0.0  ;;  %v5364_v7 = vpop.f32.mrb[62].mxu1  ;;  %v6205_v33 = vmax.f32 %v5985_v31, %v6150_v52 }
 0x710   :  { %v5779_v43 = vadd.f32 %v11911_v12, %v5364_v7  ;;  %v5366_v49 = vpop.f32.mrb[63].mxu1 }
 0x711   :  { %v5989_v20 = vmax.f32 %v5887_v8, %v5888_v19  ;;  %v5780_v42 = vadd.f32 %v11916_v57, %v5366_v49 }
 0x712   :  { %v5889_v50 = vmax.f32 %v5779_v43, 0.0  ;;  %v6151_v44 = vld [vmem:[#allocation4 + $0x2a] sm:$0xff] }
 0x713   :  { %6044 = vst [vmem:[#allocation4 + $0x40] sm:$0xff] %v5989_v20  ;;  %v5890_v18 = vmax.f32 %v5780_v42, 0.0  ;;  %v5370_v28 = vpop.f32.mrb[64].mxu1  ;;  %v6206_v24 = vmax.f32 %v5986_v58, %v6151_v44 }
 0x714   :  { %v5781_v62 = vadd.f32 %v11911_v12, %v5370_v28  ;;  %v5372_v27 = vpop.f32.mrb[65].mxu1 }
 0x715   :  { %v5990_v13 = vmax.f32 %v5889_v50, %v5890_v18  ;;  %v5782_v59 = vadd.f32 %v11916_v57, %v5372_v27  ;;  %v11945_v54 = vpack.c.bf16 %v6206_v24, %v6205_v33 }
 0x716   :  { %v5891_v5 = vmax.f32 %v5781_v62, 0.0  ;;  %v6152_v21 = vld [vmem:[#allocation4 + $0x32] sm:$0xff] }
 0x717   :  { %6045 = vst [vmem:[#allocation4 + $0x48] sm:$0xff] %v5990_v13  ;;  %v5892_v30 = vmax.f32 %v5782_v59, 0.0  ;;  %v5376_v32 = vpop.f32.mrb[66].mxu1  ;;  %v6207_v56 = vmax.f32 %v5987_v35, %v6152_v21 }
 0x718   :  { %v5783_v2 = vadd.f32 %v11911_v12, %v5376_v32  ;;  %v5378_v38 = vpop.f32.mrb[67].mxu1 }
 0x719   :  { %v5991_v26 = vmax.f32 %v5891_v5, %v5892_v30  ;;  %v5784_v48 = vadd.f32 %v11916_v57, %v5378_v38 }
 0x71a   :  { %v5893_v40 = vmax.f32 %v5783_v2, 0.0  ;;  %v6153_v31 = vld [vmem:[#allocation4 + $0x3a] sm:$0xff] }
 0x71b   :  { %6046 = vst [vmem:[#allocation4 + $0x50] sm:$0xff] %v5991_v26  ;;  %v5894_v47 = vmax.f32 %v5784_v48, 0.0  ;;  %v5382_v9 = vpop.f32.mrb[68].mxu1  ;;  %v6208_v36 = vmax.f32 %v5988_v11, %v6153_v31 }
 0x71c   :  { %v5785_v60 = vadd.f32 %v11911_v12, %v5382_v9  ;;  %v5384_v53 = vpop.f32.mrb[69].mxu1 }
 0x71d   :  { %v5992_v1 = vmax.f32 %v5893_v40, %v5894_v47  ;;  %v5786_v45 = vadd.f32 %v11916_v57, %v5384_v53  ;;  %v11951_v34 = vpack.c.bf16 %v6208_v36, %v6207_v56 }
 0x71e   :  { %v5895_v58 = vmax.f32 %v5785_v60, 0.0  ;;  %v6154_v17 = vld [vmem:[#allocation4 + $0x42] sm:$0xff] }
 0x71f   :  { %6047 = vst [vmem:[#allocation4 + $0x58] sm:$0xff] %v5992_v1  ;;  %v5896_v55 = vmax.f32 %v5786_v45, 0.0  ;;  %v5388_v14 = vpop.f32.mrb[70].mxu1  ;;  %v6209_v41 = vmax.f32 %v5989_v20, %v6154_v17 }
 0x720   :  { %v5787_v6 = vadd.f32 %v11911_v12, %v5388_v14  ;;  %v5390_v16 = vpop.f32.mrb[71].mxu1 }
 0x721   :  { %v5993_v23 = vmax.f32 %v5895_v58, %v5896_v55  ;;  %v5788_v37 = vadd.f32 %v11916_v57, %v5390_v16 }
 0x722   :  { %v5897_v22 = vmax.f32 %v5787_v6, 0.0  ;;  %v6155_v35 = vld [vmem:[#allocation4 + $0x4a] sm:$0xff] }
 0x723   :  { %6048 = vst [vmem:[#allocation4 + $0x60] sm:$0xff] %v5993_v23  ;;  %v5898_v39 = vmax.f32 %v5788_v37, 0.0  ;;  %v5394_v15 = vpop.f32.mrb[72].mxu1  ;;  %v6210_v63 = vmax.f32 %v5990_v13, %v6155_v35 }
 0x724   :  { %v5789_v51 = vadd.f32 %v11911_v12, %v5394_v15  ;;  %v5396_v4 = vpop.f32.mrb[73].mxu1 }
 0x725   :  { %v5994_v46 = vmax.f32 %v5897_v22, %v5898_v39  ;;  %v5790_v0 = vadd.f32 %v11916_v57, %v5396_v4  ;;  %v11957_v25 = vpack.c.bf16 %v6210_v63, %v6209_v41 }
 0x726   :  { %v5899_v11 = vmax.f32 %v5789_v51, 0.0  ;;  %v6156_v43 = vld [vmem:[#allocation4 + $0x52] sm:$0xff] }
 0x727   :  { %6049 = vst [vmem:[#allocation4 + $0x68] sm:$0xff] %v5994_v46  ;;  %v5900_v3 = vmax.f32 %v5790_v0, 0.0  ;;  %v5400_v8 = vpop.f32.mrb[74].mxu1  ;;  %v6211_v18 = vmax.f32 %v5991_v26, %v6156_v43 }
 0x728   :  { %v5791_v19 = vadd.f32 %v11911_v12, %v5400_v8  ;;  %v5402_v7 = vpop.f32.mrb[75].mxu1 }
 0x729   :  { %v5995_v49 = vmax.f32 %v5899_v11, %v5900_v3  ;;  %v5792_v52 = vadd.f32 %v11916_v57, %v5402_v7 }
 0x72a   :  { %v5901_v20 = vmax.f32 %v5791_v19, 0.0  ;;  %v6157_v42 = vld [vmem:[#allocation4 + $0x5a] sm:$0xff] }
 0x72b   :  { %6050 = vst [vmem:[#allocation4 + $0x70] sm:$0xff] %v5995_v49  ;;  %v5902_v50 = vmax.f32 %v5792_v52, 0.0  ;;  %v5406_v44 = vpop.f32.mrb[76].mxu1  ;;  %v6212_v28 = vmax.f32 %v5992_v1, %v6157_v42 }
 0x72c   :  { %v5793_v33 = vadd.f32 %v11911_v12, %v5406_v44  ;;  %v5408_v24 = vpop.f32.mrb[77].mxu1 }
 0x72d   :  { %v5996_v62 = vmax.f32 %v5901_v20, %v5902_v50  ;;  %v5794_v27 = vadd.f32 %v11916_v57, %v5408_v24  ;;  %v11963_v13 = vpack.c.bf16 %v6212_v28, %v6211_v18 }
 0x72e   :  { %v5903_v59 = vmax.f32 %v5793_v33, 0.0  ;;  %v6158_v38 = vld [vmem:[#allocation4 + $0x62] sm:$0xff] }
 0x72f   :  { %6051 = vst [vmem:[#allocation4 + $0x78] sm:$0xff] %v5996_v62  ;;  %v5904_v5 = vmax.f32 %v5794_v27, 0.0  ;;  %v5412_v30 = vpop.f32.mrb[78].mxu1  ;;  %v6213_v9 = vmax.f32 %v5993_v23, %v6158_v38 }
 0x730   :  { %v5795_v32 = vadd.f32 %v11911_v12, %v5412_v30  ;;  %v5414_v2 = vpop.f32.mrb[79].mxu1 }
 0x731   :  { %v5997_v21 = vmax.f32 %v5903_v59, %v5904_v5  ;;  %v5796_v26 = vadd.f32 %v11916_v57, %v5414_v2 }
 0x732   :  { %v5905_v48 = vmax.f32 %v5795_v32, 0.0  ;;  %v6159_v40 = vld [vmem:[#allocation4 + $0x6a] sm:$0xff] }
 0x733   :  { %6052 = vst [vmem:[#allocation4 + $0x80] sm:$0xff] %v5997_v21  ;;  %v5906_v31 = vmax.f32 %v5796_v26, 0.0  ;;  %v5418_v47 = vpop.f32.mrb[80].mxu1  ;;  %v6214_v56 = vmax.f32 %v5994_v46, %v6159_v40 }
 0x734   :  { %v5797_v36 = vadd.f32 %v11911_v12, %v5418_v47  ;;  %v5420_v60 = vpop.f32.mrb[81].mxu1 }
 0x735   :  { %v5998_v53 = vmax.f32 %v5905_v48, %v5906_v31  ;;  %v5798_v1 = vadd.f32 %v11916_v57, %v5420_v60  ;;  %v11969_v45 = vpack.c.bf16 %v6214_v56, %v6213_v9 }
 0x736   :  { %v5907_v58 = vmax.f32 %v5797_v36, 0.0  ;;  %v6160_v17 = vld [vmem:[#allocation4 + $0x72] sm:$0xff] }
 0x737   :  { %6053 = vst [vmem:[#allocation4 + $0x88] sm:$0xff] %v5998_v53  ;;  %v5908_v55 = vmax.f32 %v5798_v1, 0.0  ;;  %v5424_v14 = vpop.f32.mrb[82].mxu1  ;;  %v6215_v41 = vmax.f32 %v5995_v49, %v6160_v17 }
 0x738   :  { %v5799_v6 = vadd.f32 %v11911_v12, %v5424_v14  ;;  %v5426_v16 = vpop.f32.mrb[83].mxu1 }
 0x739   :  { %v5999_v37 = vmax.f32 %v5907_v58, %v5908_v55  ;;  %v5800_v23 = vadd.f32 %v11916_v57, %v5426_v16 }
 0x73a   :  { %v5909_v22 = vmax.f32 %v5799_v6, 0.0  ;;  %v6161_v35 = vld [vmem:[#allocation4 + $0x7a] sm:$0xff] }
 0x73b   :  { %6054 = vst [vmem:[#allocation4 + $0x90] sm:$0xff] %v5999_v37  ;;  %v5910_v39 = vmax.f32 %v5800_v23, 0.0  ;;  %v5430_v15 = vpop.f32.mrb[84].mxu1  ;;  %v6216_v63 = vmax.f32 %v5996_v62, %v6161_v35 }
 0x73c   :  { %v5801_v51 = vadd.f32 %v11911_v12, %v5430_v15  ;;  %v5432_v4 = vpop.f32.mrb[85].mxu1 }
 0x73d   :  { %v6000_v46 = vmax.f32 %v5909_v22, %v5910_v39  ;;  %v5802_v0 = vadd.f32 %v11916_v57, %v5432_v4  ;;  %v11975_v11 = vpack.c.bf16 %v6216_v63, %v6215_v41 }
 0x73e   :  { %v5911_v3 = vmax.f32 %v5801_v51, 0.0  ;;  %v6162_v52 = vld [vmem:[#allocation4 + $0x82] sm:$0xff] }
 0x73f   :  { %6055 = vst [vmem:[#allocation4 + $0x98] sm:$0xff] %v6000_v46  ;;  %v5912_v8 = vmax.f32 %v5802_v0, 0.0  ;;  %v5436_v19 = vpop.f32.mrb[86].mxu1  ;;  %v6217_v28 = vmax.f32 %v5997_v21, %v6162_v52 }
 0x740   :  { %v5803_v7 = vadd.f32 %v11911_v12, %v5436_v19  ;;  %v5438_v43 = vpop.f32.mrb[87].mxu1 }
 0x741   :  { %v6001_v20 = vmax.f32 %v5911_v3, %v5912_v8  ;;  %v5804_v49 = vadd.f32 %v11916_v57, %v5438_v43 }
 0x742   :  { %v5913_v42 = vmax.f32 %v5803_v7, 0.0  ;;  %v6163_v50 = vld [vmem:[#allocation4 + $0x8a] sm:$0xff] }
 0x743   :  { %6056 = vst [vmem:[#allocation4 + $0xa0] sm:$0xff] %v6001_v20  ;;  %v5914_v44 = vmax.f32 %v5804_v49, 0.0  ;;  %v5442_v18 = vpop.f32.mrb[88].mxu1  ;;  %v6218_v33 = vmax.f32 %v5998_v53, %v6163_v50 }
 0x744   :  { %v5805_v24 = vadd.f32 %v11911_v12, %v5442_v18  ;;  %v5444_v62 = vpop.f32.mrb[89].mxu1 }
 0x745   :  { %v6002_v27 = vmax.f32 %v5913_v42, %v5914_v44  ;;  %v5806_v59 = vadd.f32 %v11916_v57, %v5444_v62  ;;  %v8286_v5 = vpack.c.bf16 %v6218_v33, %v6217_v28 }
 0x746   :  { %v5915_v30 = vmax.f32 %v5805_v24, 0.0  ;;  %v6164_v48 = vld [vmem:[#allocation4 + $0x92] sm:$0xff] }
 0x747   :  { %6057 = vst [vmem:[#allocation4 + $0xa8] sm:$0xff] %v6002_v27  ;;  %v5916_v32 = vmax.f32 %v5806_v59, 0.0  ;;  %v5448_v2 = vpop.f32.mrb[90].mxu1  ;;  %8287 = vmatprep.subr.bf16.mxu1 %v8286_v5  ;;  %v6219_v36 = vmax.f32 %v5999_v37, %v6164_v48 }
 0x748   :  { %v5807_v38 = vadd.f32 %v11911_v12, %v5448_v2  ;;  %v5450_v26 = vpop.f32.mrb[91].mxu1  ;;  %8289 = vmatpush3.bf16.msra.mxu1 %v11933_v61 }
 0x749   :  { %v6003_v21 = vmax.f32 %v5915_v30, %v5916_v32  ;;  %v5808_v40 = vadd.f32 %v11916_v57, %v5450_v26 }
 0x74a   :  { %v5917_v31 = vmax.f32 %v5807_v38, 0.0  ;;  %v6165_v47 = vld [vmem:[#allocation4 + $0x9a] sm:$0xff] }
 0x74b   :  { %6058 = vst [vmem:[#allocation4 + $0xb0] sm:$0xff] %v6003_v21  ;;  %v5918_v9 = vmax.f32 %v5808_v40, 0.0  ;;  %v5454_v56 = vpop.f32.mrb[92].mxu1  ;;  %v6220_v60 = vmax.f32 %v6000_v46, %v6165_v47 }
 0x74c   :  { %v5809_v53 = vadd.f32 %v11911_v12, %v5454_v56  ;;  %v5456_v1 = vpop.f32.mrb[93].mxu1 }
 0x74d   :  { %v6004_v58 = vmax.f32 %v5917_v31, %v5918_v9  ;;  %v5810_v55 = vadd.f32 %v11916_v57, %v5456_v1  ;;  %v8290_v14 = vpack.c.bf16 %v6220_v60, %v6219_v36 }
 0x74e   :  { %v5919_v6 = vmax.f32 %v5809_v53, 0.0  ;;  %v6166_v22 = vld [vmem:[#allocation4 + $0xa2] sm:$0xff] }
 0x74f   :  { %6059 = vst [vmem:[#allocation4 + $0xb8] sm:$0xff] %v6004_v58  ;;  %v5920_v61 = vmax.f32 %v5810_v55, 0.0  ;;  %v5460_v16 = vpop.f32.mrb[94].mxu1  ;;  %8291 = vmatprep.subr.bf16.mxu1 %v8290_v14  ;;  %v6221_v51 = vmax.f32 %v6001_v20, %v6166_v22 }
 0x750   :  { %v5811_v17 = vadd.f32 %v11911_v12, %v5460_v16  ;;  %v5462_v23 = vpop.f32.mrb[95].mxu1  ;;  %8293 = vmatpush3.bf16.msra.mxu1 %v11939_v29 }
 0x751   :  { %v6005_v37 = vmax.f32 %v5919_v6, %v5920_v61  ;;  %v5812_v35 = vadd.f32 %v11916_v57, %v5462_v23 }
 0x752   :  { %v5921_v39 = vmax.f32 %v5811_v17, 0.0  ;;  %v6167_v15 = vld [vmem:[#allocation4 + $0xaa] sm:$0xff] }
 0x753   :  { %6060 = vst [vmem:[#allocation4 + $0xc0] sm:$0xff] %v6005_v37  ;;  %v5922_v41 = vmax.f32 %v5812_v35, 0.0  ;;  %v5466_v63 = vpop.f32.mrb[96].mxu1  ;;  %v6222_v4 = vmax.f32 %v6002_v27, %v6167_v15 }
 0x754   :  { %v5813_v46 = vadd.f32 %v11911_v12, %v5466_v63  ;;  %v5468_v0 = vpop.f32.mrb[97].mxu1 }
 0x755   :  { %v6006_v3 = vmax.f32 %v5921_v39, %v5922_v41  ;;  %v5814_v8 = vadd.f32 %v11916_v57, %v5468_v0  ;;  %v8294_v19 = vpack.c.bf16 %v6222_v4, %v6221_v51 }
 0x756   :  { %v5923_v7 = vmax.f32 %v5813_v46, 0.0  ;;  %v6168_v42 = vld [vmem:[#allocation4 + $0xb2] sm:$0xff] }
 0x757   :  { %6061 = vst [vmem:[#allocation4 + $0xc8] sm:$0xff] %v6006_v3  ;;  %v5924_v29 = vmax.f32 %v5814_v8, 0.0  ;;  %v5472_v43 = vpop.f32.mrb[98].mxu1  ;;  %8295 = vmatprep.subr.bf16.mxu1 %v8294_v19  ;;  %v6223_v24 = vmax.f32 %v6003_v21, %v6168_v42 }
 0x758   :  { %v5815_v52 = vadd.f32 %v11911_v12, %v5472_v43  ;;  %v5474_v49 = vpop.f32.mrb[99].mxu1  ;;  %8297 = vmatpush3.bf16.msra.mxu1 %v11945_v54 }
 0x759   :  { %v6007_v20 = vmax.f32 %v5923_v7, %v5924_v29  ;;  %v5816_v50 = vadd.f32 %v11916_v57, %v5474_v49 }
 0x75a   :  { %v5925_v44 = vmax.f32 %v5815_v52, 0.0  ;;  %v6169_v18 = vld [vmem:[#allocation4 + $0xba] sm:$0xff] }
 0x75b   :  { %6062 = vst [vmem:[#allocation4 + $0xd0] sm:$0xff] %v6007_v20  ;;  %v5926_v28 = vmax.f32 %v5816_v50, 0.0  ;;  %v5478_v33 = vpop.f32.mrb[100].mxu1  ;;  %v6224_v62 = vmax.f32 %v6004_v58, %v6169_v18 }
 0x75c   :  { %v5817_v27 = vadd.f32 %v11911_v12, %v5478_v33  ;;  %v5480_v59 = vpop.f32.mrb[101].mxu1 }
 0x75d   :  { %v6008_v5 = vmax.f32 %v5925_v44, %v5926_v28  ;;  %v5818_v30 = vadd.f32 %v11916_v57, %v5480_v59  ;;  %v8298_v32 = vpack.c.bf16 %v6224_v62, %v6223_v24 }
 0x75e   :  { %v5927_v2 = vmax.f32 %v5817_v27, 0.0  ;;  %v6170_v40 = vld [vmem:[#allocation4 + $0xc2] sm:$0xff] }
 0x75f   :  { %6063 = vst [vmem:[#allocation4 + $0xd8] sm:$0xff] %v6008_v5  ;;  %v5928_v54 = vmax.f32 %v5818_v30, 0.0  ;;  %v5484_v38 = vpop.f32.mrb[102].mxu1  ;;  %8299 = vmatprep.subr.bf16.mxu1 %v8298_v32  ;;  %v6225_v60 = vmax.f32 %v6005_v37, %v6170_v40 }
 0x760   :  { %v5819_v26 = vadd.f32 %v11911_v12, %v5484_v38  ;;  %v5486_v48 = vpop.f32.mrb[103].mxu1  ;;  %8301 = vmatpush3.bf16.msra.mxu1 %v11951_v34 }
 0x761   :  { %v6009_v21 = vmax.f32 %v5927_v2, %v5928_v54  ;;  %v5820_v31 = vadd.f32 %v11916_v57, %v5486_v48 }
 0x762   :  { %v5929_v47 = vmax.f32 %v5819_v26, 0.0  ;;  %v6171_v9 = vld [vmem:[#allocation4 + $0xca] sm:$0xff] }
 0x763   :  { %6064 = vst [vmem:[#allocation4 + $0xe0] sm:$0xff] %v6009_v21  ;;  %v5930_v56 = vmax.f32 %v5820_v31, 0.0  ;;  %v5490_v36 = vpop.f32.mrb[104].mxu1  ;;  %v6226_v53 = vmax.f32 %v6006_v3, %v6171_v9 }
 0x764   :  { %v5821_v1 = vadd.f32 %v11911_v12, %v5490_v36  ;;  %v5492_v58 = vpop.f32.mrb[105].mxu1 }
 0x765   :  { %v6010_v55 = vmax.f32 %v5929_v47, %v5930_v56  ;;  %v5822_v14 = vadd.f32 %v11916_v57, %v5492_v58  ;;  %v8302_v6 = vpack.c.bf16 %v6226_v53, %v6225_v60 }
 0x766   :  { %v5931_v61 = vmax.f32 %v5821_v1, 0.0  ;;  %v6172_v22 = vld [vmem:[#allocation4 + $0xd2] sm:$0xff] }
 0x767   :  { %6065 = vst [vmem:[#allocation4 + $0xe8] sm:$0xff] %v6010_v55  ;;  %v5932_v34 = vmax.f32 %v5822_v14, 0.0  ;;  %v5496_v16 = vpop.f32.mrb[106].mxu1  ;;  %8303 = vmatprep.subr.bf16.mxu1 %v8302_v6  ;;  %v6227_v51 = vmax.f32 %v6007_v20, %v6172_v22 }
 0x768   :  { %v5823_v17 = vadd.f32 %v11911_v12, %v5496_v16  ;;  %v5498_v23 = vpop.f32.mrb[107].mxu1  ;;  %8305 = vmatpush3.bf16.msra.mxu1 %v11957_v25  ;;  %v6256_v16 = vld [vmem:[#allocation5] sm:$0xff] }
 0x769   :  { %v6011_v37 = vmax.f32 %v5931_v61, %v5932_v34  ;;  %v5824_v35 = vadd.f32 %v11916_v57, %v5498_v23 }
 0x76a   :  { %v5933_v39 = vmax.f32 %v5823_v17, 0.0  ;;  %v6173_v15 = vld [vmem:[#allocation4 + $0xda] sm:$0xff] }
 0x76b   :  { %6066 = vst [vmem:[#allocation4 + $0xf0] sm:$0xff] %v6011_v37  ;;  %v5934_v41 = vmax.f32 %v5824_v35, 0.0  ;;  %v5502_v63 = vpop.f32.mrb[108].mxu1  ;;  %v6228_v4 = vmax.f32 %v6008_v5, %v6173_v15  ;;  %v6261_v35 = vld [vmem:[#allocation5 + $0x28] sm:$0xff] }
 0x76c   :  { %v5825_v46 = vadd.f32 %v11911_v12, %v5502_v63  ;;  %v5504_v0 = vpop.f32.mrb[109].mxu1 }
 0x76d   :  { %v6012_v3 = vmax.f32 %v5933_v39, %v5934_v41  ;;  %v5826_v8 = vadd.f32 %v11916_v57, %v5504_v0  ;;  %v8306_v19 = vpack.c.bf16 %v6228_v4, %v6227_v51 }
 0x76e   :  { %v5935_v7 = vmax.f32 %v5825_v46, 0.0  ;;  %v6174_v49 = vld [vmem:[#allocation4 + $0xe2] sm:$0xff] }
 0x76f   :  { %6067 = vst [vmem:[#allocation4 + $0xf8] sm:$0xff] %v6012_v3  ;;  %v5936_v25 = vmax.f32 %v5826_v8, 0.0  ;;  %v5508_v29 = vpop.f32.mrb[110].mxu1  ;;  %8307 = vmatprep.subr.bf16.mxu1 %v8306_v19  ;;  %v6229_v33 = vmax.f32 %v6009_v21, %v6174_v49  ;;  %v6260_v19 = vld [vmem:[#allocation5 + $0x20] sm:$0xff] }
 0x770   :  { %v5827_v43 = vadd.f32 %v11911_v12, %v5508_v29  ;;  %v5510_v52 = vpop.f32.mrb[111].mxu1  ;;  %8309 = vmatpush3.bf16.msra.mxu1 %v11963_v13 }
 0x771   :  { %v12008_v42 = vmax.f32 %v5935_v7, %v5936_v25  ;;  %v5828_v20 = vadd.f32 %v11916_v57, %v5510_v52  ;;  %v6265_v25 = vld [vmem:[#allocation5 + $0x48] sm:$0xff] }
 0x772   :  { %v5937_v50 = vmax.f32 %v5827_v43, 0.0  ;;  %v6175_v44 = vld [vmem:[#allocation4 + $0xea] sm:$0xff] }
 0x773   :  { %6068 = vst [vmem:[#allocation4 + $0x100] sm:$0xff] %v12008_v42  ;;  %v5938_v18 = vmax.f32 %v5828_v20, 0.0  ;;  %v5514_v28 = vpop.f32.mrb[112].mxu1  ;;  %v6230_v24 = vmax.f32 %v6010_v55, %v6175_v44  ;;  %v6264_v44 = vld [vmem:[#allocation5 + $0x40] sm:$0xff] }
 0x774   :  { %v5829_v62 = vadd.f32 %v11911_v12, %v5514_v28  ;;  %v5516_v27 = vpop.f32.mrb[113].mxu1 }
 0x775   :  { %v6014_v59 = vmax.f32 %v5937_v50, %v5938_v18  ;;  %v5830_v5 = vadd.f32 %v11916_v57, %v5516_v27  ;;  %v8310_v13 = vpack.c.bf16 %v6230_v24, %v6229_v33  ;;  %v6269_v33 = vld [vmem:[#allocation5 + $0x68] sm:$0xff] }
 0x776   :  { %v5939_v30 = vmax.f32 %v5829_v62, 0.0  ;;  %v6176_v26 = vld [vmem:[#allocation4 + $0xf2] sm:$0xff] }
 0x777   :  { %6069 = vst [vmem:[#allocation4 + $0x108] sm:$0xff] %v6014_v59  ;;  %v5940_v32 = vmax.f32 %v5830_v5, 0.0  ;;  %v5520_v2 = vpop.f32.mrb[114].mxu1  ;;  %8311 = vmatprep.subr.bf16.mxu1 %v8310_v13  ;;  %v6231_v56 = vmax.f32 %v6011_v37, %v6176_v26  ;;  %v9344_v37 = vmov 0.0|0.0   ;;  %v6273_v26 = vld [vmem:[#allocation5 + $0x88] sm:$0xff] }
 0x778   :  { %v5831_v54 = vadd.f32 %v11911_v12, %v5520_v2  ;;  %v5522_v38 = vpop.f32.mrb[115].mxu1  ;;  %8313 = vmatpush3.bf16.msra.mxu1 %v11969_v45 }
 0x779   :  { %v12016_v48 = vmax.f32 %v5939_v30, %v5940_v32  ;;  %v5832_v40 = vadd.f32 %v11916_v57, %v5522_v38 }
 0x77a   :  { %v5941_v21 = vmax.f32 %v5831_v54, 0.0  ;;  %v6177_v31 = vld [vmem:[#allocation4 + $0xfa] sm:$0xff] }
 0x77b   :  { %6070 = vst [vmem:[#allocation4 + $0x110] sm:$0xff] %v12016_v48  ;;  %v5942_v47 = vmax.f32 %v5832_v40, 0.0  ;;  %v5526_v9 = vpop.f32.mrb[116].mxu1  ;;  %v6232_v36 = vmax.f32 %v6012_v3, %v6177_v31  ;;  %v6268_v54 = vld [vmem:[#allocation5 + $0x60] sm:$0xff] }
 0x77c   :  { %v5833_v60 = vadd.f32 %v11911_v12, %v5526_v9  ;;  %v5528_v53 = vpop.f32.mrb[117].mxu1 }
 0x77d   :  { %v6016_v1 = vmax.f32 %v5941_v21, %v5942_v47  ;;  %v5834_v58 = vadd.f32 %v11916_v57, %v5528_v53  ;;  %v8314_v45 = vpack.c.bf16 %v6232_v36, %v6231_v56  ;;  %v6272_v36 = vld [vmem:[#allocation5 + $0x80] sm:$0xff] }
 0x77e   :  { %v5943_v55 = vmax.f32 %v5833_v60, 0.0  ;;  %v6178_v17 = vld [vmem:[#allocation4 + $0x102] sm:$0xff] }
 0x77f   :  { %6071 = vst [vmem:[#allocation4 + $0x118] sm:$0xff] %v6016_v1  ;;  %v5944_v14 = vmax.f32 %v5834_v58, 0.0  ;;  %v5532_v6 = vpop.f32.mrb[118].mxu1  ;;  %8315 = vmatprep.subr.bf16.mxu1 %v8314_v45  ;;  %v6233_v51 = vmax.f32 %v12008_v42, %v6178_v17 }
 0x780   :  { %v5835_v61 = vadd.f32 %v11911_v12, %v5532_v6  ;;  %v5534_v34 = vpop.f32.mrb[119].mxu1  ;;  %8317 = vmatpush3.bf16.msra.mxu1 %v11975_v11 }
 0x781   :  { %v12024_v23 = vmax.f32 %v5943_v55, %v5944_v14  ;;  %v5836_v22 = vadd.f32 %v11916_v57, %v5534_v34  ;;  %8318 = vmatprep.subr.bf16.mxu1 %v9344_v37 }
 0x782   :  { %v5945_v39 = vmax.f32 %v5835_v61, 0.0  ;;  %v6179_v15 = vld [vmem:[#allocation4 + $0x10a] sm:$0xff] }
 0x783   :  { %6072 = vst [vmem:[#allocation4 + $0x120] sm:$0xff] %v12024_v23  ;;  %v5946_v41 = vmax.f32 %v5836_v22, 0.0  ;;  %v5538_v63 = vpop.f32.mrb[120].mxu1  ;;  %6396 = vmatmul.mubr.f32.vlgmr.msra.gmra.mrb[154].mxu1 %v6256_v16  ;;  %v6234_v11 = vmax.f32 %v6014_v59, %v6179_v15  ;;  %v6276_v22 = vld [vmem:[#allocation5 + $0xa0] sm:$0xff] }
 0x784   :  { %v5837_v4 = vadd.f32 %v11911_v12, %v5538_v63  ;;  %v5540_v46 = vpop.f32.mrb[121].mxu1  ;;  %6400 = vmatprep.mubr.f32.mxu1 %v6261_v35 }
 0x785   :  { %v12031_v0 = vmax.f32 %v5945_v39, %v5946_v41  ;;  %v5838_v3 = vadd.f32 %v11916_v57, %v5540_v46  ;;  %v8319_v8 = vpack.c.bf16 %v6234_v11, %v6233_v51  ;;  %v6281_v39 = vld [vmem:[#allocation5 + $0xc8] sm:$0xff]  ;;  %v6280_v46 = vld [vmem:[#allocation5 + $0xc0] sm:$0xff] }
 0x786   :  { %v5947_v7 = vmax.f32 %v5837_v4, 0.0  ;;  %v6180_v42 = vld [vmem:[#allocation4 + $0x112] sm:$0xff] }
 0x787   :  { %6073 = vst [vmem:[#allocation4 + $0x128] sm:$0xff] %v12031_v0  ;;  %v5948_v29 = vmax.f32 %v5838_v3, 0.0  ;;  %v5544_v43 = vpop.f32.mrb[122].mxu1  ;;  %8320 = vmatpush1.bf16.msra.mxu1 %v8319_v8  ;;  %v6235_v27 = vmax.f32 %v12016_v48, %v6180_v42  ;;  %v6285_v8 = vld [vmem:[#allocation5 + $0xe8] sm:$0xff] }
 0x788   :  { %v5839_v52 = vadd.f32 %v11911_v12, %v5544_v43  ;;  %v5546_v49 = vpop.f32.mrb[123].mxu1  ;;  %8321 = vmatprep.subr.bf16.mxu1 %v9344_v37  ;;  %6401 = vmatmul.mubr.f32.gmra.mrb[156].mxu1 %v6260_v19 }
 0x789   :  { %v12037_v20 = vmax.f32 %v5947_v7, %v5948_v29  ;;  %v5840_v50 = vadd.f32 %v11916_v57, %v5546_v49  ;;  %6405 = vmatprep.mubr.f32.mxu1 %v6265_v25 }
 0x78a   :  { %v5949_v18 = vmax.f32 %v5839_v52, 0.0  ;;  %v6181_v28 = vld [vmem:[#allocation4 + $0x11a] sm:$0xff] }
 0x78b   :  { %6074 = vst [vmem:[#allocation4 + $0x130] sm:$0xff] %v12037_v20  ;;  %v5950_v24 = vmax.f32 %v5840_v50, 0.0  ;;  %v5550_v62 = vpop.f32.mrb[124].mxu1  ;;  %v6236_v59 = vmax.f32 %v6016_v1, %v6181_v28  ;;  %v6277_v1 = vld [vmem:[#allocation5 + $0xa8] sm:$0xff] }
 0x78c   :  { %v5841_v5 = vadd.f32 %v11911_v12, %v5550_v62  ;;  %v5552_v13 = vpop.f32.mrb[125].mxu1  ;;  %6406 = vmatmul.mubr.f32.gmra.mrb[158].mxu1 %v6264_v44  ;;  %v6284_v44 = vld [vmem:[#allocation5 + $0xe0] sm:$0xff]  ;;  %v6289_v28 = vld [vmem:[#allocation5 + $0x108] sm:$0xff] }
 0x78d   :  { %v12043_v30 = vmax.f32 %v5949_v18, %v5950_v24  ;;  %v5842_v32 = vadd.f32 %v11916_v57, %v5552_v13  ;;  %v8322_v2 = vpack.c.bf16 %v6236_v59, %v6235_v27  ;;  %6410 = vmatprep.mubr.f32.mxu1 %v6269_v33  ;;  %v6288_v13 = vld [vmem:[#allocation5 + $0x100] sm:$0xff] }
 0x78e   :  { %v5951_v38 = vmax.f32 %v5841_v5, 0.0  ;;  %v6182_v47 = vld [vmem:[#allocation4 + $0x122] sm:$0xff] }
 0x78f   :  { %6075 = vst [vmem:[#allocation4 + $0x138] sm:$0xff] %v12043_v30  ;;  %v5952_v40 = vmax.f32 %v5842_v32, 0.0  ;;  %v5556_v21 = vpop.f32.mrb[126].mxu1  ;;  %8323 = vmatpush1.bf16.msra.mxu1 %v8322_v2  ;;  %v6237_v55 = vmax.f32 %v12024_v23, %v6182_v47  ;;  %v6293_v2 = vld [vmem:[#allocation5 + $0x128] sm:$0xff] }
 0x790   :  { %v5843_v48 = vadd.f32 %v11911_v12, %v5556_v21  ;;  %v5558_v31 = vpop.f32.mrb[127].mxu1  ;;  %8324 = vmatprep.subr.bf16.mxu1 %v9344_v37  ;;  %6411 = vmatmul.mubr.f32.gmra.mrb[160].mxu1 %v6268_v54 }
 0x791   :  { %v12049_v9 = vmax.f32 %v5951_v38, %v5952_v40  ;;  %v5844_v56 = vadd.f32 %v11916_v57, %v5558_v31  ;;  %6415 = vmatprep.mubr.f32.mxu1 %v6273_v26 }
 0x792   :  { %v5953_v60 = vmax.f32 %v5843_v48, 0.0  ;;  %v6183_v53 = vld [vmem:[#allocation4 + $0x12a] sm:$0xff] }
 0x793   :  { %6076 = vst [vmem:[#allocation4 + $0x140] sm:$0xff] %v12049_v9  ;;  %v5954_v58 = vmax.f32 %v5844_v56, 0.0  ;;  %v5562_v45 = vpop.f32.mrb[128].mxu1  ;;  %v6238_v14 = vmax.f32 %v12031_v0, %v6183_v53  ;;  %v6259_v53 = vld [vmem:[#allocation5 + $0x18] sm:$0xff] }
 0x794   :  { %v5845_v6 = vadd.f32 %v11911_v12, %v5562_v45  ;;  %v5564_v61 = vpop.f32.mrb[129].mxu1  ;;  %6416 = vmatmul.mubr.f32.gmra.mrb[162].mxu1 %v6272_v36  ;;  %v6292_v36 = vld [vmem:[#allocation5 + $0x120] sm:$0xff] }
 0x795   :  { %v12056_v34 = vmax.f32 %v5953_v60, %v5954_v58  ;;  %v5846_v16 = vadd.f32 %v11916_v57, %v5564_v61  ;;  %v8325_v17 = vpack.c.bf16 %v6238_v14, %v6237_v55  ;;  %6420 = vmatprep.mubr.f32.mxu1 %v6277_v1 }
 0x796   :  { %v5955_v35 = vmax.f32 %v5845_v6, 0.0  ;;  %v6184_v51 = vld [vmem:[#allocation4 + $0x132] sm:$0xff] }
 0x797   :  { %6077 = vst [vmem:[#allocation4 + $0x148] sm:$0xff] %v12056_v34  ;;  %v5956_v15 = vmax.f32 %v5846_v16, 0.0  ;;  %v5568_v41 = vpop.f32.mrb[130].mxu1  ;;  %8326 = vmatpush1.bf16.msra.mxu1 %v8325_v17  ;;  %v6239_v25 = vmax.f32 %v12037_v20, %v6184_v51 }
 0x798   :  { %v5847_v23 = vadd.f32 %v11911_v12, %v5568_v41  ;;  %v5570_v63 = vpop.f32.mrb[131].mxu1  ;;  %8327 = vmatprep.subr.bf16.mxu1 %v9344_v37  ;;  %6421 = vmatmul.mubr.f32.gmra.mrb[164].mxu1 %v6276_v22 }
 0x799   :  { %v12062_v11 = vmax.f32 %v5955_v35, %v5956_v15  ;;  %v5848_v4 = vadd.f32 %v11916_v57, %v5570_v63  ;;  %6425 = vmatprep.mubr.f32.mxu1 %v6281_v39 }
 0x79a   :  { %v5957_v0 = vmax.f32 %v5847_v23, 0.0  ;;  %v6185_v3 = vld [vmem:[#allocation4 + $0x13a] sm:$0xff] }
 0x79b   :  { %6078 = vst [vmem:[#allocation4 + $0x150] sm:$0xff] %v12062_v11  ;;  %v5958_v19 = vmax.f32 %v5848_v4, 0.0  ;;  %v5574_v7 = vpop.f32.mrb[132].mxu1  ;;  %v6240_v29 = vmax.f32 %v12043_v30, %v6185_v3 }
 0x79c   :  { %v5849_v43 = vadd.f32 %v11911_v12, %v5574_v7  ;;  %v5576_v52 = vpop.f32.mrb[133].mxu1  ;;  %6426 = vmatmul.mubr.f32.gmra.mrb[166].mxu1 %v6280_v46 }
 0x79d   :  { %v12069_v49 = vmax.f32 %v5957_v0, %v5958_v19  ;;  %v5850_v42 = vadd.f32 %v11916_v57, %v5576_v52  ;;  %v8328_v50 = vpack.c.bf16 %v6240_v29, %v6239_v25  ;;  %6430 = vmatprep.mubr.f32.mxu1 %v6285_v8 }
 0x79e   :  { %v5959_v18 = vmax.f32 %v5849_v43, 0.0  ;;  %v6186_v27 = vld [vmem:[#allocation4 + $0x142] sm:$0xff] }
 0x79f   :  { %6079 = vst [vmem:[#allocation4 + $0x158] sm:$0xff] %v12069_v49  ;;  %v5960_v33 = vmax.f32 %v5850_v42, 0.0  ;;  %v5580_v24 = vpop.f32.mrb[134].mxu1  ;;  %8329 = vmatpush1.bf16.msra.mxu1 %v8328_v50  ;;  %v6241_v26 = vmax.f32 %v12049_v9, %v6186_v27 }
 0x7a0   :  { %v5851_v20 = vadd.f32 %v11911_v12, %v5580_v24  ;;  %v5582_v62 = vpop.f32.mrb[135].mxu1  ;;  %8330 = vmatprep.subr.bf16.mxu1 %v9344_v37  ;;  %6431 = vmatmul.mubr.f32.gmra.mrb[168].mxu1 %v6284_v44 }
 0x7a1   :  { %v12075_v59 = vmax.f32 %v5959_v18, %v5960_v33  ;;  %v5852_v5 = vadd.f32 %v11916_v57, %v5582_v62  ;;  %6435 = vmatprep.mubr.f32.mxu1 %v6289_v28 }
 0x7a2   :  { %v5961_v30 = vmax.f32 %v5851_v20, 0.0  ;;  %v6187_v32 = vld [vmem:[#allocation4 + $0x14a] sm:$0xff] }
 0x7a3   :  { %6080 = vst [vmem:[#allocation4 + $0x160] sm:$0xff] %v12075_v59  ;;  %v5962_v54 = vmax.f32 %v5852_v5, 0.0  ;;  %v5586_v38 = vpop.f32.mrb[136].mxu1  ;;  %v6242_v40 = vmax.f32 %v12056_v34, %v6187_v32 }
 0x7a4   :  { %v5853_v21 = vadd.f32 %v11911_v12, %v5586_v38  ;;  %v5588_v48 = vpop.f32.mrb[137].mxu1  ;;  %6436 = vmatmul.mubr.f32.gmra.mrb[170].mxu1 %v6288_v13 }
 0x7a5   :  { %v6026_v31 = vmax.f32 %v5961_v30, %v5962_v54  ;;  %v5854_v47 = vadd.f32 %v11916_v57, %v5588_v48  ;;  %v8331_v56 = vpack.c.bf16 %v6242_v40, %v6241_v26  ;;  %6440 = vmatprep.mubr.f32.mxu1 %v6293_v2 }
 0x7a6   :  { %v5963_v60 = vmax.f32 %v5853_v21, 0.0  ;;  %v6188_v55 = vld [vmem:[#allocation4 + $0x152] sm:$0xff] }
 0x7a7   :  { %6081 = vst [vmem:[#allocation4 + $0x168] sm:$0xff] %v6026_v31  ;;  %v5964_v1 = vmax.f32 %v5854_v47, 0.0  ;;  %v5592_v58 = vpop.f32.mrb[138].mxu1  ;;  %8332 = vmatpush1.bf16.msra.mxu1 %v8331_v56  ;;  %v6243_v22 = vmax.f32 %v12062_v11, %v6188_v55 }
 0x7a8   :  { %v5855_v9 = vadd.f32 %v11911_v12, %v5592_v58  ;;  %v5594_v45 = vpop.f32.mrb[139].mxu1  ;;  %8333 = vmatprep.subr.bf16.mxu1 %v9344_v37  ;;  %6441 = vmatmul.mubr.f32.gmra.mrb[172].mxu1 %v6292_v36 }
 0x7a9   :  { %v6027_v14 = vmax.f32 %v5963_v60, %v5964_v1  ;;  %v5856_v6 = vadd.f32 %v11916_v57, %v5594_v45  ;;  %7630 = vmatprep.mubr.msk.f32.mxu1 %vm6296_vm4, %v6259_v53 }
 0x7aa   :  { %v5965_v61 = vmax.f32 %v5855_v9, 0.0  ;;  %v6189_v34 = vld [vmem:[#allocation4 + $0x15a] sm:$0xff] }
 0x7ab   :  { %6082 = vst [vmem:[#allocation4 + $0x170] sm:$0xff] %v6027_v14  ;;  %v5966_v16 = vmax.f32 %v5856_v6, 0.0  ;;  %v5598_v17 = vpop.f32.mrb[140].mxu1  ;;  %v6244_v35 = vmax.f32 %v12069_v49, %v6189_v34 }
 0x7ac   :  { %v5857_v39 = vadd.f32 %v11911_v12, %v5598_v17  ;;  %v5600_v15 = vpop.f32.mrb[141].mxu1 }
 0x7ad   :  { %v6028_v41 = vmax.f32 %v5965_v61, %v5966_v16  ;;  %v5858_v23 = vadd.f32 %v11916_v57, %v5600_v15  ;;  %v8334_v63 = vpack.c.bf16 %v6244_v35, %v6243_v22 }
 0x7ae   :  { %v5967_v51 = vmax.f32 %v5857_v39, 0.0  ;;  %v6190_v11 = vld [vmem:[#allocation4 + $0x162] sm:$0xff] }
 0x7af   :  { %6083 = vst [vmem:[#allocation4 + $0x178] sm:$0xff] %v6028_v41  ;;  %v5968_v4 = vmax.f32 %v5858_v23, 0.0  ;;  %v5604_v46 = vpop.f32.mrb[142].mxu1  ;;  %8335 = vmatpush1.bf16.msra.mxu1 %v8334_v63  ;;  %v6245_v52 = vmax.f32 %v12075_v59, %v6190_v11 }
 0x7b0   :  { %v5859_v0 = vadd.f32 %v11911_v12, %v5604_v46  ;;  %v5606_v3 = vpop.f32.mrb[143].mxu1  ;;  %8336 = vmatprep.subr.bf16.mxu1 %v9344_v37 }
 0x7b1   :  { %v6029_v8 = vmax.f32 %v5967_v51, %v5968_v4  ;;  %v5860_v19 = vadd.f32 %v11916_v57, %v5606_v3 }
 0x7b2   :  { %v5969_v7 = vmax.f32 %v5859_v0, 0.0  ;;  %v6191_v25 = vld [vmem:[#allocation4 + $0x16a] sm:$0xff] }
 0x7b3   :  { %6084 = vst [vmem:[#allocation4 + $0x180] sm:$0xff] %v6029_v8  ;;  %v5970_v29 = vmax.f32 %v5860_v19, 0.0  ;;  %v5610_v43 = vpop.f32.mrb[144].mxu1  ;;  %v6246_v49 = vmax.f32 %v6026_v31, %v6191_v25  ;;  %v7641_v25 = vld [vmem:[%s12401_s6 + $0x88] sm:$0xff] }
 0x7b4   :  { %v5861_v42 = vadd.f32 %v11911_v12, %v5610_v43  ;;  %v5612_v50 = vpop.f32.mrb[145].mxu1 }
 0x7b5   :  { %v6030_v44 = vmax.f32 %v5969_v7, %v5970_v29  ;;  %v5862_v18 = vadd.f32 %v11916_v57, %v5612_v50  ;;  %v8337_v28 = vpack.c.bf16 %v6246_v49, %v6245_v52  ;;  %v7640_v7 = vld [vmem:[%s12401_s6 + $0x80] sm:$0xff]  ;;  %v7643_v52 = vld [vmem:[%s12401_s6 + $0x98] sm:$0xff]  ;;  %v6258_v50 = vld [vmem:[#allocation5 + $0x10] sm:$0xff] }
 0x7b6   :  { %v5971_v33 = vmax.f32 %v5861_v42, 0.0  ;;  %v6192_v5 = vld [vmem:[#allocation4 + $0x172] sm:$0xff]  ;;  %v8351_v49 = vpack.c.bf16 %v7641_v25, %v7640_v7 }
 0x7b7   :  { %6085 = vst [vmem:[#allocation4 + $0x188] sm:$0xff] %v6030_v44  ;;  %v5972_v24 = vmax.f32 %v5862_v18, 0.0  ;;  %v5616_v20 = vpop.f32.mrb[146].mxu1  ;;  %8338 = vmatpush1.bf16.msra.mxu1 %v8337_v28  ;;  %v6247_v38 = vmax.f32 %v6027_v14, %v6192_v5  ;;  %v6262_v28 = vld [vmem:[#allocation5 + $0x30] sm:$0xff] }
 0x7b8   :  { %v5863_v62 = vadd.f32 %v11911_v12, %v5616_v20  ;;  %v5618_v27 = vpop.f32.mrb[147].mxu1  ;;  %8339 = vmatprep.subr.bf16.mxu1 %v9344_v37  ;;  %v6270_v5 = vld [vmem:[#allocation5 + $0x70] sm:$0xff] }
 0x7b9   :  { %v6031_v59 = vmax.f32 %v5971_v33, %v5972_v24  ;;  %v5864_v13 = vadd.f32 %v11916_v57, %v5618_v27  ;;  %v6267_v33 = vld [vmem:[#allocation5 + $0x58] sm:$0xff]  ;;  %v7644_v24 = vld [vmem:[%s12401_s6 + $0xa0] sm:$0xff] }
 0x7ba   :  { %v5973_v30 = vmax.f32 %v5863_v62, 0.0  ;;  %v6193_v32 = vld [vmem:[#allocation4 + $0x17a] sm:$0xff]  ;;  %v6266_v62 = vld [vmem:[#allocation5 + $0x50] sm:$0xff]  ;;  %v6271_v27 = vld [vmem:[#allocation5 + $0x78] sm:$0xff] }
 0x7bb   :  { %6086 = vst [vmem:[#allocation4 + $0x190] sm:$0xff] %v6031_v59  ;;  %v5974_v2 = vmax.f32 %v5864_v13, 0.0  ;;  %v5622_v54 = vpop.f32.mrb[148].mxu1  ;;  %v6248_v26 = vmax.f32 %v6028_v41, %v6193_v32  ;;  %v7646_v13 = vld [vmem:[%s12401_s6 + $0xb0] sm:$0xff] }
 0x7bc   :  { %v5865_v40 = vadd.f32 %v11911_v12, %v5622_v54  ;;  %v5624_v21 = vpop.f32.mrb[149].mxu1  ;;  %v6279_v54 = vld [vmem:[#allocation5 + $0xb8] sm:$0xff] }
 0x7bd   :  { %v6032_v48 = vmax.f32 %v5973_v30, %v5974_v2  ;;  %v5866_v31 = vadd.f32 %v11916_v57, %v5624_v21  ;;  %v8340_v47 = vpack.c.bf16 %v6248_v26, %v6247_v38  ;;  %v7647_v30 = vld [vmem:[%s12401_s6 + $0xb8] sm:$0xff]  ;;  %v6274_v2 = vld [vmem:[#allocation5 + $0x90] sm:$0xff]  ;;  %v6283_v26 = vld [vmem:[#allocation5 + $0xd8] sm:$0xff] }
 0x7be   :  { %v5975_v56 = vmax.f32 %v5865_v40, 0.0  ;;  %v6194_v58 = vld [vmem:[#allocation4 + $0x182] sm:$0xff]  ;;  %v8363_v32 = vpack.c.bf16 %v7647_v30, %v7646_v13 }
 0x7bf   :  { %6087 = vst [vmem:[#allocation4 + $0x198] sm:$0xff] %v6032_v48  ;;  %v5976_v36 = vmax.f32 %v5866_v31, 0.0  ;;  %v5628_v60 = vpop.f32.mrb[150].mxu1  ;;  %8341 = vmatpush1.bf16.msra.mxu1 %v8340_v47  ;;  %v6249_v34 = vmax.f32 %v6029_v8, %v6194_v58  ;;  %v6278_v38 = vld [vmem:[#allocation5 + $0xb0] sm:$0xff]  ;;  %v7648_v40 = vld [vmem:[%s12401_s6 + $0xc0] sm:$0xff]  ;;  %v6287_v47 = vld [vmem:[#allocation5 + $0xf8] sm:$0xff] }
 0x7c0   :  { %v5867_v53 = vadd.f32 %v11911_v12, %v5628_v60  ;;  %v5630_v1 = vpop.f32.mrb[151].mxu1  ;;  %8342 = vmatprep.subr.bf16.mxu1 %v9344_v37  ;;  %v7649_v21 = vld [vmem:[%s12401_s6 + $0xc8] sm:$0xff]  ;;  %v7650_v60 = vld [vmem:[%s12401_s6 + $0xd0] sm:$0xff] }
 0x7c1   :  { %v6033_v9 = vmax.f32 %v5975_v56, %v5976_v36  ;;  %v5868_v45 = vadd.f32 %v11916_v57, %v5630_v1  ;;  %v6282_v31 = vld [vmem:[#allocation5 + $0xd0] sm:$0xff]  ;;  %v6291_v36 = vld [vmem:[#allocation5 + $0x118] sm:$0xff] }
 0x7c2   :  { %v5977_v55 = vmax.f32 %v5867_v53, 0.0  ;;  %v6195_v14 = vld [vmem:[#allocation4 + $0x18a] sm:$0xff]  ;;  %v7651_v53 = vld [vmem:[%s12401_s6 + $0xd8] sm:$0xff] }
 0x7c3   :  { %6088 = vst [vmem:[#allocation4 + $0x1a0] sm:$0xff] %v6033_v9  ;;  %v5978_v6 = vmax.f32 %v5868_v45, 0.0  ;;  %v5634_v61 = vpop.f32.mrb[152].mxu1  ;;  %v6250_v16 = vmax.f32 %v6030_v44, %v6195_v14  ;;  %v6263_v44 = vld [vmem:[#allocation5 + $0x38] sm:$0xff]  ;;  %v6286_v56 = vld [vmem:[#allocation5 + $0xf0] sm:$0xff]  ;;  %v8371_v1 = vpack.c.bf16 %v7651_v53, %v7650_v60 }
 0x7c4   :  { %v5869_v17 = vadd.f32 %v11911_v12, %v5634_v61  ;;  %v5636_v22 = vpop.f32.mrb[153].mxu1  ;;  %v6290_v58 = vld [vmem:[#allocation5 + $0x110] sm:$0xff]  ;;  %v7654_v61 = vld [vmem:[%s12401_s6 + $0xf0] sm:$0xff] }
 0x7c5   :  { %v6034_v35 = vmax.f32 %v5977_v55, %v5978_v6  ;;  %v5870_v39 = vadd.f32 %v11916_v57, %v5636_v22  ;;  %v8343_v15 = vpack.c.bf16 %v6250_v16, %v6249_v34  ;;  %v6294_v45 = vld [vmem:[#allocation5 + $0x130] sm:$0xff]  ;;  %v7652_v55 = vld [vmem:[%s12401_s6 + $0xe0] sm:$0xff]  ;;  %v7655_v34 = vld [vmem:[%s12401_s6 + $0xf8] sm:$0xff] }
 0x7c6   :  { %v5979_v41 = vmax.f32 %v5869_v17, 0.0  ;;  %v6196_v63 = vld [vmem:[#allocation4 + $0x192] sm:$0xff]  ;;  %v7653_v14 = vld [vmem:[%s12401_s6 + $0xe8] sm:$0xff]  ;;  %v8379_v16 = vpack.c.bf16 %v7655_v34, %v7654_v61  ;;  %v6561_v17 = vld [vmem:[%s12401_s6] sm:$0xff] }
 0x7c7   :  { %6089 = vst [vmem:[#allocation4 + $0x1a8] sm:$0xff] %v6034_v35  ;;  %v5980_v23 = vmax.f32 %v5870_v39, 0.0  ;;  %8344 = vmatpush1.bf16.msra.mxu1 %v8343_v15  ;;  %v6251_v46 = vmax.f32 %v6031_v59, %v6196_v63  ;;  %v6275_v59 = vld [vmem:[#allocation5 + $0x98] sm:$0xff]  ;;  %v8375_v6 = vpack.c.bf16 %v7653_v14, %v7652_v55  ;;  %v6562_v22 = vld [vmem:[%s12401_s6 + $0x8] sm:$0xff] }
 0x7c8   :  { %8345 = vmatprep.subr.bf16.mxu1 %v9344_v37  ;;  %v6570_v61 = vld [vmem:[%s12401_s6 + $0x48] sm:$0xff] }
 0x7c9   :  { %v6035_v51 = vmax.f32 %v5979_v41, %v5980_v23 }
 0x7ca   :  { %v6197_v4 = vld [vmem:[#allocation4 + $0x19a] sm:$0xff] }
 0x7cb   :  { %6090 = vst [vmem:[#allocation4 + $0x1b0] sm:$0x7f] %v6035_v51  ;;  %v6252_v0 = vmax.f32 %v6032_v48, %v6197_v4  ;;  %v8367_v48 = vpack.c.bf16 %v7649_v21, %v7648_v40 }
 0x7cd   :  { %v8346_v3 = vpack.c.bf16 %v6252_v0, %v6251_v46 }
 0x7ce   :  { %v6198_v12 = vld [vmem:[#allocation4 + $0x1a2] sm:$0xff] }
 0x7cf   :  { %8347 = vmatpush1.bf16.msra.mxu1 %v8346_v3  ;;  %v6253_v57 = vmax.f32 %v6033_v9, %v6198_v12  ;;  %v6295_v9 = vld [vmem:[#allocation5 + $0x138] sm:$0xff] }
 0x7d0   :  { %8348 = vmatprep.subr.bf16.mxu1 %v9344_v37  ;;  %v7642_v37 = vld [vmem:[%s12401_s6 + $0x90] sm:$0xff] }
 0x7d1   :  { %v8355_v18 = vpack.c.bf16 %v7643_v52, %v7642_v37 }
 0x7d2   :  { %v6199_v11 = vld [vmem:[#allocation4 + $0x1aa] sm:$0xff]  ;;  %v6200_v43 = vld [vmem:[#allocation4 + $0x1b2] sm:$0x1f] }
 0x7d3   :  { %v6254_v8 = vmax.f32 %v6034_v35, %v6199_v11  ;;  %v6145_v29 = vld [vmem:[#allocation4 + $0x1b0] sm:$0x1f]  ;;  %v8383_v35 = vpack.c.bf16 %v6562_v22, %v6561_v17 }
 0x7d4   :  { %v6255_v42 = vmax.f32 %v6145_v29, %v6200_v43 }
 0x7d5   :  { %v8349_v19 = vpack.c.bf16 %v6254_v8, %v6253_v57 }
 0x7d7   :  { %8350 = vmatpush1.bf16.msra.mxu1 %v8349_v19 }
 0x7d8   :  { %6490 = vmatprep.subr.mxu1 %v12419_v10  ;;  %v7645_v10 = vld [vmem:[%s12401_s6 + $0xa8] sm:$0xff] }
 0x7d9   :  { %v8359_v20 = vpack.c.bf16 %v7645_v10, %v7644_v24 }
 0x7db   :  { %7629 = vmatpush1.msk.msra.mxu1 %vm6327_vm5, %v6255_v42 }
 0x7dc   :  { %6511 = vmatmul.mubr.f32.vlgmr.msra.gmra.mrb[174].mxu1 %v6258_v50  ;;  %8352 = vmatprep.subr.bf16.mxu1 %v8351_v49 }
 0x7dd   :  { %7631 = vmatprep.mubr.msk.f32.mxu1 %vm6296_vm4, %v6263_v44  ;;  %8354 = vmatpush3.bf16.msra.mxu1 %v8351_v49 }
 0x7de   :  { %8356 = vmatprep.subr.bf16.mxu1 %v8355_v18 }
 0x7e0   :  { %6516 = vmatmul.mubr.f32.gmra.mrb[176].mxu1 %v6262_v28 }
 0x7e1   :  { %7632 = vmatprep.mubr.msk.f32.mxu1 %vm6296_vm4, %v6267_v33  ;;  %8358 = vmatpush3.bf16.msra.mxu1 %v8355_v18 }
 0x7e2   :  { %8360 = vmatprep.subr.bf16.mxu1 %v8359_v20 }
 0x7e4   :  { %6521 = vmatmul.mubr.f32.gmra.mrb[178].mxu1 %v6266_v62 }
 0x7e5   :  { %7633 = vmatprep.mubr.msk.f32.mxu1 %vm6296_vm4, %v6271_v27  ;;  %8362 = vmatpush3.bf16.msra.mxu1 %v8359_v20 }
 0x7e6   :  { %8364 = vmatprep.subr.bf16.mxu1 %v8363_v32 }
 0x7e8   :  { %6526 = vmatmul.mubr.f32.gmra.mrb[180].mxu1 %v6270_v5 }
 0x7e9   :  { %7634 = vmatprep.mubr.msk.f32.mxu1 %vm6296_vm4, %v6275_v59  ;;  %8366 = vmatpush3.bf16.msra.mxu1 %v8363_v32 }
 0x7ea   :  { %8368 = vmatprep.subr.bf16.mxu1 %v8367_v48 }
 0x7ec   :  { %6531 = vmatmul.mubr.f32.gmra.mrb[182].mxu1 %v6274_v2 }
 0x7ed   :  { %7635 = vmatprep.mubr.msk.f32.mxu1 %vm6296_vm4, %v6279_v54  ;;  %8370 = vmatpush3.bf16.msra.mxu1 %v8367_v48  ;;  %v6563_v54 = vld [vmem:[%s12401_s6 + $0x10] sm:$0xff] }
 0x7ee   :  { %8372 = vmatprep.subr.bf16.mxu1 %v8371_v1 }
 0x7f0   :  { %6536 = vmatmul.mubr.f32.gmra.mrb[184].mxu1 %v6278_v38  ;;  %v6564_v38 = vld [vmem:[%s12401_s6 + $0x18] sm:$0xff] }
 0x7f1   :  { %7636 = vmatprep.mubr.msk.f32.mxu1 %vm6296_vm4, %v6283_v26  ;;  %8374 = vmatpush3.bf16.msra.mxu1 %v8371_v1  ;;  %v8387_v21 = vpack.c.bf16 %v6564_v38, %v6563_v54  ;;  %v6567_v1 = vld [vmem:[%s12401_s6 + $0x30] sm:$0xff]  ;;  %v7671_v54 = vld [vmem:[%s12401_s6 + $0x178] sm:$0xff] }
 0x7f2   :  { %8376 = vmatprep.subr.bf16.mxu1 %v8375_v6 }
 0x7f4   :  { %6541 = vmatmul.mubr.f32.gmra.mrb[186].mxu1 %v6282_v31  ;;  %v6565_v31 = vld [vmem:[%s12401_s6 + $0x20] sm:$0xff] }
 0x7f5   :  { %7637 = vmatprep.mubr.msk.f32.mxu1 %vm6296_vm4, %v6287_v47  ;;  %8378 = vmatpush3.bf16.msra.mxu1 %v8375_v6  ;;  %v6566_v47 = vld [vmem:[%s12401_s6 + $0x28] sm:$0xff]  ;;  %v6569_v6 = vld [vmem:[%s12401_s6 + $0x40] sm:$0xff] }
 0x7f6   :  { %8380 = vmatprep.subr.bf16.mxu1 %v8379_v16 }
 0x7f8   :  { %6546 = vmatmul.mubr.f32.gmra.mrb[188].mxu1 %v6286_v56 }
 0x7f9   :  { %7638 = vmatprep.mubr.msk.f32.mxu1 %vm6296_vm4, %v6291_v36  ;;  %8382 = vmatpush3.bf16.msra.mxu1 %v8379_v16  ;;  %v8391_v36 = vpack.c.bf16 %v6566_v47, %v6565_v31  ;;  %v8399_v16 = vpack.c.bf16 %v6570_v61, %v6569_v6  ;;  %v7675_v31 = vld [vmem:[%s12401_s6 + $0x198] sm:$0xff] }
 0x7fa   :  { %8384 = vmatprep.subr.bf16.mxu1 %v8383_v35  ;;  %v7683_v6 = vld [vmem:[%s12401_s6 + $0x1d8] sm:$0xff] }
 0x7fc   :  { %6551 = vmatmul.mubr.f32.gmra.mrb[190].mxu1 %v6290_v58  ;;  %v6568_v58 = vld [vmem:[%s12401_s6 + $0x38] sm:$0xff] }
 0x7fd   :  { %7639 = vmatprep.mubr.msk.f32.mxu1 %vm6296_vm4, %v6295_v9 }
 0x800   :  { %6556 = vmatmul.mubr.f32.gmra.mrb[192].mxu1 %v6294_v45  ;;  %v8395_v45 = vpack.c.bf16 %v6568_v58, %v6567_v1  ;;  %v7679_v1 = vld [vmem:[%s12401_s6 + $0x1b8] sm:$0xff] }
 0x856   :  { %v7739_v39 = vpop.f32.mrb[154].mxu1 }
 0x857   :  { %v7740_v15 = vpop.f32.mrb[155].mxu1 }
 0x858   :  { %v7741_v41 = vadd.f32 %v7740_v15, %v7739_v39  ;;  %v6572_v39 = vld [vmem:[%s12401_s6 + $0x58] sm:$0xff] }
 0x85b   :  { %v7742_v23 = vpop.f32.mrb[156].mxu1 }
 0x85c   :  { %v7743_v63 = vpop.f32.mrb[157].mxu1 }
 0x85d   :  { %v7744_v51 = vadd.f32 %v7743_v63, %v7742_v23 }
 0x85f   :  { %v7745_v4 = vpop.f32.mrb[158].mxu1 }
 0x860   :  { %v7746_v46 = vpop.f32.mrb[159].mxu1 }
 0x861   :  { %v7747_v0 = vadd.f32 %v7746_v46, %v7745_v4  ;;  %v6574_v4 = vld [vmem:[%s12401_s6 + $0x68] sm:$0xff] }
 0x863   :  { %v7748_v3 = vpop.f32.mrb[160].mxu1 }
 0x864   :  { %v7749_v12 = vpop.f32.mrb[161].mxu1 }
 0x865   :  { %v7750_v11 = vadd.f32 %v7749_v12, %v7748_v3 }
 0x867   :  { %v7751_v57 = vpop.f32.mrb[162].mxu1 }
 0x868   :  { %v7752_v8 = vpop.f32.mrb[163].mxu1 }
 0x869   :  { %v7753_v19 = vadd.f32 %v7752_v8, %v7751_v57  ;;  %v6576_v57 = vld [vmem:[%s12401_s6 + $0x78] sm:$0xff] }
 0x86b   :  { %v7754_v7 = vpop.f32.mrb[164].mxu1 }
 0x86c   :  { %v7755_v25 = vpop.f32.mrb[165].mxu1 }
 0x86d   :  { %v7756_v29 = vadd.f32 %v7755_v25, %v7754_v7 }
 0x86f   :  { %v7757_v43 = vpop.f32.mrb[166].mxu1 }
 0x870   :  { %v7758_v37 = vpop.f32.mrb[167].mxu1 }
 0x871   :  { %v7759_v52 = vadd.f32 %v7758_v37, %v7757_v43  ;;  %v7657_v43 = vld [vmem:[%s12401_s6 + $0x108] sm:$0xff] }
 0x873   :  { %v7760_v49 = vpop.f32.mrb[168].mxu1 }
 0x874   :  { %v7761_v42 = vpop.f32.mrb[169].mxu1 }
 0x875   :  { %v7762_v50 = vadd.f32 %v7761_v42, %v7760_v49  ;;  %v7659_v49 = vld [vmem:[%s12401_s6 + $0x118] sm:$0xff] }
 0x877   :  { %v7763_v44 = vpop.f32.mrb[170].mxu1 }
 0x878   :  { %v7764_v18 = vpop.f32.mrb[171].mxu1 }
 0x879   :  { %v7765_v28 = vadd.f32 %v7764_v18, %v7763_v44  ;;  %v7661_v44 = vld [vmem:[%s12401_s6 + $0x128] sm:$0xff] }
 0x87b   :  { %v7766_v33 = vpop.f32.mrb[172].mxu1 }
 0x87c   :  { %v7767_v24 = vpop.f32.mrb[173].mxu1 }
 0x87d   :  { %v12173_v10 = vadd.f32 %v7767_v24, %v7766_v33  ;;  %v7663_v33 = vld [vmem:[%s12401_s6 + $0x138] sm:$0xff] }
 0x8af   :  { %v6512_v20 = vpop.f32.mrb[174].mxu1 }
 0x8b0   :  { %v6513_v62 = vadd.f32 %v7741_v41, %v6512_v20  ;;  %v6514_v27 = vpop.f32.mrb[175].mxu1  ;;  %v7665_v20 = vld [vmem:[%s12401_s6 + $0x148] sm:$0xff] }
 0x8b1   :  { %v7666_v27 = vld [vmem:[%s12401_s6 + $0x150] sm:$0xff] }
 0x8b3   :  { %v6517_v5 = vpop.f32.mrb[176].mxu1 }
 0x8b4   :  { %v12175_v59 = vadd.f32 %v7744_v51, %v6517_v5  ;;  %v6519_v13 = vpop.f32.mrb[177].mxu1  ;;  %v6573_v51 = vld [vmem:[%s12401_s6 + $0x60] sm:$0xff]  ;;  %v7667_v5 = vld [vmem:[%s12401_s6 + $0x158] sm:$0xff] }
 0x8b5   :  { %v7668_v13 = vld [vmem:[%s12401_s6 + $0x160] sm:$0xff] }
 0x8b7   :  { %v6522_v30 = vpop.f32.mrb[178].mxu1 }
 0x8b8   :  { %v6523_v32 = vadd.f32 %v7747_v0, %v6522_v30  ;;  %v6524_v2 = vpop.f32.mrb[179].mxu1  ;;  %v8407_v0 = vpack.c.bf16 %v6574_v4, %v6573_v51  ;;  %v7669_v30 = vld [vmem:[%s12401_s6 + $0x168] sm:$0xff]  ;;  %v7690_v51 = vld [vmem:[%s12401_s6 + $0x210] sm:$0xff]  ;;  %v7691_v4 = vld [vmem:[%s12401_s6 + $0x218] sm:$0xff] }
 0x8b9   :  { %v7670_v2 = vld [vmem:[%s12401_s6 + $0x170] sm:$0xff] }
 0x8ba   :  { %7927 = vmatprep.mubr.f32.mxu1 %v6523_v32  ;;  %v8439_v32 = vpack.c.bf16 %v7669_v30, %v7668_v13  ;;  %v8443_v38 = vpack.c.bf16 %v7671_v54, %v7670_v2  ;;  %v7043_v13 = vld [vmem:[#allocation7 + $0x30] sm:$0xff]  ;;  %v7044_v30 = vld [vmem:[#allocation7 + $0x38] sm:$0xff]  ;;  %v7045_v2 = vld [vmem:[#allocation7 + $0x40] sm:$0xff] }
 0x8bb   :  { %v6527_v26 = vpop.f32.mrb[180].mxu1  ;;  %v7046_v54 = vld [vmem:[#allocation7 + $0x48] sm:$0xff] }
 0x8bc   :  { %v6528_v40 = vadd.f32 %v7750_v11, %v6527_v26  ;;  %v6529_v48 = vpop.f32.mrb[181].mxu1  ;;  %v6575_v11 = vld [vmem:[%s12401_s6 + $0x70] sm:$0xff]  ;;  %v7672_v26 = vld [vmem:[%s12401_s6 + $0x180] sm:$0xff] }
 0x8bd   :  { %v7674_v48 = vld [vmem:[%s12401_s6 + $0x190] sm:$0xff] }
 0x8be   :  { %7928 = vmatmul.mubr.f32.vlgmr.msra.gmra.mrb[194].mxu1 %v6528_v40  ;;  %v7673_v40 = vld [vmem:[%s12401_s6 + $0x188] sm:$0xff]  ;;  %v8451_v47 = vpack.c.bf16 %v7675_v31, %v7674_v48  ;;  %v7049_v48 = vld [vmem:[#allocation7 + $0x60] sm:$0xff] }
 0x8bf   :  { %8386 = vmatpush3.bf16.msra.mxu1 %v8383_v35  ;;  %7962 = vmatprep.mubr.f32.mxu1 %v6513_v62  ;;  %v6532_v56 = vpop.f32.mrb[182].mxu1  ;;  %v6571_v35 = vld [vmem:[%s12401_s6 + $0x50] sm:$0xff] }
 0x8c0   :  { %8388 = vmatprep.subr.bf16.mxu1 %v8387_v21  ;;  %v6533_v60 = vadd.f32 %v7753_v19, %v6532_v56  ;;  %v6534_v53 = vpop.f32.mrb[183].mxu1  ;;  %v8403_v41 = vpack.c.bf16 %v6572_v39, %v6571_v35  ;;  %v8411_v19 = vpack.c.bf16 %v6576_v57, %v6575_v11  ;;  %v7676_v56 = vld [vmem:[%s12401_s6 + $0x1a0] sm:$0xff]  ;;  %v7687_v35 = vld [vmem:[%s12401_s6 + $0x1f8] sm:$0xff]  ;;  %v7694_v57 = vld [vmem:[%s12401_s6 + $0x230] sm:$0xff] }
 0x8c1   :  { %v7678_v53 = vld [vmem:[%s12401_s6 + $0x1b0] sm:$0xff] }
 0x8c2   :  { %v8459_v58 = vpack.c.bf16 %v7679_v1, %v7678_v53  ;;  %v7138_v53 = vld [vmem:[#allocation9 + $0x8] sm:$0xff] }
 0x8c3   :  { %8390 = vmatpush3.bf16.msra.mxu1 %v8387_v21  ;;  %v6537_v9 = vpop.f32.mrb[184].mxu1  ;;  %v8447_v21 = vpack.c.bf16 %v7673_v40, %v7672_v26  ;;  %v7047_v26 = vld [vmem:[#allocation7 + $0x50] sm:$0xff]  ;;  %v7048_v40 = vld [vmem:[#allocation7 + $0x58] sm:$0xff] }
 0x8c4   :  { %8392 = vmatprep.subr.bf16.mxu1 %v8391_v36  ;;  %v12195_v55 = vadd.f32 %v7756_v29, %v6537_v9  ;;  %v6539_v14 = vpop.f32.mrb[185].mxu1  ;;  %v7656_v29 = vld [vmem:[%s12401_s6 + $0x100] sm:$0xff] }
 0x8c5   :  { %v8415_v37 = vpack.c.bf16 %v7657_v43, %v7656_v29  ;;  %v7680_v9 = vld [vmem:[%s12401_s6 + $0x1c0] sm:$0xff]  ;;  %v7682_v14 = vld [vmem:[%s12401_s6 + $0x1d0] sm:$0xff]  ;;  %v7699_v43 = vld [vmem:[%s12401_s6 + $0x258] sm:$0xff] }
 0x8c6   :  { %v8467_v61 = vpack.c.bf16 %v7683_v6, %v7682_v14  ;;  %v7698_v29 = vld [vmem:[%s12401_s6 + $0x250] sm:$0xff]  ;;  %v7139_v6 = vld [vmem:[#allocation9 + $0x10] sm:$0xff] }
 0x8c7   :  { %8394 = vmatpush3.bf16.msra.mxu1 %v8391_v36  ;;  %v6542_v34 = vpop.f32.mrb[186].mxu1  ;;  %v7677_v36 = vld [vmem:[%s12401_s6 + $0x1a8] sm:$0xff] }
 0x8c8   :  { %8396 = vmatprep.subr.bf16.mxu1 %v8395_v45  ;;  %v12203_v17 = vadd.f32 %v7759_v52, %v6542_v34  ;;  %v6544_v22 = vpop.f32.mrb[187].mxu1  ;;  %v7658_v52 = vld [vmem:[%s12401_s6 + $0x110] sm:$0xff]  ;;  %v7684_v34 = vld [vmem:[%s12401_s6 + $0x1e0] sm:$0xff] }
 0x8c9   :  { %v8419_v42 = vpack.c.bf16 %v7659_v49, %v7658_v52  ;;  %v7686_v22 = vld [vmem:[%s12401_s6 + $0x1f0] sm:$0xff]  ;;  %v7700_v52 = vld [vmem:[%s12401_s6 + $0x260] sm:$0xff]  ;;  %v7701_v49 = vld [vmem:[%s12401_s6 + $0x268] sm:$0xff] }
 0x8ca   :  { %v8475_v39 = vpack.c.bf16 %v7687_v35, %v7686_v22  ;;  %v7141_v22 = vld [vmem:[#allocation9 + $0x20] sm:$0xff]  ;;  %v7142_v35 = vld [vmem:[#allocation9 + $0x28] sm:$0xff] }
 0x8cb   :  { %8398 = vmatpush3.bf16.msra.mxu1 %v8395_v45  ;;  %v6547_v15 = vpop.f32.mrb[188].mxu1  ;;  %v7681_v45 = vld [vmem:[%s12401_s6 + $0x1c8] sm:$0xff] }
 0x8cc   :  { %8400 = vmatprep.subr.bf16.mxu1 %v8399_v16  ;;  %v12211_v23 = vadd.f32 %v7762_v50, %v6547_v15  ;;  %v6549_v63 = vpop.f32.mrb[189].mxu1  ;;  %v7660_v50 = vld [vmem:[%s12401_s6 + $0x120] sm:$0xff] }
 0x8cd   :  { %v8423_v18 = vpack.c.bf16 %v7661_v44, %v7660_v50  ;;  %v7688_v15 = vld [vmem:[%s12401_s6 + $0x200] sm:$0xff]  ;;  %v7702_v50 = vld [vmem:[%s12401_s6 + $0x270] sm:$0xff]  ;;  %v7703_v44 = vld [vmem:[%s12401_s6 + $0x278] sm:$0xff] }
 0x8cf   :  { %8402 = vmatpush3.bf16.msra.mxu1 %v8399_v16  ;;  %v6552_v46 = vpop.f32.mrb[190].mxu1  ;;  %v7685_v16 = vld [vmem:[%s12401_s6 + $0x1e8] sm:$0xff] }
 0x8d0   :  { %8404 = vmatprep.subr.bf16.mxu1 %v8403_v41  ;;  %v12219_v3 = vadd.f32 %v7765_v28, %v6552_v46  ;;  %v6554_v12 = vpop.f32.mrb[191].mxu1  ;;  %v7662_v28 = vld [vmem:[%s12401_s6 + $0x130] sm:$0xff]  ;;  %v8483_v46 = vpack.c.bf16 %v7691_v4, %v7690_v51  ;;  %v7145_v51 = vld [vmem:[#allocation9 + $0x40] sm:$0xff]  ;;  %v7146_v4 = vld [vmem:[#allocation9 + $0x48] sm:$0xff] }
 0x8d1   :  { %v8427_v24 = vpack.c.bf16 %v7663_v33, %v7662_v28  ;;  %v7693_v12 = vld [vmem:[%s12401_s6 + $0x228] sm:$0xff]  ;;  %v7037_v28 = vld [vmem:[#allocation7] sm:$0xff]  ;;  %v7038_v33 = vld [vmem:[#allocation7 + $0x8] sm:$0xff] }
 0x8d3   :  { %8406 = vmatpush3.bf16.msra.mxu1 %v8403_v41  ;;  %v6557_v8 = vpop.f32.mrb[192].mxu1  ;;  %v7689_v41 = vld [vmem:[%s12401_s6 + $0x208] sm:$0xff] }
 0x8d4   :  { %8408 = vmatprep.subr.bf16.mxu1 %v8407_v0  ;;  %v12228_v7 = vadd.f32 %v12173_v10, %v6557_v8  ;;  %v6559_v25 = vpop.f32.mrb[193].mxu1  ;;  %v7664_v10 = vld [vmem:[%s12401_s6 + $0x140] sm:$0xff]  ;;  %v8479_v63 = vpack.c.bf16 %v7689_v41, %v7688_v15  ;;  %v7695_v8 = vld [vmem:[%s12401_s6 + $0x238] sm:$0xff]  ;;  %v7143_v15 = vld [vmem:[#allocation9 + $0x30] sm:$0xff] }
 0x8d5   :  { %v8431_v62 = vpack.c.bf16 %v7665_v20, %v7664_v10  ;;  %v7039_v10 = vld [vmem:[#allocation7 + $0x10] sm:$0xff]  ;;  %v7040_v20 = vld [vmem:[#allocation7 + $0x18] sm:$0xff] }
 0x8d6   :  { %v7144_v41 = vld [vmem:[#allocation9 + $0x38] sm:$0xff] }
 0x8d7   :  { %8410 = vmatpush3.bf16.msra.mxu1 %v8407_v0  ;;  %v7692_v0 = vld [vmem:[%s12401_s6 + $0x220] sm:$0xff] }
 0x8d8   :  { %8412 = vmatprep.subr.bf16.mxu1 %v8411_v19  ;;  %v8487_v11 = vpack.c.bf16 %v7693_v12, %v7692_v0  ;;  %v7147_v0 = vld [vmem:[#allocation9 + $0x50] sm:$0xff]  ;;  %v7148_v12 = vld [vmem:[#allocation9 + $0x58] sm:$0xff] }
 0x8db   :  { %8414 = vmatpush3.bf16.msra.mxu1 %v8411_v19  ;;  %v8491_v19 = vpack.c.bf16 %v7695_v8, %v7694_v57  ;;  %v7149_v57 = vld [vmem:[#allocation9 + $0x60] sm:$0xff]  ;;  %v7150_v8 = vld [vmem:[#allocation9 + $0x68] sm:$0xff] }
 0x8dc   :  { %8416 = vmatprep.subr.bf16.mxu1 %v8415_v37 }
 0x8de   :  { %7963 = vmatmul.mubr.f32.vlgmr.msra.gmra.mrb[194].mxu1 %v12175_v59  ;;  %v8435_v59 = vpack.c.bf16 %v7667_v5, %v7666_v27  ;;  %v7041_v27 = vld [vmem:[#allocation7 + $0x20] sm:$0xff]  ;;  %v7042_v5 = vld [vmem:[#allocation7 + $0x28] sm:$0xff] }
 0x8df   :  { %8418 = vmatpush3.bf16.msra.mxu1 %v8415_v37  ;;  %7997 = vmatprep.mubr.f32.mxu1 %v6533_v60  ;;  %v8455_v60 = vpack.c.bf16 %v7677_v36, %v7676_v56  ;;  %v8499_v37 = vpack.c.bf16 %v7699_v43, %v7698_v29  ;;  %v7052_v56 = vld [vmem:[#allocation7 + $0x78] sm:$0xff]  ;;  %v7705_v29 = vld [vmem:[%s12404_s9] ss:$0 sm:$0xff] }
 0x8e0   :  { %8420 = vmatprep.subr.bf16.mxu1 %v8419_v42 }
 0x8e3   :  { %8422 = vmatpush3.bf16.msra.mxu1 %v8419_v42  ;;  %v8503_v42 = vpack.c.bf16 %v7701_v49, %v7700_v52 }
 0x8e4   :  { %8424 = vmatprep.subr.bf16.mxu1 %v8423_v18 }
 0x8e7   :  { %8426 = vmatpush3.bf16.msra.mxu1 %v8423_v18  ;;  %v8507_v18 = vpack.c.bf16 %v7703_v44, %v7702_v50  ;;  %v7706_v44 = vld [vmem:[%s12406_s11] ss:$0 sm:$0xff] }
 0x8e8   :  { %8428 = vmatprep.subr.bf16.mxu1 %v8427_v24 }
 0x8eb   :  { %8430 = vmatpush3.bf16.msra.mxu1 %v8427_v24  ;;  %v8511_v24 = vpack.c.bf16 %v7038_v33, %v7037_v28 }
 0x8ec   :  { %8432 = vmatprep.subr.bf16.mxu1 %v8431_v62 }
 0x8ef   :  { %8434 = vmatpush3.bf16.msra.mxu1 %v8431_v62  ;;  %v8515_v62 = vpack.c.bf16 %v7040_v20, %v7039_v10 }
 0x8f0   :  { %8436 = vmatprep.subr.bf16.mxu1 %v8435_v59 }
 0x8f3   :  { %8438 = vmatpush3.bf16.msra.mxu1 %v8435_v59  ;;  %v8519_v59 = vpack.c.bf16 %v7042_v5, %v7041_v27 }
 0x8f4   :  { %8440 = vmatprep.subr.bf16.mxu1 %v8439_v32 }
 0x8f7   :  { %8442 = vmatpush3.bf16.msra.mxu1 %v8439_v32  ;;  %v8523_v32 = vpack.c.bf16 %v7044_v30, %v7043_v13 }
 0x8f8   :  { %8444 = vmatprep.subr.bf16.mxu1 %v8443_v38 }
 0x8fb   :  { %8446 = vmatpush3.bf16.msra.mxu1 %v8443_v38  ;;  %v8527_v38 = vpack.c.bf16 %v7046_v54, %v7045_v2 }
 0x8fc   :  { %8448 = vmatprep.subr.bf16.mxu1 %v8447_v21 }
 0x8fe   :  { %7998 = vmatmul.mubr.f32.vlgmr.msra.gmra.mrb[194].mxu1 %v12195_v55  ;;  %v8463_v55 = vpack.c.bf16 %v7681_v45, %v7680_v9 }
 0x8ff   :  { %8450 = vmatpush3.bf16.msra.mxu1 %v8447_v21  ;;  %8032 = vmatprep.mubr.f32.mxu1 %v12203_v17  ;;  %v8471_v17 = vpack.c.bf16 %v7685_v16, %v7684_v34  ;;  %v8531_v21 = vpack.c.bf16 %v7048_v40, %v7047_v26 }
 0x900   :  { %8452 = vmatprep.subr.bf16.mxu1 %v8451_v47 }
 0x903   :  { %8454 = vmatpush3.bf16.msra.mxu1 %v8451_v47  ;;  %v7051_v47 = vld [vmem:[#allocation7 + $0x70] sm:$0xff] }
 0x904   :  { %8456 = vmatprep.subr.bf16.mxu1 %v8455_v60  ;;  %v8539_v36 = vpack.c.bf16 %v7052_v56, %v7051_v47 }
 0x907   :  { %8458 = vmatpush3.bf16.msra.mxu1 %v8455_v60  ;;  %v7137_v60 = vld [vmem:[#allocation9] sm:$0xff] }
 0x908   :  { %8460 = vmatprep.subr.bf16.mxu1 %v8459_v58  ;;  %v8543_v1 = vpack.c.bf16 %v7138_v53, %v7137_v60 }
 0x90b   :  { %8462 = vmatpush3.bf16.msra.mxu1 %v8459_v58  ;;  %v7704_v58 = vld [vmem:[%s12402_s7] ss:$0 sm:$0xff] }
 0x90c   :  { %8464 = vmatprep.subr.bf16.mxu1 %v8463_v55 }
 0x90f   :  { %8466 = vmatpush3.bf16.msra.mxu1 %v8463_v55 }
 0x910   :  { %8468 = vmatprep.subr.bf16.mxu1 %v8467_v61 }
 0x913   :  { %8470 = vmatpush3.bf16.msra.mxu1 %v8467_v61  ;;  %v7140_v61 = vld [vmem:[#allocation9 + $0x18] sm:$0xff] }
 0x914   :  { %8472 = vmatprep.subr.bf16.mxu1 %v8471_v17 }
 0x917   :  { %8474 = vmatpush3.bf16.msra.mxu1 %v8471_v17  ;;  %v8547_v17 = vpack.c.bf16 %v7140_v61, %v7139_v6 }
 0x918   :  { %8476 = vmatprep.subr.bf16.mxu1 %v8475_v39 }
 0x91b   :  { %8478 = vmatpush3.bf16.msra.mxu1 %v8475_v39  ;;  %v8551_v39 = vpack.c.bf16 %v7142_v35, %v7141_v22 }
 0x91c   :  { %8480 = vmatprep.subr.bf16.mxu1 %v8479_v63 }
 0x91e   :  { %8033 = vmatmul.mubr.f32.vlgmr.msra.gmra.mrb[194].mxu1 %v12211_v23  ;;  %v7696_v23 = vld [vmem:[%s12401_s6 + $0x240] sm:$0xff] }
 0x91f   :  { %8482 = vmatpush3.bf16.msra.mxu1 %v8479_v63  ;;  %8067 = vmatprep.mubr.f32.mxu1 %v12219_v3  ;;  %v7697_v3 = vld [vmem:[%s12401_s6 + $0x248] sm:$0xff]  ;;  %v8555_v63 = vpack.c.bf16 %v7144_v41, %v7143_v15 }
 0x920   :  { %8484 = vmatprep.subr.bf16.mxu1 %v8483_v46  ;;  %v8495_v25 = vpack.c.bf16 %v7697_v3, %v7696_v23  ;;  %v7151_v23 = vld [vmem:[#allocation9 + $0x70] sm:$0xff]  ;;  %v7152_v3 = vld [vmem:[#allocation9 + $0x78] sm:$0xff] }
 0x923   :  { %8486 = vmatpush3.bf16.msra.mxu1 %v8483_v46  ;;  %v8559_v46 = vpack.c.bf16 %v7146_v4, %v7145_v51 }
 0x924   :  { %8488 = vmatprep.subr.bf16.mxu1 %v8487_v11 }
 0x927   :  { %8490 = vmatpush3.bf16.msra.mxu1 %v8487_v11  ;;  %v8563_v11 = vpack.c.bf16 %v7148_v12, %v7147_v0 }
 0x928   :  { %8492 = vmatprep.subr.bf16.mxu1 %v8491_v19 }
 0x92b   :  { %8494 = vmatpush3.bf16.msra.mxu1 %v8491_v19  ;;  %v8567_v19 = vpack.c.bf16 %v7150_v8, %v7149_v57 }
 0x92c   :  { %8496 = vmatprep.subr.bf16.mxu1 %v8495_v25 }
 0x92f   :  { %8498 = vmatpush3.bf16.msra.mxu1 %v8495_v25  ;;  %v8571_v25 = vpack.c.bf16 %v7152_v3, %v7151_v23 }
 0x930   :  { %8500 = vmatprep.subr.bf16.mxu1 %v8499_v37 }
 0x933   :  { %8502 = vmatpush3.bf16.msra.mxu1 %v8499_v37 }
 0x934   :  { %8504 = vmatprep.subr.bf16.mxu1 %v8503_v42 }
 0x937   :  { %8506 = vmatpush3.bf16.msra.mxu1 %v8503_v42 }
 0x938   :  { %8508 = vmatprep.subr.bf16.mxu1 %v8507_v18 }
 0x93b   :  { %8510 = vmatpush3.bf16.msra.mxu1 %v8507_v18 }
 0x93c   :  { %8512 = vmatprep.subr.bf16.mxu1 %v8511_v24 }
 0x93e   :  { %8068 = vmatmul.mubr.f32.vlgmr.msra.gmra.mrb[194].mxu1 %v12228_v7  ;;  %v7050_v7 = vld [vmem:[#allocation7 + $0x68] sm:$0xff] }
 0x93f   :  { %8514 = vmatpush3.bf16.msra.mxu1 %v8511_v24  ;;  %v8535_v31 = vpack.c.bf16 %v7050_v7, %v7049_v48 }
 0x940   :  { %8516 = vmatprep.subr.bf16.mxu1 %v8515_v62 }
 0x943   :  { %8518 = vmatpush3.bf16.msra.mxu1 %v8515_v62 }
 0x944   :  { %8520 = vmatprep.subr.bf16.mxu1 %v8519_v59 }
 0x947   :  { %8522 = vmatpush3.bf16.msra.mxu1 %v8519_v59 }
 0x948   :  { %8524 = vmatprep.subr.bf16.mxu1 %v8523_v32 }
 0x94b   :  { %8526 = vmatpush3.bf16.msra.mxu1 %v8523_v32 }
 0x94c   :  { %8528 = vmatprep.subr.bf16.mxu1 %v8527_v38 }
 0x94f   :  { %8530 = vmatpush3.bf16.msra.mxu1 %v8527_v38 }
 0x950   :  { %8532 = vmatprep.subr.bf16.mxu1 %v8531_v21 }
 0x953   :  { %8534 = vmatpush3.bf16.msra.mxu1 %v8531_v21 }
 0x954   :  { %8536 = vmatprep.subr.bf16.mxu1 %v8535_v31 }
 0x957   :  { %8538 = vmatpush3.bf16.msra.mxu1 %v8535_v31 }
 0x958   :  { %8540 = vmatprep.subr.bf16.mxu1 %v8539_v36 }
 0x95b   :  { %8542 = vmatpush3.bf16.msra.mxu1 %v8539_v36 }
 0x95c   :  { %8544 = vmatprep.subr.bf16.mxu1 %v8543_v1 }
 0xa11   :  { %v8069_v9 = vpop.f32.mrb[194].mxu1 }
 0xa12   :  { %v7034_v45 = vadd.f32 %v8069_v9, %v7704_v58  ;;  %v7015_v55 = vpop.f32.mrb[195].mxu1 }
 0xa13   :  { %v7033_v14 = vadd.f32 %v7704_v58, %v7015_v55 }
 0xa14   :  { %v7036_v16 = vmax.f32 %v7034_v45, 0.0 }
 0xa15   :  { %v7035_v34 = vmax.f32 %v7033_v14, 0.0 }
 0xa17   :  { %8102 = vmatprep.mubr.f32.mxu1 %v7035_v34 }
 0xa18   :  { %8103 = vmatmul.mubr.f32.vlgmr.msra.gmra.mrb[196].mxu1 %v7036_v16 }
 0xa19   :  { %8546 = vmatpush3.bf16.msra.mxu1 %v8543_v1 }
 0xa1a   :  { %8548 = vmatprep.subr.bf16.mxu1 %v8547_v17 }
 0xa1d   :  { %8550 = vmatpush3.bf16.msra.mxu1 %v8547_v17 }
 0xa1e   :  { %8552 = vmatprep.subr.bf16.mxu1 %v8551_v39 }
 0xa21   :  { %8554 = vmatpush3.bf16.msra.mxu1 %v8551_v39 }
 0xa22   :  { %8556 = vmatprep.subr.bf16.mxu1 %v8555_v63 }
 0xa25   :  { %8558 = vmatpush3.bf16.msra.mxu1 %v8555_v63 }
 0xa26   :  { %8560 = vmatprep.subr.bf16.mxu1 %v8559_v46 }
 0xa29   :  { %8562 = vmatpush3.bf16.msra.mxu1 %v8559_v46 }
 0xa2a   :  { %8564 = vmatprep.subr.bf16.mxu1 %v8563_v11 }
 0xa2d   :  { %8566 = vmatpush3.bf16.msra.mxu1 %v8563_v11 }
 0xa2e   :  { %8568 = vmatprep.subr.bf16.mxu1 %v8567_v19 }
 0xa31   :  { %8570 = vmatpush3.bf16.msra.mxu1 %v8567_v19 }
 0xa32   :  { %8572 = vmatprep.subr.bf16.mxu1 %v8571_v25 }
 0xa35   :  { %8574 = vmatpush3.bf16.msra.mxu1 %v8571_v25 }
 0xaeb   :  { %v8104_v43 = vpop.f32.mrb[196].mxu1 }
 0xaec   :  { %v7132_v37 = vadd.f32 %v8104_v43, %v7705_v29  ;;  %v7126_v52 = vpop.f32.mrb[197].mxu1 }
 0xaed   :  { %v7127_v49 = vadd.f32 %v7705_v29, %v7126_v52 }
 0xaee   :  { %v7136_v50 = vmax.f32 %v7132_v37, 0.0 }
 0xaef   :  { %v7135_v42 = vmax.f32 %v7127_v49, 0.0 }
 0xaf1   :  { %8137 = vmatprep.mubr.f32.mxu1 %v7135_v42 }
 0xaf2   :  { %8138 = vmatmul.mubr.f32.vlgmr.msra.gmra.mrb[198].mxu1 %v7136_v50 }
 0xbc5   :  { %v8139_v18 = vpop.f32.mrb[198].mxu1 }
 0xbc6   :  { %v7232_v28 = vadd.f32 %v8139_v18, %v7706_v44  ;;  %v7226_v33 = vpop.f32.mrb[199].mxu1 }
 0xbc7   :  { %v7227_v24 = vadd.f32 %v7706_v44, %v7226_v33 }
 0xbc8   :  { %7236 = vst [vmem:[%s12407_s12 + $0x8] sm:$0xff] %v7232_v28 }
 0xbc9   :  { %7235 = vst [vmem:[%s12407_s12] sm:$0xff] %v7227_v24 }
 0xbca   :  { %7241 = vsyncpa [#allocation6], 1 }
 0xbcb   :  { %7242 = vsyncpa [#allocation8], 1 }

</bundles_post_ra>
